<compile_context>
chip_gen: v7x
topology: tpu7x:2x2x1
jax: 0.10.0
libtpu: 0.0.40
codegen_flags: <defaults>
</compile_context>

<pallas_src>
import functools

import jax
import jax.numpy as jnp
from jax import lax
from jax.experimental import pallas as pl
from jax.experimental.pallas import tpu as pltpu


# ------------------------------ in-kernel math ------------------------------ #

def _silu(y):
    # y * sigmoid(y); reciprocal routed to the EUP (approx) to stay off the VALU.
    return y * pl.reciprocal(1.0 + jnp.exp(-y), approx=True)


def _gsconv_compute(x_ref, w1_ref, b1_ref, w2_ref, b2_ref, mask_ref,
                    x1_sc, x2_sc, *, k, Wp, P1, P2):
    """Fused Conv(kxk)+BN+SiLU -> 5x5 depthwise+BN+SiLU for one image tile."""
    m = x1_sc.shape[0]

    # cv1: k*k matmul-accumulates (MXU), taps = static lane slices of the padded
    # flattened input, f32 accumulator.
    acc = jnp.zeros((m, P1), jnp.float32)
    for kh in range(k):
        for kw in range(k):
            tap = x_ref[:, pl.ds(kh * Wp + kw, P1)]              # (Cin, P1)
            acc = acc + jnp.dot(w1_ref[kh, kw], tap,
                                preferred_element_type=jnp.float32)
    # mask zeroes the extended-frame halo (reference zero-pads cv1's output).
    x1_sc[...] = _silu(acc + b1_ref[...]) * mask_ref[...]

    # cv2: 5x5 depthwise, 25 shifted VMEM slices, per-channel scalar MAC (VPU).
    acc2 = jnp.zeros((m, P2), jnp.float32)
    for i in range(5):
        for j in range(5):
            t = i * 5 + j
            acc2 = acc2 + x1_sc[:, pl.ds(i * Wp + j, P2)] * w2_ref[:, t:t + 1]
    x2_sc[...] = _silu(acc2 + b2_ref[...])


def _write_shuffled(o_ref, x1_sc, x2_sc, *, Wp, P2, plan):
    # GSConv channel shuffle: weights were pre-permuted even/odd at prep time, so
    # the shuffled concat is just 4 contiguous channel-chunk stores.
    x1c_off = 2 * Wp + 2                       # crop the 2-halo of the cv1 frame
    for dst, which, lo, hi in plan:
        n = hi - lo
        if which == 0:                         # cv1 branch
            chunk = x1_sc[lo:hi, pl.ds(x1c_off, P2)]
        else:                                  # depthwise branch
            chunk = x2_sc[lo:hi, :]
        o_ref[dst:dst + n, :] = chunk.astype(o_ref.dtype)


def _gsconv_kernel(x_ref, w1_ref, b1_ref, w2_ref, b2_ref, mask_ref, o_ref,
                   x1_sc, x2_sc, *, k, Wp, P1, P2, plan):
    _gsconv_compute(x_ref, w1_ref, b1_ref, w2_ref, b2_ref, mask_ref,
                    x1_sc, x2_sc, k=k, Wp=Wp, P1=P1, P2=P2)
    _write_shuffled(o_ref, x1_sc, x2_sc, Wp=Wp, P2=P2, plan=plan)


def _gsconv_shortcut_kernel(x_ref, xs_ref, w1_ref, b1_ref, w2_ref, b2_ref,
                            mask_ref, wsc_ref, bsc_ref, o_ref,
                            x1_sc, x2_sc, *, k, Wp, P1, P2, plan):
    _gsconv_compute(x_ref, w1_ref, b1_ref, w2_ref, b2_ref, mask_ref,
                    x1_sc, x2_sc, k=k, Wp=Wp, P1=P1, P2=P2)
    _write_shuffled(o_ref, x1_sc, x2_sc, Wp=Wp, P2=P2, plan=plan)
    # fused shortcut Conv(c1, c2, 1, act=False) + residual add, same flat frame.
    s = jnp.dot(wsc_ref[...], xs_ref[...],
                preferred_element_type=jnp.float32) + bsc_ref[...]
    o_ref[...] = (o_ref[...].astype(jnp.float32) + s).astype(o_ref.dtype)


# ------------------------- frame / plan / call helpers ----------------------- #

def _chunk_plan(m):
    """Static (dst_off, branch, lo, hi) chunks realizing shuffle(concat(x1, x2))
    given that the conv output channels were pre-permuted even-then-odd."""
    ne = (m + 1) // 2
    if m % 2 == 0:
        src = [(0, 0, ne), (1, 0, ne), (0, ne, m), (1, ne, m)]
    else:
        src = [(0, 0, ne), (1, ne, m), (0, ne, m), (1, 0, ne)]
    plan, off = [], 0
    for which, lo, hi in src:
        plan.append((off, which, lo, hi))
        off += hi - lo
    return tuple(plan)


def _frame_dims(k, H, W):
    pt = k // 2 + 2                      # conv halo + 2 for the 5x5 depthwise
    Hp, Wp = H + 2 * pt, W + 2 * pt
    L = Hp * Wp + (k + 3)                # flat length (+slack so all taps fit)
    P1 = (H + 4) * Wp + 4                # cv1 extended frame
    P2 = H * Wp                          # output frame (valid cols [0, W))
    return pt, Hp, Wp, L, P1, P2


def _halo_mask(H, W, Wp, P1):
    pos = jnp.arange(P1, dtype=jnp.int32)
    row, col = pos // Wp, pos % Wp
    valid = (row >= 2) & (row < 2 + H) & (col >= 2) & (col < 2 + W)
    return valid.astype(jnp.float32).reshape(1, P1)


def _compiler_params():
    return pltpu.CompilerParams(dimension_semantics=("parallel",),
                                vmem_limit_bytes=32 * 1024 * 1024)


def gsconv_fused(xflat, w1, b1, w2, b2, mask, *, k, H, W):
    B, cin, L = xflat.shape
    m = w1.shape[2]
    _, _, Wp, Lc, P1, P2 = _frame_dims(k, H, W)
    assert L == Lc
    kern = functools.partial(_gsconv_kernel, k=k, Wp=Wp, P1=P1, P2=P2,
                             plan=_chunk_plan(m))
    return pl.pallas_call(
        kern,
        out_shape=jax.ShapeDtypeStruct((B, 2 * m, P2), xflat.dtype),
        grid=(B,),
        in_specs=[
            pl.BlockSpec((None, cin, L), lambda b: (b, 0, 0)),
            pl.BlockSpec(w1.shape, lambda b: (0, 0, 0, 0)),
            pl.BlockSpec(b1.shape, lambda b: (0, 0)),
            pl.BlockSpec(w2.shape, lambda b: (0, 0)),
            pl.BlockSpec(b2.shape, lambda b: (0, 0)),
            pl.BlockSpec(mask.shape, lambda b: (0, 0)),
        ],
        out_specs=pl.BlockSpec((None, 2 * m, P2), lambda b: (b, 0, 0)),
        scratch_shapes=[pltpu.VMEM((m, P1), jnp.float32),
                        pltpu.VMEM((m, P2), jnp.float32)],
        compiler_params=_compiler_params(),
    )(xflat, w1, b1, w2, b2, mask)


def gsconv_shortcut_fused(xflat, xsflat, w1, b1, w2, b2, mask, wsc, bsc, *, k, H, W):
    B, cin, L = xflat.shape
    m = w1.shape[2]
    c2 = wsc.shape[0]
    _, _, Wp, Lc, P1, P2 = _frame_dims(k, H, W)
    assert L == Lc and 2 * m == c2
    kern = functools.partial(_gsconv_shortcut_kernel, k=k, Wp=Wp, P1=P1, P2=P2,
                             plan=_chunk_plan(m))
    return pl.pallas_call(
        kern,
        out_shape=jax.ShapeDtypeStruct((B, c2, P2), xflat.dtype),
        grid=(B,),
        in_specs=[
            pl.BlockSpec((None, cin, L), lambda b: (b, 0, 0)),
            pl.BlockSpec((None, wsc.shape[1], P2), lambda b: (b, 0, 0)),
            pl.BlockSpec(w1.shape, lambda b: (0, 0, 0, 0)),
            pl.BlockSpec(b1.shape, lambda b: (0, 0)),
            pl.BlockSpec(w2.shape, lambda b: (0, 0)),
            pl.BlockSpec(b2.shape, lambda b: (0, 0)),
            pl.BlockSpec(mask.shape, lambda b: (0, 0)),
            pl.BlockSpec(wsc.shape, lambda b: (0, 0)),
            pl.BlockSpec(bsc.shape, lambda b: (0, 0)),
        ],
        out_specs=pl.BlockSpec((None, c2, P2), lambda b: (b, 0, 0)),
        scratch_shapes=[pltpu.VMEM((m, P1), jnp.float32),
                        pltpu.VMEM((m, P2), jnp.float32)],
        compiler_params=_compiler_params(),
    )(xflat, xsflat, w1, b1, w2, b2, mask, wsc, bsc)


# ------------------------------ module forward ------------------------------ #

def gs_bottleneck(x_nchw, kp):
    """GSBottleneck forward.  x: (B, C1, H, W) NCHW, returns (B, C2, H, W) NCHW."""
    B, C1, H, W = x_nchw.shape
    x = x_nchw

    # ---- GSConv(c1, c_, k=1, s=1) ----
    # Note: for very large feature maps add an H-band grid axis with a manual halo
    # DMA; at typical neck sizes a whole image per grid step fits VMEM comfortably.
    k1 = 1
    pt1, Hp1, Wp1, L1, P1_1, _ = _frame_dims(k1, H, W)
    xp = jnp.pad(x, ((0, 0), (0, 0), (pt1, pt1), (pt1, pt1)))
    xpf = jnp.pad(xp.reshape(B, C1, Hp1 * Wp1),
                  ((0, 0), (0, 0), (0, L1 - Hp1 * Wp1)))
    mask1 = _halo_mask(H, W, Wp1, P1_1)
    tflat = gsconv_fused(xpf, kp['g1_w1'], kp['g1_b1'], kp['g1_w2'], kp['g1_b2'],
                         mask1, k=k1, H=H, W=W)
    c_ = tflat.shape[1]
    t = tflat.reshape(B, c_, H, Wp1)[..., :W]        # strip frame pad columns

    # ---- GSConv(c_, c2, k=3, s=1) + shortcut Conv(c1, c2, 1, act=False) + add ----
    k2 = 3
    pt2, Hp2, Wp2, L2, P1_2, _ = _frame_dims(k2, H, W)
    tp = jnp.pad(t, ((0, 0), (0, 0), (pt2, pt2), (pt2, pt2)))
    tpf = jnp.pad(tp.reshape(B, c_, Hp2 * Wp2),
                  ((0, 0), (0, 0), (0, L2 - Hp2 * Wp2)))
    xsf = jnp.pad(x, ((0, 0), (0, 0), (0, 0), (0, Wp2 - W))).reshape(B, C1, H * Wp2)
    mask2 = _halo_mask(H, W, Wp2, P1_2)
    outflat = gsconv_shortcut_fused(tpf, xsf,
                                    kp['g2_w1'], kp['g2_b1'], kp['g2_w2'], kp['g2_b2'],
                                    mask2, kp['sc_w'], kp['sc_b'],
                                    k=k2, H=H, W=W)
    c2 = outflat.shape[1]
    return outflat.reshape(B, c2, H, Wp2)[..., :W]


# ----------------------- deterministic parameter init ----------------------- #

def _fold_bn(key, w, cout, eps=1e-5):
    """Fold eval-mode BatchNorm2d into conv weight (last dim = out-channels) + bias."""
    kg, kb, km, kv = jax.random.split(key, 4)
    gamma = 1.0 + 0.1 * jax.random.normal(kg, (cout,), jnp.float32)
    beta = 0.1 * jax.random.normal(kb, (cout,), jnp.float32)
    mean = 0.1 * jax.random.normal(km, (cout,), jnp.float32)
    var = 0.5 + jnp.abs(jax.random.normal(kv, (cout,), jnp.float32))
    scale = gamma / jnp.sqrt(var + eps)
    return (w * scale).astype(jnp.float32), (beta - mean * scale).astype(jnp.float32)


def init_params(key, c1, c2):
    """Reference-layout folded Conv+BN weights (HWIO dense, (5,5,C) depthwise)."""
    c_ = int(c2 * 0.5)
    g1 = c_ // 2           # GSConv1 hidden channels
    g2 = c2 // 2           # GSConv2 hidden channels
    keys = jax.random.split(key, 10)
    p = {}
    w = 0.3 * jax.random.normal(keys[0], (1, 1, c1, g1), jnp.float32)
    p['g1c1_w'], p['g1c1_b'] = _fold_bn(keys[1], w, g1)
    w = 0.3 * jax.random.normal(keys[2], (5, 5, g1), jnp.float32)
    p['g1c2_w'], p['g1c2_b'] = _fold_bn(keys[3], w, g1)
    w = 0.3 * jax.random.normal(keys[4], (3, 3, c_, g2), jnp.float32)
    p['g2c1_w'], p['g2c1_b'] = _fold_bn(keys[5], w, g2)
    w = 0.3 * jax.random.normal(keys[6], (5, 5, g2), jnp.float32)
    p['g2c2_w'], p['g2c2_b'] = _fold_bn(keys[7], w, g2)
    w = 0.3 * jax.random.normal(keys[8], (1, 1, c1, c2), jnp.float32)
    p['sc_w'], p['sc_b'] = _fold_bn(keys[9], w, c2)
    return p


def _prep_gsconv(w1, b1, w2, b2):
    """Kernel-layout GSConv weights with the channel shuffle folded in (even-then-
    odd output-channel permutation, applied identically to the depthwise)."""
    m = w1.shape[-1]
    sig = jnp.asarray(list(range(0, m, 2)) + list(range(1, m, 2)))
    w1k = jnp.take(jnp.transpose(w1, (0, 1, 3, 2)), sig, axis=2)       # (k,k,m,cin)
    b1k = jnp.take(b1, sig, axis=0).reshape(m, 1)
    w2k = jnp.transpose(jnp.take(w2.reshape(25, m), sig, axis=1), (1, 0))  # (m,25)
    b2k = jnp.take(b2, sig, axis=0).reshape(m, 1)
    return w1k, b1k, w2k, b2k


def prepare_kernel_params(p):
    kp = {}
    kp['g1_w1'], kp['g1_b1'], kp['g1_w2'], kp['g1_b2'] = _prep_gsconv(
        p['g1c1_w'], p['g1c1_b'], p['g1c2_w'], p['g1c2_b'])
    kp['g2_w1'], kp['g2_b1'], kp['g2_w2'], kp['g2_b2'] = _prep_gsconv(
        p['g2c1_w'], p['g2c1_b'], p['g2c2_w'], p['g2c2_b'])
    c1, c2 = p['sc_w'].shape[2], p['sc_w'].shape[3]
    kp['sc_w'] = jnp.transpose(p['sc_w'].reshape(c1, c2), (1, 0))      # (c2, c1)
    kp['sc_b'] = p['sc_b'].reshape(c2, 1)
    return kp


# ----------------------------- plain-JAX reference --------------------------- #

def _conv_ref(x, w_hwio, b, groups=1):
    dn = lax.conv_dimension_numbers(x.shape, w_hwio.shape, ('NCHW', 'HWIO', 'NCHW'))
    y = lax.conv_general_dilated(x, w_hwio, (1, 1), 'SAME',
                                 dimension_numbers=dn, feature_group_count=groups)
    return y + b.reshape(1, -1, 1, 1)


def _gsconv_ref(x, w1, b1, w2, b2):
    x1 = jax.nn.silu(_conv_ref(x, w1, b1))
    dw = w2.reshape(w2.shape[0], w2.shape[1], 1, w2.shape[2])
    x2 = jax.nn.silu(_conv_ref(x1, dw, b2, groups=x1.shape[1]))
    cat = jnp.concatenate([x1, x2], axis=1)
    return jnp.concatenate([cat[:, 0::2], cat[:, 1::2]], axis=1)


def gs_bottleneck_ref(x, p):
    t = _gsconv_ref(x, p['g1c1_w'], p['g1c1_b'], p['g1c2_w'], p['g1c2_b'])
    u = _gsconv_ref(t, p['g2c1_w'], p['g2c1_b'], p['g2c2_w'], p['g2c2_b'])
    s = _conv_ref(x, p['sc_w'], p['sc_b'])
    return u + s


# ---------------------------------- main ------------------------------------ #

if __name__ == "__main__":
    key = jax.random.PRNGKey(0)
    kx, kpar = jax.random.split(key)

    c1, c2 = 4, 8
    B, H, W = 2, 16, 16
    x = jax.random.normal(kx, (B, c1, H, W), jnp.float32)     # NCHW, like PyTorch
    params = init_params(kpar, c1, c2)
    kparams = prepare_kernel_params(params)

    fwd = jax.jit(gs_bottleneck)
    out = jax.block_until_ready(fwd(x, kparams))
    assert out.shape == (B, c2, H, W), out.shape
    assert out.dtype == jnp.float32

    # sanity check vs. plain-JAX reference (loose tol: kernels use the EUP's
    # approximate reciprocal inside SiLU).
    ref = gs_bottleneck_ref(x, params)
    err = float(jnp.max(jnp.abs(out - ref)))
    scale = float(jnp.max(jnp.abs(ref))) + 1.0
    assert err <= 5e-2 * scale, (err, scale)

    print("KERNEL_OK")
</pallas_src>

<mosaic_0001>
module attributes {stable_mosaic.version = 11 : i64} {
  func.func @_gsconv_kernel(%arg0: i32, %arg1: memref<1x4x404xf32, #tpu.memory_space<vmem>>, %arg2: memref<1x1x2x4xf32, #tpu.memory_space<vmem>>, %arg3: memref<2x1xf32, #tpu.memory_space<vmem>>, %arg4: memref<2x25xf32, #tpu.memory_space<vmem>>, %arg5: memref<2x1xf32, #tpu.memory_space<vmem>>, %arg6: memref<1x404xf32, #tpu.memory_space<vmem>>, %arg7: memref<1x4x320xf32, #tpu.memory_space<vmem>>, %arg8: memref<2x404xf32, #tpu.memory_space<vmem>>, %arg9: memref<2x320xf32, #tpu.memory_space<vmem>>) attributes {dimension_semantics = [#tpu.dimension_semantics<parallel>], iteration_bounds = array<i64: 2>, scalar_prefetch = 0 : i64, scratch_operands = 2 : i64, tpu.core_type = #tpu.core_type<tc>, window_params = [{transform_indices = @transform_0, window_bounds = array<i64: 1, 4, 404>}, {pipeline_mode = #tpu.pipeline_mode<synchronous>, transform_indices = @transform_1, window_bounds = array<i64: 1, 1, 2, 4>}, {pipeline_mode = #tpu.pipeline_mode<synchronous>, transform_indices = @transform_2, window_bounds = array<i64: 2, 1>}, {pipeline_mode = #tpu.pipeline_mode<synchronous>, transform_indices = @transform_3, window_bounds = array<i64: 2, 25>}, {pipeline_mode = #tpu.pipeline_mode<synchronous>, transform_indices = @transform_4, window_bounds = array<i64: 2, 1>}, {pipeline_mode = #tpu.pipeline_mode<synchronous>, transform_indices = @transform_5, window_bounds = array<i64: 1, 404>}, {transform_indices = @transform_6, window_bounds = array<i64: 1, 4, 320>}]} {
    %cst = arith.constant 0.000000e+00 : f32
    %0 = vector.broadcast %cst : f32 to vector<2x404xf32>
    %c0 = arith.constant 0 : index
    %c0_0 = arith.constant 0 : index
    %c0_1 = arith.constant 0 : index
    %1 = vector.load %arg1[%c0, %c0_0, %c0_1] : memref<1x4x404xf32, #tpu.memory_space<vmem>>, vector<1x4x404xf32>
    %2 = vector.shape_cast %1 : vector<1x4x404xf32> to vector<4x404xf32>
    %c0_2 = arith.constant 0 : index
    %c0_3 = arith.constant 0 : index
    %c0_4 = arith.constant 0 : index
    %c0_5 = arith.constant 0 : index
    %3 = vector.load %arg2[%c0_2, %c0_3, %c0_4, %c0_5] : memref<1x1x2x4xf32, #tpu.memory_space<vmem>>, vector<1x1x2x4xf32>
    %4 = vector.shape_cast %3 : vector<1x1x2x4xf32> to vector<2x4xf32>
    %cst_6 = arith.constant dense<0.000000e+00> : vector<2x404xf32>
    %5 = tpu.matmul %4, %2, %cst_6 {dimension_numbers = #tpu.dot_dimension_numbers<[1], [0], [0], [1], [0, 0, 1, 1], [], []>} : vector<2x4xf32>, vector<4x404xf32>, vector<2x404xf32> -> vector<2x404xf32>
    %6 = arith.addf %0, %5 : vector<2x404xf32>
    %c0_7 = arith.constant 0 : index
    %c0_8 = arith.constant 0 : index
    %7 = vector.load %arg3[%c0_7, %c0_8] : memref<2x1xf32, #tpu.memory_space<vmem>>, vector<2x1xf32>
    %8 = vector.broadcast %7 : vector<2x1xf32> to vector<2x404xf32>
    %9 = arith.addf %6, %8 : vector<2x404xf32>
    %cst_9 = arith.constant 0.000000e+00 : f32
    %10 = vector.broadcast %cst_9 : f32 to vector<2x404xf32>
    %11 = arith.subf %10, %9 : vector<2x404xf32>
    %12 = math.exp %11 : vector<2x404xf32>
    %cst_10 = arith.constant 1.000000e+00 : f32
    %13 = vector.broadcast %cst_10 : f32 to vector<2x404xf32>
    %14 = arith.addf %13, %12 : vector<2x404xf32>
    %15 = tpu.reciprocal %14 {approx = true} : vector<2x404xf32> -> vector<2x404xf32>
    %16 = arith.mulf %9, %15 : vector<2x404xf32>
    %c0_11 = arith.constant 0 : index
    %c0_12 = arith.constant 0 : index
    %17 = vector.load %arg6[%c0_11, %c0_12] : memref<1x404xf32, #tpu.memory_space<vmem>>, vector<1x404xf32>
    %18 = vector.broadcast %17 : vector<1x404xf32> to vector<2x404xf32>
    %19 = arith.mulf %16, %18 : vector<2x404xf32>
    %c0_13 = arith.constant 0 : index
    %c0_14 = arith.constant 0 : index
    %20 = vector.load %arg8[%c0_13, %c0_14] : memref<2x404xf32, #tpu.memory_space<vmem>>, vector<2x404xf32>
    tpu.vector_store %arg8[%c0_13, %c0_14], %19 {strides = array<i32>} : memref<2x404xf32, #tpu.memory_space<vmem>>, vector<2x404xf32>,
    %cst_15 = arith.constant 0.000000e+00 : f32
    %21 = vector.broadcast %cst_15 : f32 to vector<2x320xf32>
    %c0_16 = arith.constant 0 : index
    %c0_17 = arith.constant 0 : index
    %22 = vector.load %arg8[%c0_16, %c0_17] : memref<2x404xf32, #tpu.memory_space<vmem>>, vector<2x320xf32>
    %c0_18 = arith.constant 0 : index
    %c0_19 = arith.constant 0 : index
    %23 = vector.load %arg4[%c0_18, %c0_19] : memref<2x25xf32, #tpu.memory_space<vmem>>, vector<2x1xf32>
    %24 = vector.broadcast %23 : vector<2x1xf32> to vector<2x320xf32>
    %25 = arith.mulf %22, %24 : vector<2x320xf32>
    %26 = arith.addf %21, %25 : vector<2x320xf32>
    %c0_20 = arith.constant 0 : index
    %c1 = arith.constant 1 : index
    %27 = vector.load %arg8[%c0_20, %c1] : memref<2x404xf32, #tpu.memory_space<vmem>>, vector<2x320xf32>
    %c0_21 = arith.constant 0 : index
    %c1_22 = arith.constant 1 : index
    %28 = vector.load %arg4[%c0_21, %c1_22] : memref<2x25xf32, #tpu.memory_space<vmem>>, vector<2x1xf32>
    %29 = vector.broadcast %28 : vector<2x1xf32> to vector<2x320xf32>
    %30 = arith.mulf %27, %29 : vector<2x320xf32>
    %31 = arith.addf %26, %30 : vector<2x320xf32>
    %c0_23 = arith.constant 0 : index
    %c2 = arith.constant 2 : index
    %32 = vector.load %arg8[%c0_23, %c2] : memref<2x404xf32, #tpu.memory_space<vmem>>, vector<2x320xf32>
    %c0_24 = arith.constant 0 : index
    %c2_25 = arith.constant 2 : index
    %33 = vector.load %arg4[%c0_24, %c2_25] : memref<2x25xf32, #tpu.memory_space<vmem>>, vector<2x1xf32>
    %34 = vector.broadcast %33 : vector<2x1xf32> to vector<2x320xf32>
    %35 = arith.mulf %32, %34 : vector<2x320xf32>
    %36 = arith.addf %31, %35 : vector<2x320xf32>
    %c0_26 = arith.constant 0 : index
    %c3 = arith.constant 3 : index
    %37 = vector.load %arg8[%c0_26, %c3] : memref<2x404xf32, #tpu.memory_space<vmem>>, vector<2x320xf32>
    %c0_27 = arith.constant 0 : index
    %c3_28 = arith.constant 3 : index
    %38 = vector.load %arg4[%c0_27, %c3_28] : memref<2x25xf32, #tpu.memory_space<vmem>>, vector<2x1xf32>
    %39 = vector.broadcast %38 : vector<2x1xf32> to vector<2x320xf32>
    %40 = arith.mulf %37, %39 : vector<2x320xf32>
    %41 = arith.addf %36, %40 : vector<2x320xf32>
    %c0_29 = arith.constant 0 : index
    %c4 = arith.constant 4 : index
    %42 = vector.load %arg8[%c0_29, %c4] : memref<2x404xf32, #tpu.memory_space<vmem>>, vector<2x320xf32>
    %c0_30 = arith.constant 0 : index
    %c4_31 = arith.constant 4 : index
    %43 = vector.load %arg4[%c0_30, %c4_31] : memref<2x25xf32, #tpu.memory_space<vmem>>, vector<2x1xf32>
    %44 = vector.broadcast %43 : vector<2x1xf32> to vector<2x320xf32>
    %45 = arith.mulf %42, %44 : vector<2x320xf32>
    %46 = arith.addf %41, %45 : vector<2x320xf32>
    %c0_32 = arith.constant 0 : index
    %c20 = arith.constant 20 : index
    %47 = vector.load %arg8[%c0_32, %c20] : memref<2x404xf32, #tpu.memory_space<vmem>>, vector<2x320xf32>
    %c0_33 = arith.constant 0 : index
    %c5 = arith.constant 5 : index
    %48 = vector.load %arg4[%c0_33, %c5] : memref<2x25xf32, #tpu.memory_space<vmem>>, vector<2x1xf32>
    %49 = vector.broadcast %48 : vector<2x1xf32> to vector<2x320xf32>
    %50 = arith.mulf %47, %49 : vector<2x320xf32>
    %51 = arith.addf %46, %50 : vector<2x320xf32>
    %c0_34 = arith.constant 0 : index
    %c21 = arith.constant 21 : index
    %52 = vector.load %arg8[%c0_34, %c21] : memref<2x404xf32, #tpu.memory_space<vmem>>, vector<2x320xf32>
    %c0_35 = arith.constant 0 : index
    %c6 = arith.constant 6 : index
    %53 = vector.load %arg4[%c0_35, %c6] : memref<2x25xf32, #tpu.memory_space<vmem>>, vector<2x1xf32>
    %54 = vector.broadcast %53 : vector<2x1xf32> to vector<2x320xf32>
    %55 = arith.mulf %52, %54 : vector<2x320xf32>
    %56 = arith.addf %51, %55 : vector<2x320xf32>
    %c0_36 = arith.constant 0 : index
    %c22 = arith.constant 22 : index
    %57 = vector.load %arg8[%c0_36, %c22] : memref<2x404xf32, #tpu.memory_space<vmem>>, vector<2x320xf32>
    %c0_37 = arith.constant 0 : index
    %c7 = arith.constant 7 : index
    %58 = vector.load %arg4[%c0_37, %c7] : memref<2x25xf32, #tpu.memory_space<vmem>>, vector<2x1xf32>
    %59 = vector.broadcast %58 : vector<2x1xf32> to vector<2x320xf32>
    %60 = arith.mulf %57, %59 : vector<2x320xf32>
    %61 = arith.addf %56, %60 : vector<2x320xf32>
    %c0_38 = arith.constant 0 : index
    %c23 = arith.constant 23 : index
    %62 = vector.load %arg8[%c0_38, %c23] : memref<2x404xf32, #tpu.memory_space<vmem>>, vector<2x320xf32>
    %c0_39 = arith.constant 0 : index
    %c8 = arith.constant 8 : index
    %63 = vector.load %arg4[%c0_39, %c8] : memref<2x25xf32, #tpu.memory_space<vmem>>, vector<2x1xf32>
    %64 = vector.broadcast %63 : vector<2x1xf32> to vector<2x320xf32>
    %65 = arith.mulf %62, %64 : vector<2x320xf32>
    %66 = arith.addf %61, %65 : vector<2x320xf32>
    %c0_40 = arith.constant 0 : index
    %c24 = arith.constant 24 : index
    %67 = vector.load %arg8[%c0_40, %c24] : memref<2x404xf32, #tpu.memory_space<vmem>>, vector<2x320xf32>
    %c0_41 = arith.constant 0 : index
    %c9 = arith.constant 9 : index
    %68 = vector.load %arg4[%c0_41, %c9] : memref<2x25xf32, #tpu.memory_space<vmem>>, vector<2x1xf32>
    %69 = vector.broadcast %68 : vector<2x1xf32> to vector<2x320xf32>
    %70 = arith.mulf %67, %69 : vector<2x320xf32>
    %71 = arith.addf %66, %70 : vector<2x320xf32>
    %c0_42 = arith.constant 0 : index
    %c40 = arith.constant 40 : index
    %72 = vector.load %arg8[%c0_42, %c40] : memref<2x404xf32, #tpu.memory_space<vmem>>, vector<2x320xf32>
    %c0_43 = arith.constant 0 : index
    %c10 = arith.constant 10 : index
    %73 = vector.load %arg4[%c0_43, %c10] : memref<2x25xf32, #tpu.memory_space<vmem>>, vector<2x1xf32>
    %74 = vector.broadcast %73 : vector<2x1xf32> to vector<2x320xf32>
    %75 = arith.mulf %72, %74 : vector<2x320xf32>
    %76 = arith.addf %71, %75 : vector<2x320xf32>
    %c0_44 = arith.constant 0 : index
    %c41 = arith.constant 41 : index
    %77 = vector.load %arg8[%c0_44, %c41] : memref<2x404xf32, #tpu.memory_space<vmem>>, vector<2x320xf32>
    %c0_45 = arith.constant 0 : index
    %c11 = arith.constant 11 : index
    %78 = vector.load %arg4[%c0_45, %c11] : memref<2x25xf32, #tpu.memory_space<vmem>>, vector<2x1xf32>
    %79 = vector.broadcast %78 : vector<2x1xf32> to vector<2x320xf32>
    %80 = arith.mulf %77, %79 : vector<2x320xf32>
    %81 = arith.addf %76, %80 : vector<2x320xf32>
    %c0_46 = arith.constant 0 : index
    %c42 = arith.constant 42 : index
    %82 = vector.load %arg8[%c0_46, %c42] : memref<2x404xf32, #tpu.memory_space<vmem>>, vector<2x320xf32>
    %c0_47 = arith.constant 0 : index
    %c12 = arith.constant 12 : index
    %83 = vector.load %arg4[%c0_47, %c12] : memref<2x25xf32, #tpu.memory_space<vmem>>, vector<2x1xf32>
    %84 = vector.broadcast %83 : vector<2x1xf32> to vector<2x320xf32>
    %85 = arith.mulf %82, %84 : vector<2x320xf32>
    %86 = arith.addf %81, %85 : vector<2x320xf32>
    %c0_48 = arith.constant 0 : index
    %c43 = arith.constant 43 : index
    %87 = vector.load %arg8[%c0_48, %c43] : memref<2x404xf32, #tpu.memory_space<vmem>>, vector<2x320xf32>
    %c0_49 = arith.constant 0 : index
    %c13 = arith.constant 13 : index
    %88 = vector.load %arg4[%c0_49, %c13] : memref<2x25xf32, #tpu.memory_space<vmem>>, vector<2x1xf32>
    %89 = vector.broadcast %88 : vector<2x1xf32> to vector<2x320xf32>
    %90 = arith.mulf %87, %89 : vector<2x320xf32>
    %91 = arith.addf %86, %90 : vector<2x320xf32>
    %c0_50 = arith.constant 0 : index
    %c44 = arith.constant 44 : index
    %92 = vector.load %arg8[%c0_50, %c44] : memref<2x404xf32, #tpu.memory_space<vmem>>, vector<2x320xf32>
    %c0_51 = arith.constant 0 : index
    %c14 = arith.constant 14 : index
    %93 = vector.load %arg4[%c0_51, %c14] : memref<2x25xf32, #tpu.memory_space<vmem>>, vector<2x1xf32>
    %94 = vector.broadcast %93 : vector<2x1xf32> to vector<2x320xf32>
    %95 = arith.mulf %92, %94 : vector<2x320xf32>
    %96 = arith.addf %91, %95 : vector<2x320xf32>
    %c0_52 = arith.constant 0 : index
    %c60 = arith.constant 60 : index
    %97 = vector.load %arg8[%c0_52, %c60] : memref<2x404xf32, #tpu.memory_space<vmem>>, vector<2x320xf32>
    %c0_53 = arith.constant 0 : index
    %c15 = arith.constant 15 : index
    %98 = vector.load %arg4[%c0_53, %c15] : memref<2x25xf32, #tpu.memory_space<vmem>>, vector<2x1xf32>
    %99 = vector.broadcast %98 : vector<2x1xf32> to vector<2x320xf32>
    %100 = arith.mulf %97, %99 : vector<2x320xf32>
    %101 = arith.addf %96, %100 : vector<2x320xf32>
    %c0_54 = arith.constant 0 : index
    %c61 = arith.constant 61 : index
    %102 = vector.load %arg8[%c0_54, %c61] : memref<2x404xf32, #tpu.memory_space<vmem>>, vector<2x320xf32>
    %c0_55 = arith.constant 0 : index
    %c16 = arith.constant 16 : index
    %103 = vector.load %arg4[%c0_55, %c16] : memref<2x25xf32, #tpu.memory_space<vmem>>, vector<2x1xf32>
    %104 = vector.broadcast %103 : vector<2x1xf32> to vector<2x320xf32>
    %105 = arith.mulf %102, %104 : vector<2x320xf32>
    %106 = arith.addf %101, %105 : vector<2x320xf32>
    %c0_56 = arith.constant 0 : index
    %c62 = arith.constant 62 : index
    %107 = vector.load %arg8[%c0_56, %c62] : memref<2x404xf32, #tpu.memory_space<vmem>>, vector<2x320xf32>
    %c0_57 = arith.constant 0 : index
    %c17 = arith.constant 17 : index
    %108 = vector.load %arg4[%c0_57, %c17] : memref<2x25xf32, #tpu.memory_space<vmem>>, vector<2x1xf32>
    %109 = vector.broadcast %108 : vector<2x1xf32> to vector<2x320xf32>
    %110 = arith.mulf %107, %109 : vector<2x320xf32>
    %111 = arith.addf %106, %110 : vector<2x320xf32>
    %c0_58 = arith.constant 0 : index
    %c63 = arith.constant 63 : index
    %112 = vector.load %arg8[%c0_58, %c63] : memref<2x404xf32, #tpu.memory_space<vmem>>, vector<2x320xf32>
    %c0_59 = arith.constant 0 : index
    %c18 = arith.constant 18 : index
    %113 = vector.load %arg4[%c0_59, %c18] : memref<2x25xf32, #tpu.memory_space<vmem>>, vector<2x1xf32>
    %114 = vector.broadcast %113 : vector<2x1xf32> to vector<2x320xf32>
    %115 = arith.mulf %112, %114 : vector<2x320xf32>
    %116 = arith.addf %111, %115 : vector<2x320xf32>
    %c0_60 = arith.constant 0 : index
    %c64 = arith.constant 64 : index
    %117 = vector.load %arg8[%c0_60, %c64] : memref<2x404xf32, #tpu.memory_space<vmem>>, vector<2x320xf32>
    %c0_61 = arith.constant 0 : index
    %c19 = arith.constant 19 : index
    %118 = vector.load %arg4[%c0_61, %c19] : memref<2x25xf32, #tpu.memory_space<vmem>>, vector<2x1xf32>
    %119 = vector.broadcast %118 : vector<2x1xf32> to vector<2x320xf32>
    %120 = arith.mulf %117, %119 : vector<2x320xf32>
    %121 = arith.addf %116, %120 : vector<2x320xf32>
    %c0_62 = arith.constant 0 : index
    %c80 = arith.constant 80 : index
    %122 = vector.load %arg8[%c0_62, %c80] : memref<2x404xf32, #tpu.memory_space<vmem>>, vector<2x320xf32>
    %c0_63 = arith.constant 0 : index
    %c20_64 = arith.constant 20 : index
    %123 = vector.load %arg4[%c0_63, %c20_64] : memref<2x25xf32, #tpu.memory_space<vmem>>, vector<2x1xf32>
    %124 = vector.broadcast %123 : vector<2x1xf32> to vector<2x320xf32>
    %125 = arith.mulf %122, %124 : vector<2x320xf32>
    %126 = arith.addf %121, %125 : vector<2x320xf32>
    %c0_65 = arith.constant 0 : index
    %c81 = arith.constant 81 : index
    %127 = vector.load %arg8[%c0_65, %c81] : memref<2x404xf32, #tpu.memory_space<vmem>>, vector<2x320xf32>
    %c0_66 = arith.constant 0 : index
    %c21_67 = arith.constant 21 : index
    %128 = vector.load %arg4[%c0_66, %c21_67] : memref<2x25xf32, #tpu.memory_space<vmem>>, vector<2x1xf32>
    %129 = vector.broadcast %128 : vector<2x1xf32> to vector<2x320xf32>
    %130 = arith.mulf %127, %129 : vector<2x320xf32>
    %131 = arith.addf %126, %130 : vector<2x320xf32>
    %c0_68 = arith.constant 0 : index
    %c82 = arith.constant 82 : index
    %132 = vector.load %arg8[%c0_68, %c82] : memref<2x404xf32, #tpu.memory_space<vmem>>, vector<2x320xf32>
    %c0_69 = arith.constant 0 : index
    %c22_70 = arith.constant 22 : index
    %133 = vector.load %arg4[%c0_69, %c22_70] : memref<2x25xf32, #tpu.memory_space<vmem>>, vector<2x1xf32>
    %134 = vector.broadcast %133 : vector<2x1xf32> to vector<2x320xf32>
    %135 = arith.mulf %132, %134 : vector<2x320xf32>
    %136 = arith.addf %131, %135 : vector<2x320xf32>
    %c0_71 = arith.constant 0 : index
    %c83 = arith.constant 83 : index
    %137 = vector.load %arg8[%c0_71, %c83] : memref<2x404xf32, #tpu.memory_space<vmem>>, vector<2x320xf32>
    %c0_72 = arith.constant 0 : index
    %c23_73 = arith.constant 23 : index
    %138 = vector.load %arg4[%c0_72, %c23_73] : memref<2x25xf32, #tpu.memory_space<vmem>>, vector<2x1xf32>
    %139 = vector.broadcast %138 : vector<2x1xf32> to vector<2x320xf32>
    %140 = arith.mulf %137, %139 : vector<2x320xf32>
    %141 = arith.addf %136, %140 : vector<2x320xf32>
    %c0_74 = arith.constant 0 : index
    %c84 = arith.constant 84 : index
    %142 = vector.load %arg8[%c0_74, %c84] : memref<2x404xf32, #tpu.memory_space<vmem>>, vector<2x320xf32>
    %c0_75 = arith.constant 0 : index
    %c24_76 = arith.constant 24 : index
    %143 = vector.load %arg4[%c0_75, %c24_76] : memref<2x25xf32, #tpu.memory_space<vmem>>, vector<2x1xf32>
    %144 = vector.broadcast %143 : vector<2x1xf32> to vector<2x320xf32>
    %145 = arith.mulf %142, %144 : vector<2x320xf32>
    %146 = arith.addf %141, %145 : vector<2x320xf32>
    %c0_77 = arith.constant 0 : index
    %c0_78 = arith.constant 0 : index
    %147 = vector.load %arg5[%c0_77, %c0_78] : memref<2x1xf32, #tpu.memory_space<vmem>>, vector<2x1xf32>
    %148 = vector.broadcast %147 : vector<2x1xf32> to vector<2x320xf32>
    %149 = arith.addf %146, %148 : vector<2x320xf32>
    %cst_79 = arith.constant 0.000000e+00 : f32
    %150 = vector.broadcast %cst_79 : f32 to vector<2x320xf32>
    %151 = arith.subf %150, %149 : vector<2x320xf32>
    %152 = math.exp %151 : vector<2x320xf32>
    %cst_80 = arith.constant 1.000000e+00 : f32
    %153 = vector.broadcast %cst_80 : f32 to vector<2x320xf32>
    %154 = arith.addf %153, %152 : vector<2x320xf32>
    %155 = tpu.reciprocal %154 {approx = true} : vector<2x320xf32> -> vector<2x320xf32>
    %156 = arith.mulf %149, %155 : vector<2x320xf32>
    %c0_81 = arith.constant 0 : index
    %c0_82 = arith.constant 0 : index
    %157 = vector.load %arg9[%c0_81, %c0_82] : memref<2x320xf32, #tpu.memory_space<vmem>>, vector<2x320xf32>
    tpu.vector_store %arg9[%c0_81, %c0_82], %156 {strides = array<i32>} : memref<2x320xf32, #tpu.memory_space<vmem>>, vector<2x320xf32>,
    %c0_83 = arith.constant 0 : index
    %c42_84 = arith.constant 42 : index
    %158 = vector.load %arg8[%c0_83, %c42_84] : memref<2x404xf32, #tpu.memory_space<vmem>>, vector<1x320xf32>
    %c0_85 = arith.constant 0 : index
    %c0_86 = arith.constant 0 : index
    %c0_87 = arith.constant 0 : index
    %159 = vector.load %arg7[%c0_85, %c0_86, %c0_87] : memref<1x4x320xf32, #tpu.memory_space<vmem>>, vector<1x1x320xf32>
    %160 = vector.shape_cast %159 : vector<1x1x320xf32> to vector<1x320xf32>
    %161 = vector.shape_cast %158 : vector<1x320xf32> to vector<1x1x320xf32>
    tpu.vector_store %arg7[%c0_85, %c0_86, %c0_87], %161 {strides = array<i32>} : memref<1x4x320xf32, #tpu.memory_space<vmem>>, vector<1x1x320xf32>,
    %c0_88 = arith.constant 0 : index
    %c0_89 = arith.constant 0 : index
    %162 = vector.load %arg9[%c0_88, %c0_89] : memref<2x320xf32, #tpu.memory_space<vmem>>, vector<1x320xf32>
    %c0_90 = arith.constant 0 : index
    %c1_91 = arith.constant 1 : index
    %c0_92 = arith.constant 0 : index
    %163 = vector.load %arg7[%c0_90, %c1_91, %c0_92] : memref<1x4x320xf32, #tpu.memory_space<vmem>>, vector<1x1x320xf32>
    %164 = vector.shape_cast %163 : vector<1x1x320xf32> to vector<1x320xf32>
    %165 = vector.shape_cast %162 : vector<1x320xf32> to vector<1x1x320xf32>
    tpu.vector_store %arg7[%c0_90, %c1_91, %c0_92], %165 {strides = array<i32>} : memref<1x4x320xf32, #tpu.memory_space<vmem>>, vector<1x1x320xf32>,
    %c1_93 = arith.constant 1 : index
    %c42_94 = arith.constant 42 : index
    %166 = vector.load %arg8[%c1_93, %c42_94] : memref<2x404xf32, #tpu.memory_space<vmem>>, vector<1x320xf32>
    %c0_95 = arith.constant 0 : index
    %c2_96 = arith.constant 2 : index
    %c0_97 = arith.constant 0 : index
    %167 = vector.load %arg7[%c0_95, %c2_96, %c0_97] : memref<1x4x320xf32, #tpu.memory_space<vmem>>, vector<1x1x320xf32>
    %168 = vector.shape_cast %167 : vector<1x1x320xf32> to vector<1x320xf32>
    %169 = vector.shape_cast %166 : vector<1x320xf32> to vector<1x1x320xf32>
    tpu.vector_store %arg7[%c0_95, %c2_96, %c0_97], %169 {strides = array<i32>} : memref<1x4x320xf32, #tpu.memory_space<vmem>>, vector<1x1x320xf32>,
    %c1_98 = arith.constant 1 : index
    %c0_99 = arith.constant 0 : index
    %170 = vector.load %arg9[%c1_98, %c0_99] : memref<2x320xf32, #tpu.memory_space<vmem>>, vector<1x320xf32>
    %c0_100 = arith.constant 0 : index
    %c3_101 = arith.constant 3 : index
    %c0_102 = arith.constant 0 : index
    %171 = vector.load %arg7[%c0_100, %c3_101, %c0_102] : memref<1x4x320xf32, #tpu.memory_space<vmem>>, vector<1x1x320xf32>
    %172 = vector.shape_cast %171 : vector<1x1x320xf32> to vector<1x320xf32>
    %173 = vector.shape_cast %170 : vector<1x320xf32> to vector<1x1x320xf32>
    tpu.vector_store %arg7[%c0_100, %c3_101, %c0_102], %173 {strides = array<i32>} : memref<1x4x320xf32, #tpu.memory_space<vmem>>, vector<1x1x320xf32>,
    return
  }
  func.func @transform_0(%arg0: i32) -> (i32, i32, i32) {
    %c0_i32 = arith.constant 0 : i32
    %c0_i32_0 = arith.constant 0 : i32
    %c0_i32_1 = arith.constant 0 : i32
    return %arg0, %c0_i32, %c0_i32_0 : i32, i32, i32
  }
  func.func @transform_1(%arg0: i32) -> (i32, i32, i32, i32) {
    %c0_i32 = arith.constant 0 : i32
    %c0_i32_0 = arith.constant 0 : i32
    %c0_i32_1 = arith.constant 0 : i32
    %c0_i32_2 = arith.constant 0 : i32
    %c0_i32_3 = arith.constant 0 : i32
    return %c0_i32, %c0_i32_0, %c0_i32_1, %c0_i32_2 : i32, i32, i32, i32
  }
  func.func @transform_2(%arg0: i32) -> (i32, i32) {
    %c0_i32 = arith.constant 0 : i32
    %c0_i32_0 = arith.constant 0 : i32
    %c0_i32_1 = arith.constant 0 : i32
    return %c0_i32, %c0_i32_0 : i32, i32
  }
  func.func @transform_3(%arg0: i32) -> (i32, i32) {
    %c0_i32 = arith.constant 0 : i32
    %c0_i32_0 = arith.constant 0 : i32
    %c0_i32_1 = arith.constant 0 : i32
    return %c0_i32, %c0_i32_0 : i32, i32
  }
  func.func @transform_4(%arg0: i32) -> (i32, i32) {
    %c0_i32 = arith.constant 0 : i32
    %c0_i32_0 = arith.constant 0 : i32
    %c0_i32_1 = arith.constant 0 : i32
    return %c0_i32, %c0_i32_0 : i32, i32
  }
  func.func @transform_5(%arg0: i32) -> (i32, i32) {
    %c0_i32 = arith.constant 0 : i32
    %c0_i32_0 = arith.constant 0 : i32
    %c0_i32_1 = arith.constant 0 : i32
    return %c0_i32, %c0_i32_0 : i32, i32
  }
  func.func @transform_6(%arg0: i32) -> (i32, i32, i32) {
    %c0_i32 = arith.constant 0 : i32
    %c0_i32_0 = arith.constant 0 : i32
    %c0_i32_1 = arith.constant 0 : i32
    return %arg0, %c0_i32, %c0_i32_0 : i32, i32, i32
  }
}

module attributes {stable_mosaic.version = 11 : i64} {
  func.func @_gsconv_shortcut_kernel(%arg0: i32, %arg1: memref<1x4x490xf32, #tpu.memory_space<vmem>>, %arg2: memref<1x4x352xf32, #tpu.memory_space<vmem>>, %arg3: memref<3x3x4x4xf32, #tpu.memory_space<vmem>>, %arg4: memref<4x1xf32, #tpu.memory_space<vmem>>, %arg5: memref<4x25xf32, #tpu.memory_space<vmem>>, %arg6: memref<4x1xf32, #tpu.memory_space<vmem>>, %arg7: memref<1x444xf32, #tpu.memory_space<vmem>>, %arg8: memref<8x4xf32, #tpu.memory_space<vmem>>, %arg9: memref<8x1xf32, #tpu.memory_space<vmem>>, %arg10: memref<1x8x352xf32, #tpu.memory_space<vmem>>, %arg11: memref<4x444xf32, #tpu.memory_space<vmem>>, %arg12: memref<4x352xf32, #tpu.memory_space<vmem>>) attributes {dimension_semantics = [#tpu.dimension_semantics<parallel>], iteration_bounds = array<i64: 2>, scalar_prefetch = 0 : i64, scratch_operands = 2 : i64, tpu.core_type = #tpu.core_type<tc>, window_params = [{transform_indices = @transform_0, window_bounds = array<i64: 1, 4, 490>}, {transform_indices = @transform_1, window_bounds = array<i64: 1, 4, 352>}, {pipeline_mode = #tpu.pipeline_mode<synchronous>, transform_indices = @transform_2, window_bounds = array<i64: 3, 3, 4, 4>}, {pipeline_mode = #tpu.pipeline_mode<synchronous>, transform_indices = @transform_3, window_bounds = array<i64: 4, 1>}, {pipeline_mode = #tpu.pipeline_mode<synchronous>, transform_indices = @transform_4, window_bounds = array<i64: 4, 25>}, {pipeline_mode = #tpu.pipeline_mode<synchronous>, transform_indices = @transform_5, window_bounds = array<i64: 4, 1>}, {pipeline_mode = #tpu.pipeline_mode<synchronous>, transform_indices = @transform_6, window_bounds = array<i64: 1, 444>}, {pipeline_mode = #tpu.pipeline_mode<synchronous>, transform_indices = @transform_7, window_bounds = array<i64: 8, 4>}, {pipeline_mode = #tpu.pipeline_mode<synchronous>, transform_indices = @transform_8, window_bounds = array<i64: 8, 1>}, {transform_indices = @transform_9, window_bounds = array<i64: 1, 8, 352>}]} {
    %cst = arith.constant 0.000000e+00 : f32
    %0 = vector.broadcast %cst : f32 to vector<4x444xf32>
    %c0 = arith.constant 0 : index
    %c0_0 = arith.constant 0 : index
    %c0_1 = arith.constant 0 : index
    %1 = vector.load %arg1[%c0, %c0_0, %c0_1] : memref<1x4x490xf32, #tpu.memory_space<vmem>>, vector<1x4x444xf32>
    %2 = vector.shape_cast %1 : vector<1x4x444xf32> to vector<4x444xf32>
    %c0_2 = arith.constant 0 : index
    %c0_3 = arith.constant 0 : index
    %c0_4 = arith.constant 0 : index
    %c0_5 = arith.constant 0 : index
    %3 = vector.load %arg3[%c0_2, %c0_3, %c0_4, %c0_5] : memref<3x3x4x4xf32, #tpu.memory_space<vmem>>, vector<1x1x4x4xf32>
    %4 = vector.shape_cast %3 : vector<1x1x4x4xf32> to vector<4x4xf32>
    %cst_6 = arith.constant dense<0.000000e+00> : vector<4x444xf32>
    %5 = tpu.matmul %4, %2, %cst_6 {dimension_numbers = #tpu.dot_dimension_numbers<[1], [0], [0], [1], [0, 0, 1, 1], [], []>} : vector<4x4xf32>, vector<4x444xf32>, vector<4x444xf32> -> vector<4x444xf32>
    %6 = arith.addf %0, %5 : vector<4x444xf32>
    %c0_7 = arith.constant 0 : index
    %c0_8 = arith.constant 0 : index
    %c1 = arith.constant 1 : index
    %7 = vector.load %arg1[%c0_7, %c0_8, %c1] : memref<1x4x490xf32, #tpu.memory_space<vmem>>, vector<1x4x444xf32>
    %8 = vector.shape_cast %7 : vector<1x4x444xf32> to vector<4x444xf32>
    %c0_9 = arith.constant 0 : index
    %c1_10 = arith.constant 1 : index
    %c0_11 = arith.constant 0 : index
    %c0_12 = arith.constant 0 : index
    %9 = vector.load %arg3[%c0_9, %c1_10, %c0_11, %c0_12] : memref<3x3x4x4xf32, #tpu.memory_space<vmem>>, vector<1x1x4x4xf32>
    %10 = vector.shape_cast %9 : vector<1x1x4x4xf32> to vector<4x4xf32>
    %cst_13 = arith.constant dense<0.000000e+00> : vector<4x444xf32>
    %11 = tpu.matmul %10, %8, %cst_13 {dimension_numbers = #tpu.dot_dimension_numbers<[1], [0], [0], [1], [0, 0, 1, 1], [], []>} : vector<4x4xf32>, vector<4x444xf32>, vector<4x444xf32> -> vector<4x444xf32>
    %12 = arith.addf %6, %11 : vector<4x444xf32>
    %c0_14 = arith.constant 0 : index
    %c0_15 = arith.constant 0 : index
    %c2 = arith.constant 2 : index
    %13 = vector.load %arg1[%c0_14, %c0_15, %c2] : memref<1x4x490xf32, #tpu.memory_space<vmem>>, vector<1x4x444xf32>
    %14 = vector.shape_cast %13 : vector<1x4x444xf32> to vector<4x444xf32>
    %c0_16 = arith.constant 0 : index
    %c2_17 = arith.constant 2 : index
    %c0_18 = arith.constant 0 : index
    %c0_19 = arith.constant 0 : index
    %15 = vector.load %arg3[%c0_16, %c2_17, %c0_18, %c0_19] : memref<3x3x4x4xf32, #tpu.memory_space<vmem>>, vector<1x1x4x4xf32>
    %16 = vector.shape_cast %15 : vector<1x1x4x4xf32> to vector<4x4xf32>
    %cst_20 = arith.constant dense<0.000000e+00> : vector<4x444xf32>
    %17 = tpu.matmul %16, %14, %cst_20 {dimension_numbers = #tpu.dot_dimension_numbers<[1], [0], [0], [1], [0, 0, 1, 1], [], []>} : vector<4x4xf32>, vector<4x444xf32>, vector<4x444xf32> -> vector<4x444xf32>
    %18 = arith.addf %12, %17 : vector<4x444xf32>
    %c0_21 = arith.constant 0 : index
    %c0_22 = arith.constant 0 : index
    %c22 = arith.constant 22 : index
    %19 = vector.load %arg1[%c0_21, %c0_22, %c22] : memref<1x4x490xf32, #tpu.memory_space<vmem>>, vector<1x4x444xf32>
    %20 = vector.shape_cast %19 : vector<1x4x444xf32> to vector<4x444xf32>
    %c1_23 = arith.constant 1 : index
    %c0_24 = arith.constant 0 : index
    %c0_25 = arith.constant 0 : index
    %c0_26 = arith.constant 0 : index
    %21 = vector.load %arg3[%c1_23, %c0_24, %c0_25, %c0_26] : memref<3x3x4x4xf32, #tpu.memory_space<vmem>>, vector<1x1x4x4xf32>
    %22 = vector.shape_cast %21 : vector<1x1x4x4xf32> to vector<4x4xf32>
    %cst_27 = arith.constant dense<0.000000e+00> : vector<4x444xf32>
    %23 = tpu.matmul %22, %20, %cst_27 {dimension_numbers = #tpu.dot_dimension_numbers<[1], [0], [0], [1], [0, 0, 1, 1], [], []>} : vector<4x4xf32>, vector<4x444xf32>, vector<4x444xf32> -> vector<4x444xf32>
    %24 = arith.addf %18, %23 : vector<4x444xf32>
    %c0_28 = arith.constant 0 : index
    %c0_29 = arith.constant 0 : index
    %c23 = arith.constant 23 : index
    %25 = vector.load %arg1[%c0_28, %c0_29, %c23] : memref<1x4x490xf32, #tpu.memory_space<vmem>>, vector<1x4x444xf32>
    %26 = vector.shape_cast %25 : vector<1x4x444xf32> to vector<4x444xf32>
    %c1_30 = arith.constant 1 : index
    %c1_31 = arith.constant 1 : index
    %c0_32 = arith.constant 0 : index
    %c0_33 = arith.constant 0 : index
    %27 = vector.load %arg3[%c1_30, %c1_31, %c0_32, %c0_33] : memref<3x3x4x4xf32, #tpu.memory_space<vmem>>, vector<1x1x4x4xf32>
    %28 = vector.shape_cast %27 : vector<1x1x4x4xf32> to vector<4x4xf32>
    %cst_34 = arith.constant dense<0.000000e+00> : vector<4x444xf32>
    %29 = tpu.matmul %28, %26, %cst_34 {dimension_numbers = #tpu.dot_dimension_numbers<[1], [0], [0], [1], [0, 0, 1, 1], [], []>} : vector<4x4xf32>, vector<4x444xf32>, vector<4x444xf32> -> vector<4x444xf32>
    %30 = arith.addf %24, %29 : vector<4x444xf32>
    %c0_35 = arith.constant 0 : index
    %c0_36 = arith.constant 0 : index
    %c24 = arith.constant 24 : index
    %31 = vector.load %arg1[%c0_35, %c0_36, %c24] : memref<1x4x490xf32, #tpu.memory_space<vmem>>, vector<1x4x444xf32>
    %32 = vector.shape_cast %31 : vector<1x4x444xf32> to vector<4x444xf32>
    %c1_37 = arith.constant 1 : index
    %c2_38 = arith.constant 2 : index
    %c0_39 = arith.constant 0 : index
    %c0_40 = arith.constant 0 : index
    %33 = vector.load %arg3[%c1_37, %c2_38, %c0_39, %c0_40] : memref<3x3x4x4xf32, #tpu.memory_space<vmem>>, vector<1x1x4x4xf32>
    %34 = vector.shape_cast %33 : vector<1x1x4x4xf32> to vector<4x4xf32>
    %cst_41 = arith.constant dense<0.000000e+00> : vector<4x444xf32>
    %35 = tpu.matmul %34, %32, %cst_41 {dimension_numbers = #tpu.dot_dimension_numbers<[1], [0], [0], [1], [0, 0, 1, 1], [], []>} : vector<4x4xf32>, vector<4x444xf32>, vector<4x444xf32> -> vector<4x444xf32>
    %36 = arith.addf %30, %35 : vector<4x444xf32>
    %c0_42 = arith.constant 0 : index
    %c0_43 = arith.constant 0 : index
    %c44 = arith.constant 44 : index
    %37 = vector.load %arg1[%c0_42, %c0_43, %c44] : memref<1x4x490xf32, #tpu.memory_space<vmem>>, vector<1x4x444xf32>
    %38 = vector.shape_cast %37 : vector<1x4x444xf32> to vector<4x444xf32>
    %c2_44 = arith.constant 2 : index
    %c0_45 = arith.constant 0 : index
    %c0_46 = arith.constant 0 : index
    %c0_47 = arith.constant 0 : index
    %39 = vector.load %arg3[%c2_44, %c0_45, %c0_46, %c0_47] : memref<3x3x4x4xf32, #tpu.memory_space<vmem>>, vector<1x1x4x4xf32>
    %40 = vector.shape_cast %39 : vector<1x1x4x4xf32> to vector<4x4xf32>
    %cst_48 = arith.constant dense<0.000000e+00> : vector<4x444xf32>
    %41 = tpu.matmul %40, %38, %cst_48 {dimension_numbers = #tpu.dot_dimension_numbers<[1], [0], [0], [1], [0, 0, 1, 1], [], []>} : vector<4x4xf32>, vector<4x444xf32>, vector<4x444xf32> -> vector<4x444xf32>
    %42 = arith.addf %36, %41 : vector<4x444xf32>
    %c0_49 = arith.constant 0 : index
    %c0_50 = arith.constant 0 : index
    %c45 = arith.constant 45 : index
    %43 = vector.load %arg1[%c0_49, %c0_50, %c45] : memref<1x4x490xf32, #tpu.memory_space<vmem>>, vector<1x4x444xf32>
    %44 = vector.shape_cast %43 : vector<1x4x444xf32> to vector<4x444xf32>
    %c2_51 = arith.constant 2 : index
    %c1_52 = arith.constant 1 : index
    %c0_53 = arith.constant 0 : index
    %c0_54 = arith.constant 0 : index
    %45 = vector.load %arg3[%c2_51, %c1_52, %c0_53, %c0_54] : memref<3x3x4x4xf32, #tpu.memory_space<vmem>>, vector<1x1x4x4xf32>
    %46 = vector.shape_cast %45 : vector<1x1x4x4xf32> to vector<4x4xf32>
    %cst_55 = arith.constant dense<0.000000e+00> : vector<4x444xf32>
    %47 = tpu.matmul %46, %44, %cst_55 {dimension_numbers = #tpu.dot_dimension_numbers<[1], [0], [0], [1], [0, 0, 1, 1], [], []>} : vector<4x4xf32>, vector<4x444xf32>, vector<4x444xf32> -> vector<4x444xf32>
    %48 = arith.addf %42, %47 : vector<4x444xf32>
    %c0_56 = arith.constant 0 : index
    %c0_57 = arith.constant 0 : index
    %c46 = arith.constant 46 : index
    %49 = vector.load %arg1[%c0_56, %c0_57, %c46] : memref<1x4x490xf32, #tpu.memory_space<vmem>>, vector<1x4x444xf32>
    %50 = vector.shape_cast %49 : vector<1x4x444xf32> to vector<4x444xf32>
    %c2_58 = arith.constant 2 : index
    %c2_59 = arith.constant 2 : index
    %c0_60 = arith.constant 0 : index
    %c0_61 = arith.constant 0 : index
    %51 = vector.load %arg3[%c2_58, %c2_59, %c0_60, %c0_61] : memref<3x3x4x4xf32, #tpu.memory_space<vmem>>, vector<1x1x4x4xf32>
    %52 = vector.shape_cast %51 : vector<1x1x4x4xf32> to vector<4x4xf32>
    %cst_62 = arith.constant dense<0.000000e+00> : vector<4x444xf32>
    %53 = tpu.matmul %52, %50, %cst_62 {dimension_numbers = #tpu.dot_dimension_numbers<[1], [0], [0], [1], [0, 0, 1, 1], [], []>} : vector<4x4xf32>, vector<4x444xf32>, vector<4x444xf32> -> vector<4x444xf32>
    %54 = arith.addf %48, %53 : vector<4x444xf32>
    %c0_63 = arith.constant 0 : index
    %c0_64 = arith.constant 0 : index
    %55 = vector.load %arg4[%c0_63, %c0_64] : memref<4x1xf32, #tpu.memory_space<vmem>>, vector<4x1xf32>
    %56 = vector.broadcast %55 : vector<4x1xf32> to vector<4x444xf32>
    %57 = arith.addf %54, %56 : vector<4x444xf32>
    %cst_65 = arith.constant 0.000000e+00 : f32
    %58 = vector.broadcast %cst_65 : f32 to vector<4x444xf32>
    %59 = arith.subf %58, %57 : vector<4x444xf32>
    %60 = math.exp %59 : vector<4x444xf32>
    %cst_66 = arith.constant 1.000000e+00 : f32
    %61 = vector.broadcast %cst_66 : f32 to vector<4x444xf32>
    %62 = arith.addf %61, %60 : vector<4x444xf32>
    %63 = tpu.reciprocal %62 {approx = true} : vector<4x444xf32> -> vector<4x444xf32>
    %64 = arith.mulf %57, %63 : vector<4x444xf32>
    %c0_67 = arith.constant 0 : index
    %c0_68 = arith.constant 0 : index
    %65 = vector.load %arg7[%c0_67, %c0_68] : memref<1x444xf32, #tpu.memory_space<vmem>>, vector<1x444xf32>
    %66 = vector.broadcast %65 : vector<1x444xf32> to vector<4x444xf32>
    %67 = arith.mulf %64, %66 : vector<4x444xf32>
    %c0_69 = arith.constant 0 : index
    %c0_70 = arith.constant 0 : index
    %68 = vector.load %arg11[%c0_69, %c0_70] : memref<4x444xf32, #tpu.memory_space<vmem>>, vector<4x444xf32>
    tpu.vector_store %arg11[%c0_69, %c0_70], %67 {strides = array<i32>} : memref<4x444xf32, #tpu.memory_space<vmem>>, vector<4x444xf32>,
    %cst_71 = arith.constant 0.000000e+00 : f32
    %69 = vector.broadcast %cst_71 : f32 to vector<4x352xf32>
    %c0_72 = arith.constant 0 : index
    %c0_73 = arith.constant 0 : index
    %70 = vector.load %arg11[%c0_72, %c0_73] : memref<4x444xf32, #tpu.memory_space<vmem>>, vector<4x352xf32>
    %c0_74 = arith.constant 0 : index
    %c0_75 = arith.constant 0 : index
    %71 = vector.load %arg5[%c0_74, %c0_75] : memref<4x25xf32, #tpu.memory_space<vmem>>, vector<4x1xf32>
    %72 = vector.broadcast %71 : vector<4x1xf32> to vector<4x352xf32>
    %73 = arith.mulf %70, %72 : vector<4x352xf32>
    %74 = arith.addf %69, %73 : vector<4x352xf32>
    %c0_76 = arith.constant 0 : index
    %c1_77 = arith.constant 1 : index
    %75 = vector.load %arg11[%c0_76, %c1_77] : memref<4x444xf32, #tpu.memory_space<vmem>>, vector<4x352xf32>
    %c0_78 = arith.constant 0 : index
    %c1_79 = arith.constant 1 : index
    %76 = vector.load %arg5[%c0_78, %c1_79] : memref<4x25xf32, #tpu.memory_space<vmem>>, vector<4x1xf32>
    %77 = vector.broadcast %76 : vector<4x1xf32> to vector<4x352xf32>
    %78 = arith.mulf %75, %77 : vector<4x352xf32>
    %79 = arith.addf %74, %78 : vector<4x352xf32>
    %c0_80 = arith.constant 0 : index
    %c2_81 = arith.constant 2 : index
    %80 = vector.load %arg11[%c0_80, %c2_81] : memref<4x444xf32, #tpu.memory_space<vmem>>, vector<4x352xf32>
    %c0_82 = arith.constant 0 : index
    %c2_83 = arith.constant 2 : index
    %81 = vector.load %arg5[%c0_82, %c2_83] : memref<4x25xf32, #tpu.memory_space<vmem>>, vector<4x1xf32>
    %82 = vector.broadcast %81 : vector<4x1xf32> to vector<4x352xf32>
    %83 = arith.mulf %80, %82 : vector<4x352xf32>
    %84 = arith.addf %79, %83 : vector<4x352xf32>
    %c0_84 = arith.constant 0 : index
    %c3 = arith.constant 3 : index
    %85 = vector.load %arg11[%c0_84, %c3] : memref<4x444xf32, #tpu.memory_space<vmem>>, vector<4x352xf32>
    %c0_85 = arith.constant 0 : index
    %c3_86 = arith.constant 3 : index
    %86 = vector.load %arg5[%c0_85, %c3_86] : memref<4x25xf32, #tpu.memory_space<vmem>>, vector<4x1xf32>
    %87 = vector.broadcast %86 : vector<4x1xf32> to vector<4x352xf32>
    %88 = arith.mulf %85, %87 : vector<4x352xf32>
    %89 = arith.addf %84, %88 : vector<4x352xf32>
    %c0_87 = arith.constant 0 : index
    %c4 = arith.constant 4 : index
    %90 = vector.load %arg11[%c0_87, %c4] : memref<4x444xf32, #tpu.memory_space<vmem>>, vector<4x352xf32>
    %c0_88 = arith.constant 0 : index
    %c4_89 = arith.constant 4 : index
    %91 = vector.load %arg5[%c0_88, %c4_89] : memref<4x25xf32, #tpu.memory_space<vmem>>, vector<4x1xf32>
    %92 = vector.broadcast %91 : vector<4x1xf32> to vector<4x352xf32>
    %93 = arith.mulf %90, %92 : vector<4x352xf32>
    %94 = arith.addf %89, %93 : vector<4x352xf32>
    %c0_90 = arith.constant 0 : index
    %c22_91 = arith.constant 22 : index
    %95 = vector.load %arg11[%c0_90, %c22_91] : memref<4x444xf32, #tpu.memory_space<vmem>>, vector<4x352xf32>
    %c0_92 = arith.constant 0 : index
    %c5 = arith.constant 5 : index
    %96 = vector.load %arg5[%c0_92, %c5] : memref<4x25xf32, #tpu.memory_space<vmem>>, vector<4x1xf32>
    %97 = vector.broadcast %96 : vector<4x1xf32> to vector<4x352xf32>
    %98 = arith.mulf %95, %97 : vector<4x352xf32>
    %99 = arith.addf %94, %98 : vector<4x352xf32>
    %c0_93 = arith.constant 0 : index
    %c23_94 = arith.constant 23 : index
    %100 = vector.load %arg11[%c0_93, %c23_94] : memref<4x444xf32, #tpu.memory_space<vmem>>, vector<4x352xf32>
    %c0_95 = arith.constant 0 : index
    %c6 = arith.constant 6 : index
    %101 = vector.load %arg5[%c0_95, %c6] : memref<4x25xf32, #tpu.memory_space<vmem>>, vector<4x1xf32>
    %102 = vector.broadcast %101 : vector<4x1xf32> to vector<4x352xf32>
    %103 = arith.mulf %100, %102 : vector<4x352xf32>
    %104 = arith.addf %99, %103 : vector<4x352xf32>
    %c0_96 = arith.constant 0 : index
    %c24_97 = arith.constant 24 : index
    %105 = vector.load %arg11[%c0_96, %c24_97] : memref<4x444xf32, #tpu.memory_space<vmem>>, vector<4x352xf32>
    %c0_98 = arith.constant 0 : index
    %c7 = arith.constant 7 : index
    %106 = vector.load %arg5[%c0_98, %c7] : memref<4x25xf32, #tpu.memory_space<vmem>>, vector<4x1xf32>
    %107 = vector.broadcast %106 : vector<4x1xf32> to vector<4x352xf32>
    %108 = arith.mulf %105, %107 : vector<4x352xf32>
    %109 = arith.addf %104, %108 : vector<4x352xf32>
    %c0_99 = arith.constant 0 : index
    %c25 = arith.constant 25 : index
    %110 = vector.load %arg11[%c0_99, %c25] : memref<4x444xf32, #tpu.memory_space<vmem>>, vector<4x352xf32>
    %c0_100 = arith.constant 0 : index
    %c8 = arith.constant 8 : index
    %111 = vector.load %arg5[%c0_100, %c8] : memref<4x25xf32, #tpu.memory_space<vmem>>, vector<4x1xf32>
    %112 = vector.broadcast %111 : vector<4x1xf32> to vector<4x352xf32>
    %113 = arith.mulf %110, %112 : vector<4x352xf32>
    %114 = arith.addf %109, %113 : vector<4x352xf32>
    %c0_101 = arith.constant 0 : index
    %c26 = arith.constant 26 : index
    %115 = vector.load %arg11[%c0_101, %c26] : memref<4x444xf32, #tpu.memory_space<vmem>>, vector<4x352xf32>
    %c0_102 = arith.constant 0 : index
    %c9 = arith.constant 9 : index
    %116 = vector.load %arg5[%c0_102, %c9] : memref<4x25xf32, #tpu.memory_space<vmem>>, vector<4x1xf32>
    %117 = vector.broadcast %116 : vector<4x1xf32> to vector<4x352xf32>
    %118 = arith.mulf %115, %117 : vector<4x352xf32>
    %119 = arith.addf %114, %118 : vector<4x352xf32>
    %c0_103 = arith.constant 0 : index
    %c44_104 = arith.constant 44 : index
    %120 = vector.load %arg11[%c0_103, %c44_104] : memref<4x444xf32, #tpu.memory_space<vmem>>, vector<4x352xf32>
    %c0_105 = arith.constant 0 : index
    %c10 = arith.constant 10 : index
    %121 = vector.load %arg5[%c0_105, %c10] : memref<4x25xf32, #tpu.memory_space<vmem>>, vector<4x1xf32>
    %122 = vector.broadcast %121 : vector<4x1xf32> to vector<4x352xf32>
    %123 = arith.mulf %120, %122 : vector<4x352xf32>
    %124 = arith.addf %119, %123 : vector<4x352xf32>
    %c0_106 = arith.constant 0 : index
    %c45_107 = arith.constant 45 : index
    %125 = vector.load %arg11[%c0_106, %c45_107] : memref<4x444xf32, #tpu.memory_space<vmem>>, vector<4x352xf32>
    %c0_108 = arith.constant 0 : index
    %c11 = arith.constant 11 : index
    %126 = vector.load %arg5[%c0_108, %c11] : memref<4x25xf32, #tpu.memory_space<vmem>>, vector<4x1xf32>
    %127 = vector.broadcast %126 : vector<4x1xf32> to vector<4x352xf32>
    %128 = arith.mulf %125, %127 : vector<4x352xf32>
    %129 = arith.addf %124, %128 : vector<4x352xf32>
    %c0_109 = arith.constant 0 : index
    %c46_110 = arith.constant 46 : index
    %130 = vector.load %arg11[%c0_109, %c46_110] : memref<4x444xf32, #tpu.memory_space<vmem>>, vector<4x352xf32>
    %c0_111 = arith.constant 0 : index
    %c12 = arith.constant 12 : index
    %131 = vector.load %arg5[%c0_111, %c12] : memref<4x25xf32, #tpu.memory_space<vmem>>, vector<4x1xf32>
    %132 = vector.broadcast %131 : vector<4x1xf32> to vector<4x352xf32>
    %133 = arith.mulf %130, %132 : vector<4x352xf32>
    %134 = arith.addf %129, %133 : vector<4x352xf32>
    %c0_112 = arith.constant 0 : index
    %c47 = arith.constant 47 : index
    %135 = vector.load %arg11[%c0_112, %c47] : memref<4x444xf32, #tpu.memory_space<vmem>>, vector<4x352xf32>
    %c0_113 = arith.constant 0 : index
    %c13 = arith.constant 13 : index
    %136 = vector.load %arg5[%c0_113, %c13] : memref<4x25xf32, #tpu.memory_space<vmem>>, vector<4x1xf32>
    %137 = vector.broadcast %136 : vector<4x1xf32> to vector<4x352xf32>
    %138 = arith.mulf %135, %137 : vector<4x352xf32>
    %139 = arith.addf %134, %138 : vector<4x352xf32>
    %c0_114 = arith.constant 0 : index
    %c48 = arith.constant 48 : index
    %140 = vector.load %arg11[%c0_114, %c48] : memref<4x444xf32, #tpu.memory_space<vmem>>, vector<4x352xf32>
    %c0_115 = arith.constant 0 : index
    %c14 = arith.constant 14 : index
    %141 = vector.load %arg5[%c0_115, %c14] : memref<4x25xf32, #tpu.memory_space<vmem>>, vector<4x1xf32>
    %142 = vector.broadcast %141 : vector<4x1xf32> to vector<4x352xf32>
    %143 = arith.mulf %140, %142 : vector<4x352xf32>
    %144 = arith.addf %139, %143 : vector<4x352xf32>
    %c0_116 = arith.constant 0 : index
    %c66 = arith.constant 66 : index
    %145 = vector.load %arg11[%c0_116, %c66] : memref<4x444xf32, #tpu.memory_space<vmem>>, vector<4x352xf32>
    %c0_117 = arith.constant 0 : index
    %c15 = arith.constant 15 : index
    %146 = vector.load %arg5[%c0_117, %c15] : memref<4x25xf32, #tpu.memory_space<vmem>>, vector<4x1xf32>
    %147 = vector.broadcast %146 : vector<4x1xf32> to vector<4x352xf32>
    %148 = arith.mulf %145, %147 : vector<4x352xf32>
    %149 = arith.addf %144, %148 : vector<4x352xf32>
    %c0_118 = arith.constant 0 : index
    %c67 = arith.constant 67 : index
    %150 = vector.load %arg11[%c0_118, %c67] : memref<4x444xf32, #tpu.memory_space<vmem>>, vector<4x352xf32>
    %c0_119 = arith.constant 0 : index
    %c16 = arith.constant 16 : index
    %151 = vector.load %arg5[%c0_119, %c16] : memref<4x25xf32, #tpu.memory_space<vmem>>, vector<4x1xf32>
    %152 = vector.broadcast %151 : vector<4x1xf32> to vector<4x352xf32>
    %153 = arith.mulf %150, %152 : vector<4x352xf32>
    %154 = arith.addf %149, %153 : vector<4x352xf32>
    %c0_120 = arith.constant 0 : index
    %c68 = arith.constant 68 : index
    %155 = vector.load %arg11[%c0_120, %c68] : memref<4x444xf32, #tpu.memory_space<vmem>>, vector<4x352xf32>
    %c0_121 = arith.constant 0 : index
    %c17 = arith.constant 17 : index
    %156 = vector.load %arg5[%c0_121, %c17] : memref<4x25xf32, #tpu.memory_space<vmem>>, vector<4x1xf32>
    %157 = vector.broadcast %156 : vector<4x1xf32> to vector<4x352xf32>
    %158 = arith.mulf %155, %157 : vector<4x352xf32>
    %159 = arith.addf %154, %158 : vector<4x352xf32>
    %c0_122 = arith.constant 0 : index
    %c69 = arith.constant 69 : index
    %160 = vector.load %arg11[%c0_122, %c69] : memref<4x444xf32, #tpu.memory_space<vmem>>, vector<4x352xf32>
    %c0_123 = arith.constant 0 : index
    %c18 = arith.constant 18 : index
    %161 = vector.load %arg5[%c0_123, %c18] : memref<4x25xf32, #tpu.memory_space<vmem>>, vector<4x1xf32>
    %162 = vector.broadcast %161 : vector<4x1xf32> to vector<4x352xf32>
    %163 = arith.mulf %160, %162 : vector<4x352xf32>
    %164 = arith.addf %159, %163 : vector<4x352xf32>
    %c0_124 = arith.constant 0 : index
    %c70 = arith.constant 70 : index
    %165 = vector.load %arg11[%c0_124, %c70] : memref<4x444xf32, #tpu.memory_space<vmem>>, vector<4x352xf32>
    %c0_125 = arith.constant 0 : index
    %c19 = arith.constant 19 : index
    %166 = vector.load %arg5[%c0_125, %c19] : memref<4x25xf32, #tpu.memory_space<vmem>>, vector<4x1xf32>
    %167 = vector.broadcast %166 : vector<4x1xf32> to vector<4x352xf32>
    %168 = arith.mulf %165, %167 : vector<4x352xf32>
    %169 = arith.addf %164, %168 : vector<4x352xf32>
    %c0_126 = arith.constant 0 : index
    %c88 = arith.constant 88 : index
    %170 = vector.load %arg11[%c0_126, %c88] : memref<4x444xf32, #tpu.memory_space<vmem>>, vector<4x352xf32>
    %c0_127 = arith.constant 0 : index
    %c20 = arith.constant 20 : index
    %171 = vector.load %arg5[%c0_127, %c20] : memref<4x25xf32, #tpu.memory_space<vmem>>, vector<4x1xf32>
    %172 = vector.broadcast %171 : vector<4x1xf32> to vector<4x352xf32>
    %173 = arith.mulf %170, %172 : vector<4x352xf32>
    %174 = arith.addf %169, %173 : vector<4x352xf32>
    %c0_128 = arith.constant 0 : index
    %c89 = arith.constant 89 : index
    %175 = vector.load %arg11[%c0_128, %c89] : memref<4x444xf32, #tpu.memory_space<vmem>>, vector<4x352xf32>
    %c0_129 = arith.constant 0 : index
    %c21 = arith.constant 21 : index
    %176 = vector.load %arg5[%c0_129, %c21] : memref<4x25xf32, #tpu.memory_space<vmem>>, vector<4x1xf32>
    %177 = vector.broadcast %176 : vector<4x1xf32> to vector<4x352xf32>
    %178 = arith.mulf %175, %177 : vector<4x352xf32>
    %179 = arith.addf %174, %178 : vector<4x352xf32>
    %c0_130 = arith.constant 0 : index
    %c90 = arith.constant 90 : index
    %180 = vector.load %arg11[%c0_130, %c90] : memref<4x444xf32, #tpu.memory_space<vmem>>, vector<4x352xf32>
    %c0_131 = arith.constant 0 : index
    %c22_132 = arith.constant 22 : index
    %181 = vector.load %arg5[%c0_131, %c22_132] : memref<4x25xf32, #tpu.memory_space<vmem>>, vector<4x1xf32>
    %182 = vector.broadcast %181 : vector<4x1xf32> to vector<4x352xf32>
    %183 = arith.mulf %180, %182 : vector<4x352xf32>
    %184 = arith.addf %179, %183 : vector<4x352xf32>
    %c0_133 = arith.constant 0 : index
    %c91 = arith.constant 91 : index
    %185 = vector.load %arg11[%c0_133, %c91] : memref<4x444xf32, #tpu.memory_space<vmem>>, vector<4x352xf32>
    %c0_134 = arith.constant 0 : index
    %c23_135 = arith.constant 23 : index
    %186 = vector.load %arg5[%c0_134, %c23_135] : memref<4x25xf32, #tpu.memory_space<vmem>>, vector<4x1xf32>
    %187 = vector.broadcast %186 : vector<4x1xf32> to vector<4x352xf32>
    %188 = arith.mulf %185, %187 : vector<4x352xf32>
    %189 = arith.addf %184, %188 : vector<4x352xf32>
    %c0_136 = arith.constant 0 : index
    %c92 = arith.constant 92 : index
    %190 = vector.load %arg11[%c0_136, %c92] : memref<4x444xf32, #tpu.memory_space<vmem>>, vector<4x352xf32>
    %c0_137 = arith.constant 0 : index
    %c24_138 = arith.constant 24 : index
    %191 = vector.load %arg5[%c0_137, %c24_138] : memref<4x25xf32, #tpu.memory_space<vmem>>, vector<4x1xf32>
    %192 = vector.broadcast %191 : vector<4x1xf32> to vector<4x352xf32>
    %193 = arith.mulf %190, %192 : vector<4x352xf32>
    %194 = arith.addf %189, %193 : vector<4x352xf32>
    %c0_139 = arith.constant 0 : index
    %c0_140 = arith.constant 0 : index
    %195 = vector.load %arg6[%c0_139, %c0_140] : memref<4x1xf32, #tpu.memory_space<vmem>>, vector<4x1xf32>
    %196 = vector.broadcast %195 : vector<4x1xf32> to vector<4x352xf32>
    %197 = arith.addf %194, %196 : vector<4x352xf32>
    %cst_141 = arith.constant 0.000000e+00 : f32
    %198 = vector.broadcast %cst_141 : f32 to vector<4x352xf32>
    %199 = arith.subf %198, %197 : vector<4x352xf32>
    %200 = math.exp %199 : vector<4x352xf32>
    %cst_142 = arith.constant 1.000000e+00 : f32
    %201 = vector.broadcast %cst_142 : f32 to vector<4x352xf32>
    %202 = arith.addf %201, %200 : vector<4x352xf32>
    %203 = tpu.reciprocal %202 {approx = true} : vector<4x352xf32> -> vector<4x352xf32>
    %204 = arith.mulf %197, %203 : vector<4x352xf32>
    %c0_143 = arith.constant 0 : index
    %c0_144 = arith.constant 0 : index
    %205 = vector.load %arg12[%c0_143, %c0_144] : memref<4x352xf32, #tpu.memory_space<vmem>>, vector<4x352xf32>
    tpu.vector_store %arg12[%c0_143, %c0_144], %204 {strides = array<i32>} : memref<4x352xf32, #tpu.memory_space<vmem>>, vector<4x352xf32>,
    %c0_145 = arith.constant 0 : index
    %c46_146 = arith.constant 46 : index
    %206 = vector.load %arg11[%c0_145, %c46_146] : memref<4x444xf32, #tpu.memory_space<vmem>>, vector<2x352xf32>
    %c0_147 = arith.constant 0 : index
    %c0_148 = arith.constant 0 : index
    %c0_149 = arith.constant 0 : index
    %207 = vector.load %arg10[%c0_147, %c0_148, %c0_149] : memref<1x8x352xf32, #tpu.memory_space<vmem>>, vector<1x2x352xf32>
    %208 = vector.shape_cast %207 : vector<1x2x352xf32> to vector<2x352xf32>
    %209 = vector.shape_cast %206 : vector<2x352xf32> to vector<1x2x352xf32>
    tpu.vector_store %arg10[%c0_147, %c0_148, %c0_149], %209 {strides = array<i32>} : memref<1x8x352xf32, #tpu.memory_space<vmem>>, vector<1x2x352xf32>,
    %c0_150 = arith.constant 0 : index
    %c0_151 = arith.constant 0 : index
    %210 = vector.load %arg12[%c0_150, %c0_151] : memref<4x352xf32, #tpu.memory_space<vmem>>, vector<2x352xf32>
    %c0_152 = arith.constant 0 : index
    %c2_153 = arith.constant 2 : index
    %c0_154 = arith.constant 0 : index
    %211 = vector.load %arg10[%c0_152, %c2_153, %c0_154] : memref<1x8x352xf32, #tpu.memory_space<vmem>>, vector<1x2x352xf32>
    %212 = vector.shape_cast %211 : vector<1x2x352xf32> to vector<2x352xf32>
    %213 = vector.shape_cast %210 : vector<2x352xf32> to vector<1x2x352xf32>
    tpu.vector_store %arg10[%c0_152, %c2_153, %c0_154], %213 {strides = array<i32>} : memref<1x8x352xf32, #tpu.memory_space<vmem>>, vector<1x2x352xf32>,
    %c2_155 = arith.constant 2 : index
    %c46_156 = arith.constant 46 : index
    %214 = vector.load %arg11[%c2_155, %c46_156] : memref<4x444xf32, #tpu.memory_space<vmem>>, vector<2x352xf32>
    %c0_157 = arith.constant 0 : index
    %c4_158 = arith.constant 4 : index
    %c0_159 = arith.constant 0 : index
    %215 = vector.load %arg10[%c0_157, %c4_158, %c0_159] : memref<1x8x352xf32, #tpu.memory_space<vmem>>, vector<1x2x352xf32>
    %216 = vector.shape_cast %215 : vector<1x2x352xf32> to vector<2x352xf32>
    %217 = vector.shape_cast %214 : vector<2x352xf32> to vector<1x2x352xf32>
    tpu.vector_store %arg10[%c0_157, %c4_158, %c0_159], %217 {strides = array<i32>} : memref<1x8x352xf32, #tpu.memory_space<vmem>>, vector<1x2x352xf32>,
    %c2_160 = arith.constant 2 : index
    %c0_161 = arith.constant 0 : index
    %218 = vector.load %arg12[%c2_160, %c0_161] : memref<4x352xf32, #tpu.memory_space<vmem>>, vector<2x352xf32>
    %c0_162 = arith.constant 0 : index
    %c6_163 = arith.constant 6 : index
    %c0_164 = arith.constant 0 : index
    %219 = vector.load %arg10[%c0_162, %c6_163, %c0_164] : memref<1x8x352xf32, #tpu.memory_space<vmem>>, vector<1x2x352xf32>
    %220 = vector.shape_cast %219 : vector<1x2x352xf32> to vector<2x352xf32>
    %221 = vector.shape_cast %218 : vector<2x352xf32> to vector<1x2x352xf32>
    tpu.vector_store %arg10[%c0_162, %c6_163, %c0_164], %221 {strides = array<i32>} : memref<1x8x352xf32, #tpu.memory_space<vmem>>, vector<1x2x352xf32>,
    %c0_165 = arith.constant 0 : index
    %c0_166 = arith.constant 0 : index
    %222 = vector.load %arg8[%c0_165, %c0_166] : memref<8x4xf32, #tpu.memory_space<vmem>>, vector<8x4xf32>
    %c0_167 = arith.constant 0 : index
    %c0_168 = arith.constant 0 : index
    %c0_169 = arith.constant 0 : index
    %223 = vector.load %arg2[%c0_167, %c0_168, %c0_169] : memref<1x4x352xf32, #tpu.memory_space<vmem>>, vector<1x4x352xf32>
    %224 = vector.shape_cast %223 : vector<1x4x352xf32> to vector<4x352xf32>
    %cst_170 = arith.constant dense<0.000000e+00> : vector<8x352xf32>
    %225 = tpu.matmul %222, %224, %cst_170 {dimension_numbers = #tpu.dot_dimension_numbers<[1], [0], [0], [1], [0, 0, 1, 1], [], []>} : vector<8x4xf32>, vector<4x352xf32>, vector<8x352xf32> -> vector<8x352xf32>
    %c0_171 = arith.constant 0 : index
    %c0_172 = arith.constant 0 : index
    %226 = vector.load %arg9[%c0_171, %c0_172] : memref<8x1xf32, #tpu.memory_space<vmem>>, vector<8x1xf32>
    %227 = vector.broadcast %226 : vector<8x1xf32> to vector<8x352xf32>
    %228 = arith.addf %225, %227 : vector<8x352xf32>
    %c0_173 = arith.constant 0 : index
    %c0_174 = arith.constant 0 : index
    %c0_175 = arith.constant 0 : index
    %229 = vector.load %arg10[%c0_173, %c0_174, %c0_175] : memref<1x8x352xf32, #tpu.memory_space<vmem>>, vector<1x8x352xf32>
    %230 = vector.shape_cast %229 : vector<1x8x352xf32> to vector<8x352xf32>
    %231 = arith.addf %230, %228 : vector<8x352xf32>
    %c0_176 = arith.constant 0 : index
    %c0_177 = arith.constant 0 : index
    %c0_178 = arith.constant 0 : index
    %232 = vector.load %arg10[%c0_176, %c0_177, %c0_178] : memref<1x8x352xf32, #tpu.memory_space<vmem>>, vector<1x8x352xf32>
    %233 = vector.shape_cast %232 : vector<1x8x352xf32> to vector<8x352xf32>
    %234 = vector.shape_cast %231 : vector<8x352xf32> to vector<1x8x352xf32>
    tpu.vector_store %arg10[%c0_176, %c0_177, %c0_178], %234 {strides = array<i32>} : memref<1x8x352xf32, #tpu.memory_space<vmem>>, vector<1x8x352xf32>,
    return
  }
  func.func @transform_0(%arg0: i32) -> (i32, i32, i32) {
    %c0_i32 = arith.constant 0 : i32
    %c0_i32_0 = arith.constant 0 : i32
    %c0_i32_1 = arith.constant 0 : i32
    return %arg0, %c0_i32, %c0_i32_0 : i32, i32, i32
  }
  func.func @transform_1(%arg0: i32) -> (i32, i32, i32) {
    %c0_i32 = arith.constant 0 : i32
    %c0_i32_0 = arith.constant 0 : i32
    %c0_i32_1 = arith.constant 0 : i32
    return %arg0, %c0_i32, %c0_i32_0 : i32, i32, i32
  }
  func.func @transform_2(%arg0: i32) -> (i32, i32, i32, i32) {
    %c0_i32 = arith.constant 0 : i32
    %c0_i32_0 = arith.constant 0 : i32
    %c0_i32_1 = arith.constant 0 : i32
    %c0_i32_2 = arith.constant 0 : i32
    %c0_i32_3 = arith.constant 0 : i32
    return %c0_i32, %c0_i32_0, %c0_i32_1, %c0_i32_2 : i32, i32, i32, i32
  }
  func.func @transform_3(%arg0: i32) -> (i32, i32) {
    %c0_i32 = arith.constant 0 : i32
    %c0_i32_0 = arith.constant 0 : i32
    %c0_i32_1 = arith.constant 0 : i32
    return %c0_i32, %c0_i32_0 : i32, i32
  }
  func.func @transform_4(%arg0: i32) -> (i32, i32) {
    %c0_i32 = arith.constant 0 : i32
    %c0_i32_0 = arith.constant 0 : i32
    %c0_i32_1 = arith.constant 0 : i32
    return %c0_i32, %c0_i32_0 : i32, i32
  }
  func.func @transform_5(%arg0: i32) -> (i32, i32) {
    %c0_i32 = arith.constant 0 : i32
    %c0_i32_0 = arith.constant 0 : i32
    %c0_i32_1 = arith.constant 0 : i32
    return %c0_i32, %c0_i32_0 : i32, i32
  }
  func.func @transform_6(%arg0: i32) -> (i32, i32) {
    %c0_i32 = arith.constant 0 : i32
    %c0_i32_0 = arith.constant 0 : i32
    %c0_i32_1 = arith.constant 0 : i32
    return %c0_i32, %c0_i32_0 : i32, i32
  }
  func.func @transform_7(%arg0: i32) -> (i32, i32) {
    %c0_i32 = arith.constant 0 : i32
    %c0_i32_0 = arith.constant 0 : i32
    %c0_i32_1 = arith.constant 0 : i32
    return %c0_i32, %c0_i32_0 : i32, i32
  }
  func.func @transform_8(%arg0: i32) -> (i32, i32) {
    %c0_i32 = arith.constant 0 : i32
    %c0_i32_0 = arith.constant 0 : i32
    %c0_i32_1 = arith.constant 0 : i32
    return %c0_i32, %c0_i32_0 : i32, i32
  }
  func.func @transform_9(%arg0: i32) -> (i32, i32, i32) {
    %c0_i32 = arith.constant 0 : i32
    %c0_i32_0 = arith.constant 0 : i32
    %c0_i32_1 = arith.constant 0 : i32
    return %arg0, %c0_i32, %c0_i32_0 : i32, i32, i32
  }
}

</mosaic_0001>

<bundles_post_ra>
// kernel: gs_bottleneck.2
= control target key start
LH: loop header
LB: loop body
LE: loop exit
PB: predicated region body
PF: predicated region fallthrough
CT: control target
= control target key end

     0   :  { %s1329_s21 = smov 0   ;;  %s1488_s0 = inlined_call_operand.vmem [shape: f32[2,4,404], index: 0, kind: input, shape index: {}]   ;;  %s1489_s1 = inlined_call_operand.vmem [shape: f32[1,1,2,4], index: 1, kind: input, shape index: {}]   ;;  %s1490_s2 = inlined_call_operand.vmem [shape: f32[2,1], index: 2, kind: input, shape index: {}]   ;;  %s1491_s3 = inlined_call_operand.vmem [shape: f32[2,25], index: 3, kind: input, shape index: {}]   ;;  %s1492_s4 = inlined_call_operand.vmem [shape: f32[2,1], index: 4, kind: input, shape index: {}]   ;;  %s1493_s5 = inlined_call_operand.vmem [shape: f32[1,404], index: 5, kind: input, shape index: {}]   ;;  %s1494_s6 = inlined_call_operand.vmem [shape: f32[2,4,320], index: 6, kind: output, shape index: {}]  }
   0x1 LB: > { %s1104_s22 = sadd.s32 4294967295, %s1240_s21   ;;  %p1108_p0 = scmp.ge.s32.totalorder %s1240_s21, 1  ;;  %s1240_s21 = sphi %s1329_s21, %s16_s21  }
   0x2   : > { %p212_p1 = scmp.lt.s32.totalorder %s1240_s21, 3 }
   0x4   : > { %p213_p2 = pnand %p1108_p0, %p212_p1 }
   0x5   : > { %p242_p3 = scmp.lt.s32.totalorder (!%p213_p2), %s1104_s22, 1  ;;  %v1242_v0 = vmov (!%p213_p2), 0.0   ;;  %v1340_v1 = vld [vmem:[%s1491_s3] sm:$0x3] (!%p213_p2)  ;;  %v1243_v2 = vmov (!%p213_p2), 2   ;;  %v1244_v3 = vmov (!%p213_p2), 0   ;;  %v446_v56 = vlaneseq (!%p213_p2) }
   0x6   : > { %216 = sbr.rel (%p213_p2) target bundleno = 501 (0x1f5), region = 44  ;;  %342 = vmatprep.mubr.f32.mxu0 (!%p213_p2), %v1242_v0  ;;  %413 = vmatprep.mubr.f32.mxu1 (!%p213_p2), %v1242_v0  ;;  %v255_v4 = vld [vmem:[%s1490_s2] sm:$0x3] (!%p213_p2)  ;;  %vm269_vm0 = vcmask (!%p213_p2), 1043456   ;;  %v1245_v9 = vmov (!%p213_p2), 3   ;;  %vm265_vm1 = vcmask (!%p213_p2), 31744  }
   0x7   : > { %1187 = vset.pattern.permute.xlu1 (!%p213_p2), %v1243_v2  ;;  %1185 = vset.pattern.permute.xlu0 (!%p213_p2), %v1244_v3  ;;  %v254_v10 = vld [vmem:[%s1489_s1] sm:$0x3] (!%p213_p2)  ;;  %v1246_v11 = vmov (!%p213_p2), 1   ;;  %v1247_v12 = vmov (!%p213_p2), 4   ;;  %v1248_v13 = vmov (!%p213_p2), 5   ;;  %v1249_v14 = vmov (!%p213_p2), 6  }
   0x8   : > { %537 = vperm.xlu1 (!%p213_p2), %1187, %v1340_v1   ;;  %258 = vperm.xlu0 (!%p213_p2), %1185, %v255_v4   ;;  %v1250_v15 = vmov (!%p213_p2), 8   ;;  %v1251_v16 = vmov (!%p213_p2), 7   ;;  %v1252_v17 = vmov (!%p213_p2), 11   ;;  %v1253_v18 = vmov (!%p213_p2), 9   ;;  %s1270_s11 = smov (!%p213_p2), 127   ;;  %s1271_s12 = smov (!%p213_p2), 126  }
   0x9   : > { %v1254_v19 = vmov (!%p213_p2), 14   ;;  %v1255_v20 = vmov (!%p213_p2), 10   ;;  %v1256_v21 = vmov (!%p213_p2), 17   ;;  %v1257_v22 = vmov (!%p213_p2), 12   ;;  %s1272_s13 = smov (!%p213_p2), 125   ;;  %s1273_s14 = smov (!%p213_p2), 124  }
   0xa   : > { %v1258_v23 = vmov (!%p213_p2), 20   ;;  %v1259_v24 = vmov (!%p213_p2), 13   ;;  %v1260_v25 = vmov (!%p213_p2), 23   ;;  %v1261_v26 = vmov (!%p213_p2), 15   ;;  %s1274_s15 = smov (!%p213_p2), 108   ;;  %s1275_s16 = smov (!%p213_p2), 107  }
   0xb   : > { %v1262_v27 = vmov (!%p213_p2), 16   ;;  %v1263_v28 = vmov (!%p213_p2), 18   ;;  %v1264_v29 = vmov (!%p213_p2), 19   ;;  %v1265_v30 = vmov (!%p213_p2), 21   ;;  %s1276_s17 = smov (!%p213_p2), 106   ;;  %s1277_s18 = smov (!%p213_p2), 105  }
   0xc   : > { %1188 = vset.pattern.permute.xlu1 (!%p213_p2), %v1245_v9  ;;  %1186 = vset.pattern.permute.xlu0 (!%p213_p2), %v1246_v11  ;;  %v1266_v31 = vmov (!%p213_p2), 22   ;;  %v1267_v32 = vmov (!%p213_p2), 24   ;;  %v447_v62 = vshrl.u32 (!%p213_p2), %v446_v56, 7  ;;  %v1268_v4 = vmov (!%p213_p2), 1983009808   ;;  %s1278_s19 = smov (!%p213_p2), 104  }
   0xd   : > { %s1500_s22 = smov (!%p242_p3, %s1104_s22), 1  ;;  %557 = vperm.xlu1 %1188, %v1340_v1   ;;  %517 = vperm.xlu0 %1186, %v1340_v1   ;;  %vm492_vm2 = vcmask 1041408   ;;  %vm493_vm3 = vcmask 1043458   ;;  %vm495_vm5 = vcmask 1045508   ;;  %vm497_vm7 = vcmask 162822   ;;  %s1279_s20 = smov 88  }
   0xe   : > { %s1123_s27 = sshll.u32 %s1500_s22, 4  ;;  %v448_v63 = vsub.s32 0, %v447_v62  ;;  %v456_v2 = vsub.s32 2, %v447_v62  ;;  %vm1396_vm4 = vmor %vm493_vm3, %vm492_vm2  ;;  %s1280_s23 = smov 87   ;;  %vm532_vm9 = vcmask 1039360   ;;  %vm552_vm10 = vcmask 1031168  }
   0xf   : > { %s246_s30 = scalar_lea.vmem %s1488_s0, %s1123_s27  ;;  %vm496_vm6 = vmor %vm495_vm5, %vm1396_vm4  ;;  %s1281_s24 = smov 86   ;;  %vm572_vm11 = vcmask 1022976   ;;  %vm592_vm12 = vcmask 1014784   ;;  %vm612_vm13 = vcmask 883712   ;;  %vm632_vm14 = vcmask 875520  }
  0x10   : > { %v252_v5 = vld [vmem:[%s246_s30] sm:$0xff]  ;;  %v253_v6 = vld [vmem:[%s246_s30 + $0x8] sm:$0xff]  ;;  %vm498_vm8 = vmor %vm497_vm7, %vm496_vm6  ;;  %s1282_s25 = smov 85   ;;  %s1283_s26 = smov 84   ;;  %vm652_vm15 = vcmask 867328   ;;  %vm712_vm2 = vcmask 719872  }
  0x11   : > { %v263_v7 = vcombine.high %v252_v5, %v252_v5  ;;  %v264_v8 = vcombine.high %v253_v6, %v253_v6  ;;  %1189 = vset.pattern.permute.xlu1 %v1247_v12  ;;  %1190 = vset.pattern.permute.xlu0 %v1248_v13  ;;  %s1284_s27 = smov 68   ;;  %s1285_s28 = smov 67   ;;  %vm732_vm3 = vcmask 711680   ;;  %vm752_vm5 = vcmask 703488  }
  0x12   : > { %577 = vperm.xlu1 %1189, %v1340_v1   ;;  %597 = vperm.xlu0 %1190, %v1340_v1   ;;  %s1286_s29 = smov 66   ;;  %s1287_s30 = smov 65   ;;  %vm772_vm6 = vcmask 695296   ;;  %vm792_vm7 = vcmask 687104  }
  0x13   : > { %1112 = vmatprep.subr.msk.mxu0 %vm269_vm0, %v263_v7  ;;  %1115 = vmatprep.subr.msk.mxu1 %vm269_vm0, %v264_v8  ;;  %s1288_s7 = smov 64   ;;  %s1289_s8 = smov 48  }
  0x14   : > { %1113 = vmatpush1.msk.msra.mxu0 %vm269_vm0, %v252_v5  ;;  %1116 = vmatpush1.msk.msra.mxu1 %vm269_vm0, %v253_v6  ;;  %v477_v5 = vunpack.c.l.s4 %v1268_v4  ;;  %v460_v6 = vsub.s32 3, %v447_v62  ;;  %s1290_s9 = smov 47   ;;  %vm672_vm0 = vcmask 859136  }
  0x15   : > { %1114 = vmatmul.mubr.msk.f32.vlgmr.msra.gmra.mrb[0].mxu0 %vm265_vm1, %v254_v10  ;;  %1117 = vmatmul.mubr.msk.f32.vlgmr.msra.gmra.mrb[0].mxu1 %vm265_vm1, %v254_v10  ;;  %vm692_vm1 = vcmask 850944  }
  0x16   : > { %1191 = vset.pattern.permute.xlu1 %v1249_v14  ;;  %1193 = vset.pattern.permute.xlu0 %v1250_v15  ;;  %v478_v13 = vunpack.c.0.s8 %v477_v5 }
  0x17   : > { %617 = vperm.xlu1 %1191, %v1340_v1   ;;  %657 = vperm.xlu0 %1193, %v1340_v1  }
  0x1b   : > { %1192 = vset.pattern.permute.xlu1 %v1251_v16  ;;  %1196 = vset.pattern.permute.xlu0 %v1252_v17 }
  0x1c   : > { %637 = vperm.xlu1 %1192, %v1340_v1   ;;  %717 = vperm.xlu0 %1196, %v1340_v1  }
  0x20   : > { %1194 = vset.pattern.permute.xlu1 %v1253_v18  ;;  %1199 = vset.pattern.permute.xlu0 %v1254_v19 }
  0x21   : > { %677 = vperm.xlu1 %1194, %v1340_v1   ;;  %777 = vperm.xlu0 %1199, %v1340_v1  }
  0x25   : > { %1195 = vset.pattern.permute.xlu1 %v1255_v20  ;;  %1202 = vset.pattern.permute.xlu0 %v1256_v21 }
  0x26   : > { %697 = vperm.xlu1 %1195, %v1340_v1   ;;  %837 = vperm.xlu0 %1202, %v1340_v1  }
  0x2a   : > { %1197 = vset.pattern.permute.xlu1 %v1257_v22  ;;  %1205 = vset.pattern.permute.xlu0 %v1258_v23 }
  0x2b   : > { %737 = vperm.xlu1 %1197, %v1340_v1   ;;  %898 = vperm.xlu0 %1205, %v1340_v1  }
  0x2f   : > { %1198 = vset.pattern.permute.xlu1 %v1259_v24  ;;  %1208 = vset.pattern.permute.xlu0 %v1260_v25  ;;  %v481_v24 = vsub.s32 %v478_v13, %v447_v62 }
  0x30   : > { %757 = vperm.xlu1 %1198, %v1340_v1   ;;  %958 = vperm.xlu0 %1208, %v1340_v1  }
  0x34   : > { %1200 = vset.pattern.permute.xlu1 %v1261_v26  ;;  %1211 = vset.pattern.permute.xlu0 %v1244_v3 }
  0x35   : > { %797 = vperm.xlu1 %1200, %v1340_v1  }
  0x39   : > { %1201 = vset.pattern.permute.xlu1 %v1262_v27 }
  0x3a   : > { %817 = vperm.xlu1 %1201, %v1340_v1  }
  0x3e   : > { %1203 = vset.pattern.permute.xlu1 %v1263_v28 }
  0x3f   : > { %857 = vperm.xlu1 %1203, %v1340_v1  }
  0x43   : > { %1204 = vset.pattern.permute.xlu1 %v1264_v29 }
  0x44   : > { %877 = vperm.xlu1 %1204, %v1340_v1  }
  0x48   : > { %1206 = vset.pattern.permute.xlu1 %v1265_v30  ;;  %v1269_v30 = vmov 269488144  }
  0x49   : > { %918 = vperm.xlu1 %1206, %v1340_v1  }
  0x4d   : > { %1207 = vset.pattern.permute.xlu1 %v1266_v31  ;;  %v507_v31 = vunpack.c.l.s4 %v1269_v30 }
  0x4e   : > { %938 = vperm.xlu1 %1207, %v1340_v1  }
  0x52   : > { %1209 = vset.pattern.permute.xlu1 %v1267_v32 }
  0x53   : > { %978 = vperm.xlu1 %1209, %v1340_v1  }
  0x57   : > { %1210 = vset.pattern.permute.xlu1 %v1244_v3  ;;  %v452_v3 = vsub.s32 1, %v447_v62 }
  0x58   : > { %504 = vperm.xlu1 %1210, %v1340_v1   ;;  %v444_v1 = vld [vmem:[%s1493_s5] sm:$0xf] }
  0x59   : > { %v449_v7 = vrot.slane %v444_v1, %v448_v63  ;;  %v457_v9 = vrot.slane %v444_v1, %v456_v2  ;;  %v453_v12 = vrot.slane %v444_v1, %v452_v3  ;;  %v461_v17 = vrot.slane %v444_v1, %v460_v6 }
  0x87   : > { %v259_v33 = vpop.permute.xlu0 %258  ;;  %v1382_v50 = vpop.permute.xlu1 %537 }
  0x8c   : > { %v1384_v51 = vpop.permute.xlu1 %557 }
  0x91   : > { %v1386_v59 = vpop.permute.xlu1 %577 }
  0x96   : > { %v1389_v0 = vpop.permute.xlu1 %617 }
  0x9b   : > { %v1394_v15 = vpop.permute.xlu1 %637 }
  0xa0   : > { %v678_v29 = vpop.permute.xlu1 %677 }
  0xe8   : > { %v344_v34 = vpop.f32.mrb[0].mxu0  ;;  %v415_v35 = vpop.f32.mrb[0].mxu1 }
  0xe9   : > { %v345_v36 = vadd.f32 %v344_v34, %v259_v33  ;;  %v416_v37 = vadd.f32 %v415_v35, %v259_v33  ;;  %v346_v38 = vpop.f32.mrb[1].mxu0  ;;  %v417_v39 = vpop.f32.mrb[1].mxu1  ;;  %v508_v35 = vunpack.c.0.s8 %v507_v31 }
  0xea   : > { %v347_v40 = vadd.f32 %v346_v38, %v259_v33  ;;  %v418_v41 = vadd.f32 %v417_v39, %v259_v33  ;;  %v518_v38 = vpop.permute.xlu0 %517 }
  0xeb   : > { %v420_v42 = vsub.f32 0.0, %v345_v36  ;;  %v422_v43 = vsub.f32 0.0, %v416_v37 }
  0xec   : > { %v421_v44 = vsub.f32 0.0, %v347_v40  ;;  %v423_v45 = vsub.f32 0.0, %v418_v41 }
  0xed   : > { %v424_v46 = vmul.f32 1.442695, %v420_v42  ;;  %v428_v47 = vmul.f32 1.442695, %v422_v43 }
  0xee   : > { %v426_v48 = vmul.f32 1.442695, %v421_v44  ;;  %v430_v49 = vmul.f32 1.442695, %v423_v45 }
  0xef   : > { %1214 = vpow2.f32 %v424_v46  ;;  %v598_v46 = vpop.permute.xlu0 %597 }
  0xf0   : > { %1216 = vpow2.f32 %v428_v47 }
  0xf1   : > { %1218 = vpow2.f32 %v426_v48 }
  0xf2   : > { %1220 = vpow2.f32 %v430_v49 }
  0xf9   : > { %v1215_v52 = vpop.eup %1214 }
  0xfa   : > { %v1217_v53 = vpop.eup %1216  ;;  %v432_v54 = vadd.f32 1.0, %v1215_v52 }
  0xfb   : > { %v1219_v55 = vpop.eup %1218  ;;  %v434_v57 = vadd.f32 1.0, %v1217_v53 }
  0xfc   : > { %v1221_v58 = vpop.eup %1220  ;;  %1222 = vrcp.f32 %v432_v54  ;;  %v433_v60 = vadd.f32 1.0, %v1219_v55  ;;  %v658_v54 = vpop.permute.xlu0 %657 }
  0xfd   : > { %1224 = vrcp.f32 %v434_v57  ;;  %v435_v61 = vadd.f32 1.0, %v1221_v58 }
  0xfe   : > { %1226 = vrcp.f32 %v433_v60 }
  0xff   : > { %1228 = vrcp.f32 %v435_v61 }
 0x100   : > { %v718_v63 = vpop.permute.xlu0 %717 }
 0x106   : > { %v1223_v8 = vpop.eup %1222 }
 0x107   : > { %v1225_v10 = vpop.eup %1224  ;;  %v440_v11 = vmul.f32 %v1223_v8, %v345_v36  ;;  %v698_v36 = vpop.permute.xlu1 %697 }
 0x108   : > { %v1227_v14 = vpop.eup %1226  ;;  %v442_v16 = vmul.f32 %v1225_v10, %v416_v37  ;;  %v1402_v37 = vsub.s32 %v508_v35, %v447_v62 }
 0x109   : > { %v1229_v18 = vpop.eup %1228  ;;  %v466_v19 = vmul.f32 %v449_v7, %v440_v11  ;;  %v441_v20 = vmul.f32 %v1227_v14, %v347_v40 }
 0x10a   : > { %v468_v21 = vmul.f32 %v457_v9, %v442_v16  ;;  %v443_v22 = vmul.f32 %v1229_v18, %v418_v41  ;;  %v525_v39 = vrot.slane %v518_v38, %v1402_v37  ;;  %v545_v43 = vrot.slane %v1382_v50, %v1402_v37  ;;  %v778_v9 = vpop.permute.xlu0 %777  ;;  %v997_v38 = vld [vmem:[%s1492_s4] sm:$0x3] }
 0x10b   : > { %v467_v23 = vmul.f32 %v453_v12, %v441_v20  ;;  %v738_v40 = vpop.permute.xlu1 %737  ;;  %v565_v44 = vrot.slane %v1384_v51, %v1402_v37  ;;  %v605_v47 = vrot.slane %v598_v46, %v1402_v37  ;;  %v585_v52 = vrot.slane %v1386_v59, %v1402_v37 }
 0x10c   : > { %v469_v26 = vmul.f32 %v461_v17, %v443_v22  ;;  %v625_v55 = vrot.slane %v1389_v0, %v1402_v37  ;;  %v645_v57 = vrot.slane %v1394_v15, %v1402_v37  ;;  %v685_v58 = vrot.slane %v678_v29, %v1402_v37 }
 0x10d   : > { %v474_v27 = vcombine.low %v466_v19, %v467_v23  ;;  %v665_v59 = vrot.slane %v658_v54, %v1402_v37  ;;  %v705_v1 = vrot.slane %v698_v36, %v1402_v37  ;;  %v725_v3 = vrot.slane %v718_v63, %v1402_v37 }
 0x10e   : > { %v475_v28 = vcombine.low %v468_v21, %v469_v26  ;;  %v745_v5 = vrot.slane %v738_v40, %v1402_v37  ;;  %v785_v13 = vrot.slane %v778_v9, %v1402_v37  ;;  %v838_v15 = vpop.permute.xlu0 %837 }
 0x10f   : > { %v482_v32 = vrot.slane %v474_v27, %v481_v24  ;;  %v758_v45 = vpop.permute.xlu1 %757  ;;  %v845_v19 = vrot.slane %v838_v15, %v1402_v37 }
 0x110   : > { %v489_v33 = vrot.slane %v475_v28, %v481_v24  ;;  %v765_v6 = vrot.slane %v758_v45, %v1402_v37 }
 0x112   : > { %v490_v34 = vcombine.low %v482_v32, %v489_v33  ;;  %v899_v26 = vpop.permute.xlu0 %898 }
 0x113   : > { %v798_v53 = vpop.permute.xlu1 %797  ;;  %v906_v30 = vrot.slane %v899_v26, %v1402_v37 }
 0x114   : > { %499 = vst.msk [vmem:[#allocation2] sm:$0xff] %vm498_vm8, %v490_v34  ;;  %v805_v12 = vrot.slane %v798_v53, %v1402_v37  ;;  %vm812_vm8 = vcmask 556032  }
 0x116   : > { %v959_v36 = vpop.permute.xlu0 %958 }
 0x117   : > { %v818_v62 = vpop.permute.xlu1 %817  ;;  %v966_v40 = vrot.slane %v959_v36, %v1402_v37 }
 0x118   : > { %v825_v17 = vrot.slane %v818_v62, %v1402_v37 }
 0x11b   : > { %v1405_v41 = vld [vmem:[#allocation2] sm:$0x3f]  ;;  %v858_v8 = vpop.permute.xlu1 %857 }
 0x11c   : > { %v527_v42 = vmul.f32 %v525_v39, %v1405_v41  ;;  %v547_v48 = vmul.f32 %v545_v43, %v1405_v41  ;;  %v567_v49 = vmul.f32 %v565_v44, %v1405_v41  ;;  %v607_v50 = vmul.f32 %v605_v47, %v1405_v41  ;;  %v896_v31 = vld [vmem:[#allocation2] sm:$0xff] }
 0x11d   : > { %v587_v51 = vmul.f32 %v585_v52, %v1405_v41  ;;  %v627_v60 = vmul.f32 %v625_v55, %v1405_v41  ;;  %v647_v61 = vmul.f32 %v645_v57, %v1405_v41  ;;  %v687_v0 = vmul.f32 %v685_v58, %v1405_v41  ;;  %v1020_v45 = vld [vmem:[#allocation2] ss:$2 sm:$0x7]  ;;  %v1036_v47 = vld [vmem:[#allocation2 + $0x1] ss:$2 sm:$0x7] }
 0x11e   : > { %529 = vrot.lane.b32.xlu0 %v527_v42, %s1270_s11  ;;  %549 = vrot.lane.b32.xlu1 %v547_v48, %s1271_s12  ;;  %v667_v2 = vmul.f32 %v665_v59, %v1405_v41  ;;  %v707_v4 = vmul.f32 %v705_v1, %v1405_v41  ;;  %v727_v7 = vmul.f32 %v725_v3, %v1405_v41  ;;  %s1291_s12 = smov 46  }
 0x11f   : > { %v747_v10 = vmul.f32 %v745_v5, %v1405_v41  ;;  %v767_v11 = vmul.f32 %v765_v6, %v1405_v41  ;;  %v878_v14 = vpop.permute.xlu1 %877  ;;  %v807_v16 = vmul.f32 %v805_v12, %v1405_v41  ;;  %v787_v18 = vmul.f32 %v785_v13, %v1405_v41 }
 0x120   : > { %v827_v20 = vmul.f32 %v825_v17, %v1405_v41  ;;  %v865_v21 = vrot.slane %v858_v8, %v1402_v37  ;;  %v885_v22 = vrot.slane %v878_v14, %v1402_v37  ;;  %v847_v23 = vmul.f32 %v845_v19, %v1405_v41 }
 0x121   : > { %v908_v35 = vmul.f32 %v906_v30, %v896_v31  ;;  %v968_v44 = vmul.f32 %v966_v40, %v896_v31 }
 0x122   : > { %569 = vrot.lane.b32.xlu0 %v567_v49, %s1272_s13  ;;  %589 = vrot.lane.b32.xlu1 %v587_v51, %s1273_s14  ;;  %v867_v27 = vmul.f32 %v865_v21, %v1405_v41  ;;  %v887_v28 = vmul.f32 %v885_v22, %v1405_v41  ;;  %s1292_s13 = smov 45   ;;  %s1293_s14 = smov 44  }
 0x123   : > { %v919_v24 = vpop.permute.xlu1 %918 }
 0x124   : > { %v926_v29 = vrot.slane %v919_v24, %v1402_v37 }
 0x126   : > { %609 = vrot.lane.b32.xlu0 %v607_v50, %s1274_s15  ;;  %629 = vrot.lane.b32.xlu1 %v627_v60, %s1275_s16  ;;  %v928_v33 = vmul.f32 %v926_v29, %v896_v31  ;;  %s1124_s15 = smul.u32 12, %s1500_s22 }
 0x127   : > { %v939_v32 = vpop.permute.xlu1 %938 }
 0x128   : > { %v946_v34 = vrot.slane %v939_v32, %v1402_v37 }
 0x12a   : > { %649 = vrot.lane.b32.xlu0 %v647_v61, %s1276_s17  ;;  %669 = vrot.lane.b32.xlu1 %v667_v2, %s1277_s18  ;;  %v948_v39 = vmul.f32 %v946_v34, %v896_v31  ;;  %s251_s18 = scalar_lea.vmem %s1494_s6, %s1124_s15 }
 0x12b   : > { %v979_v42 = vpop.permute.xlu1 %978 }
 0x12c   : > { %v986_v43 = vrot.slane %v979_v42, %v1402_v37 }
 0x12e   : > { %689 = vrot.lane.b32.xlu0 %v687_v0, %s1278_s19  ;;  %709 = vrot.lane.b32.xlu1 %v707_v4, %s1279_s20  ;;  %v988_v46 = vmul.f32 %v986_v43, %v896_v31 }
 0x12f   : > { %v505_v48 = vpop.permute.xlu1 %504 }
 0x130   : > { %v512_v49 = vrot.slane %v505_v48, %v1402_v37 }
 0x132   : > { %729 = vrot.lane.b32.xlu0 %v727_v7, %s1280_s23  ;;  %749 = vrot.lane.b32.xlu1 %v747_v10, %s1281_s24  ;;  %v514_v51 = vmul.f32 %v512_v49, %v1405_v41 }
 0x136   : > { %769 = vrot.lane.b32.xlu0 %v767_v11, %s1282_s25  ;;  %789 = vrot.lane.b32.xlu1 %v787_v18, %s1283_s26 }
 0x13a   : > { %809 = vrot.lane.b32.xlu0 %v807_v16, %s1284_s27  ;;  %829 = vrot.lane.b32.xlu1 %v827_v20, %s1285_s28 }
 0x13e   : > { %849 = vrot.lane.b32.xlu0 %v847_v23, %s1286_s29  ;;  %869 = vrot.lane.b32.xlu1 %v867_v27, %s1287_s30 }
 0x142   : > { %889 = vrot.lane.b32.xlu0 %v887_v28, %s1288_s7  ;;  %910 = vrot.lane.b32.xlu1 %v908_v35, %s1289_s8 }
 0x146   : > { %930 = vrot.lane.b32.xlu0 %v928_v33, %s1290_s9  ;;  %950 = vrot.lane.b32.xlu1 %v948_v39, %s1291_s12 }
 0x14a   : > { %1000 = vperm.xlu0 %1211, %v997_v38   ;;  %970 = vrot.lane.b32.xlu1 %v968_v44, %s1292_s13 }
 0x14e   : > { %1022 = vrot.lane.b32.xlu0 %v1020_v45, %s1281_s24  ;;  %990 = vrot.lane.b32.xlu1 %v988_v46, %s1293_s14 }
 0x152   : > { %1038 = vrot.lane.b32.xlu1 %v1036_v47, %s1281_s24 }
 0x190   : > { %v530_v52 = vpop.permute.xlu0 %529  ;;  %v550_v54 = vpop.permute.xlu1 %549 }
 0x191   : > { %v531_v50 = vrot.slane %v530_v52, 2  ;;  %v551_v58 = vrot.slane %v550_v54, 2 }
 0x193   : > { %v533_v53 = vsel %vm532_vm9, %v530_v52, %v531_v50  ;;  %v553_v60 = vsel %vm552_vm10, %v550_v54, %v551_v58  ;;  %vm832_vm9 = vcmask 547840   ;;  %vm852_vm10 = vcmask 539648  }
 0x194   : > { %v535_v55 = vadd.f32 %v533_v53, %v514_v51  ;;  %v570_v57 = vpop.permute.xlu0 %569  ;;  %v590_v62 = vpop.permute.xlu1 %589 }
 0x195   : > { %v571_v59 = vrot.slane %v570_v57, 2  ;;  %v591_v1 = vrot.slane %v590_v62, 2 }
 0x196   : > { %v555_v63 = vadd.f32 %v553_v60, %v535_v55 }
 0x197   : > { %v573_v61 = vsel %vm572_vm11, %v570_v57, %v571_v59  ;;  %v593_v4 = vsel %vm592_vm12, %v590_v62, %v591_v1  ;;  %vm872_vm11 = vcmask 531456   ;;  %vm892_vm12 = vcmask 523264  }
 0x198   : > { %v610_v0 = vpop.permute.xlu0 %609  ;;  %v575_v3 = vadd.f32 %v573_v61, %v555_v63  ;;  %v630_v5 = vpop.permute.xlu1 %629 }
 0x199   : > { %v611_v2 = vrot.slane %v610_v0, 2  ;;  %v631_v8 = vrot.slane %v630_v5, 2 }
 0x19a   : > { %v595_v6 = vadd.f32 %v593_v4, %v575_v3 }
 0x19b   : > { %v613_v41 = vsel %vm612_vm13, %v610_v0, %v611_v2  ;;  %v633_v11 = vsel %vm632_vm14, %v630_v5, %v631_v8  ;;  %vm913_vm13 = vcmask 392192   ;;  %vm933_vm14 = vcmask 384000  }
 0x19c   : > { %v650_v7 = vpop.permute.xlu0 %649  ;;  %v615_v10 = vadd.f32 %v613_v41, %v595_v6  ;;  %v670_v13 = vpop.permute.xlu1 %669 }
 0x19d   : > { %v651_v9 = vrot.slane %v650_v7, 2  ;;  %v671_v16 = vrot.slane %v670_v13, 2 }
 0x19e   : > { %v635_v14 = vadd.f32 %v633_v11, %v615_v10 }
 0x19f   : > { %v653_v12 = vsel %vm652_vm15, %v650_v7, %v651_v9  ;;  %v673_v19 = vsel %vm672_vm0, %v670_v13, %v671_v16  ;;  %vm953_vm15 = vcmask 375808   ;;  %vm973_vm0 = vcmask 367616  }
 0x1a0   : > { %v690_v15 = vpop.permute.xlu0 %689  ;;  %v655_v18 = vadd.f32 %v653_v12, %v635_v14  ;;  %v710_v21 = vpop.permute.xlu1 %709 }
 0x1a1   : > { %v691_v17 = vrot.slane %v690_v15, 2  ;;  %v711_v24 = vrot.slane %v710_v21, 2 }
 0x1a2   : > { %v675_v22 = vadd.f32 %v673_v19, %v655_v18 }
 0x1a3   : > { %v693_v20 = vsel %vm692_vm1, %v690_v15, %v691_v17  ;;  %v713_v28 = vsel %vm712_vm2, %v710_v21, %v711_v24  ;;  %vm993_vm1 = vcmask 359424   ;;  %vm1468_vm2 = vcmp.lt.s32.totalorder %v446_v56, 320 }
 0x1a4   : > { %v730_v23 = vpop.permute.xlu0 %729  ;;  %v695_v27 = vadd.f32 %v693_v20, %v675_v22  ;;  %v750_v30 = vpop.permute.xlu1 %749 }
 0x1a5   : > { %v731_v26 = vrot.slane %v730_v23, 2  ;;  %v751_v33 = vrot.slane %v750_v30, 2 }
 0x1a6   : > { %v715_v31 = vadd.f32 %v713_v28, %v695_v27 }
 0x1a7   : > { %v733_v29 = vsel %vm732_vm3, %v730_v23, %v731_v26  ;;  %v753_v36 = vsel %vm752_vm5, %v750_v30, %v751_v33  ;;  %vm1017_vm3 = vcmask 521220  }
 0x1a8   : > { %v770_v32 = vpop.permute.xlu0 %769  ;;  %v735_v35 = vadd.f32 %v733_v29, %v715_v31  ;;  %v790_v39 = vpop.permute.xlu1 %789 }
 0x1a9   : > { %v771_v34 = vrot.slane %v770_v32, 2  ;;  %v791_v43 = vrot.slane %v790_v39, 2 }
 0x1aa   : > { %v755_v40 = vadd.f32 %v753_v36, %v735_v35 }
 0x1ab   : > { %v773_v38 = vsel %vm772_vm6, %v770_v32, %v771_v34  ;;  %v793_v46 = vsel %vm792_vm7, %v790_v39, %v791_v43  ;;  %vm1018_vm6 = vmor %vm1017_vm3, %vm1396_vm4 }
 0x1ac   : > { %v810_v42 = vpop.permute.xlu0 %809  ;;  %v775_v45 = vadd.f32 %v773_v38, %v755_v40  ;;  %v830_v48 = vpop.permute.xlu1 %829 }
 0x1ad   : > { %v811_v44 = vrot.slane %v810_v42, 2  ;;  %v831_v50 = vrot.slane %v830_v48, 2 }
 0x1ae   : > { %v795_v49 = vadd.f32 %v793_v46, %v775_v45 }
 0x1af   : > { %v813_v47 = vsel %vm812_vm8, %v810_v42, %v811_v44  ;;  %v833_v54 = vsel %vm832_vm9, %v830_v48, %v831_v50 }
 0x1b0   : > { %v850_v52 = vpop.permute.xlu0 %849  ;;  %v815_v53 = vadd.f32 %v813_v47, %v795_v49  ;;  %v870_v57 = vpop.permute.xlu1 %869 }
 0x1b1   : > { %v851_v51 = vrot.slane %v850_v52, 2  ;;  %v871_v60 = vrot.slane %v870_v57, 2 }
 0x1b2   : > { %v835_v58 = vadd.f32 %v833_v54, %v815_v53 }
 0x1b3   : > { %v853_v55 = vsel %vm852_vm10, %v850_v52, %v851_v51  ;;  %v873_v63 = vsel %vm872_vm11, %v870_v57, %v871_v60 }
 0x1b4   : > { %v890_v59 = vpop.permute.xlu0 %889  ;;  %v855_v62 = vadd.f32 %v853_v55, %v835_v58  ;;  %v911_v1 = vpop.permute.xlu1 %910 }
 0x1b5   : > { %v891_v61 = vrot.slane %v890_v59, 2  ;;  %v912_v4 = vrot.slane %v911_v1, 2 }
 0x1b6   : > { %v875_v2 = vadd.f32 %v873_v63, %v855_v62 }
 0x1b7   : > { %v893_v0 = vsel %vm892_vm12, %v890_v59, %v891_v61  ;;  %v914_v6 = vsel %vm913_vm13, %v911_v1, %v912_v4 }
 0x1b8   : > { %v931_v3 = vpop.permute.xlu0 %930  ;;  %v895_v5 = vadd.f32 %v893_v0, %v875_v2  ;;  %v951_v7 = vpop.permute.xlu1 %950 }
 0x1b9   : > { %v932_v41 = vrot.slane %v931_v3, 2  ;;  %v952_v10 = vrot.slane %v951_v7, 2 }
 0x1ba   : > { %v916_v8 = vadd.f32 %v914_v6, %v895_v5 }
 0x1bb   : > { %v934_v9 = vsel %vm933_vm14, %v931_v3, %v932_v41  ;;  %v954_v14 = vsel %vm953_vm15, %v951_v7, %v952_v10 }
 0x1bc   : > { %v936_v11 = vadd.f32 %v934_v9, %v916_v8  ;;  %v971_v12 = vpop.permute.xlu1 %970 }
 0x1bd   : > { %v972_v13 = vrot.slane %v971_v12, 2 }
 0x1be   : > { %v956_v15 = vadd.f32 %v954_v14, %v936_v11 }
 0x1bf   : > { %v974_v17 = vsel %vm973_vm0, %v971_v12, %v972_v13 }
 0x1c0   : > { %v991_v16 = vpop.permute.xlu1 %990  ;;  %v976_v20 = vadd.f32 %v974_v17, %v956_v15 }
 0x1c1   : > { %v992_v18 = vrot.slane %v991_v16, 2 }
 0x1c3   : > { %v994_v19 = vsel %vm993_vm1, %v991_v16, %v992_v18 }
 0x1c4   : > { %v1039_v21 = vpop.permute.xlu1 %1038  ;;  %v996_v26 = vadd.f32 %v994_v19, %v976_v20 }
 0x1c5   : > { %v1040_v23 = vrot.slane %v1039_v21, 1 }
 0x1c7   : > { %v1041_v28 = vsel %vm752_vm5, %v1039_v21, %v1040_v23 }
 0x1c8   : > { %1119 = vst.msk [vmem:[%s251_s18 + $0x2] ss:$4 sm:$0x7] %vm1468_vm2, %v1041_v28 }
 0x1c9   : > { %v1001_v24 = vpop.permute.xlu0 %1000 }
 0x1ca   : > { %v1008_v27 = vrot.slane %v1001_v24, %v1402_v37 }
 0x1cc   : > { %v1010_v29 = vadd.f32 %v1008_v27, %v996_v26 }
 0x1cd   : > { %v1023_v30 = vpop.permute.xlu0 %1022 }
 0x1ce   : > { %v1011_v31 = vsub.f32 0.0, %v1010_v29  ;;  %v1024_v32 = vrot.slane %v1023_v30, 1 }
 0x1d0   : > { %v1012_v33 = vmul.f32 1.442695, %v1011_v31  ;;  %v1025_v56 = vsel %vm752_vm5, %v1023_v30, %v1024_v32 }
 0x1d1   : > { %1031 = vst.msk [vmem:[%s251_s18] ss:$4 sm:$0x7] %vm1468_vm2, %v1025_v56 }
 0x1d2   : > { %1230 = vpow2.f32 %v1012_v33 }
 0x1dc   : > { %v1231_v34 = vpop.eup %1230 }
 0x1dd   : > { %v1014_v35 = vadd.f32 1.0, %v1231_v34 }
 0x1df   : > { %1232 = vrcp.f32 %v1014_v35 }
 0x1e9   : > { %v1233_v37 = vpop.eup %1232 }
 0x1ea   : > { %v1016_v36 = vmul.f32 %v1233_v37, %v1010_v29 }
 0x1ec   : > { %1019 = vst.msk [vmem:[#allocation3] sm:$0x3f] %vm1018_vm6, %v1016_v36 }
 0x1f3   : > { %v1032_v38 = vld [vmem:[#allocation3] ss:$2 sm:$0x7]  ;;  %v1046_v39 = vld [vmem:[#allocation3 + $0x1] ss:$2 sm:$0x7] }
 0x1f4   : > { %1118 = vst.msk [vmem:[%s251_s18 + $0x1] ss:$4 sm:$0x7] %vm1468_vm2, %v1032_v38  ;;  %1120 = vst.msk [vmem:[%s251_s18 + $0x3] ss:$4 sm:$0x7] %vm1468_vm2, %v1046_v39 }
 0x1f5 PF: > { %s16_s21 = sadd.s32 1, %s1240_s21  }
 0x1f6   : > { %p13_p4 = scmp.ge.s32.totalorder %s16_s21, 4  }
 0x1f8   :  { %15 = sbr.rel (!%p13_p4) target bundleno = 1 (0x1), region = 79 }

// kernel: gs_bottleneck.3
= control target key start
LH: loop header
LB: loop body
LE: loop exit
PB: predicated region body
PF: predicated region fallthrough
CT: control target
= control target key end

     0   :  { %s3392_s30 = smov 0   ;;  %s4048_s0 = inlined_call_operand.vmem [shape: f32[2,4,490], index: 0, kind: input, shape index: {}]   ;;  %s4049_s1 = inlined_call_operand.vmem [shape: f32[2,4,352], index: 1, kind: input, shape index: {}]   ;;  %s4050_s2 = inlined_call_operand.vmem [shape: f32[3,3,4,4], index: 2, kind: input, shape index: {}]   ;;  %s4051_s3 = inlined_call_operand.vmem [shape: f32[4,1], index: 3, kind: input, shape index: {}]   ;;  %s4052_s4 = inlined_call_operand.vmem [shape: f32[4,25], index: 4, kind: input, shape index: {}]   ;;  %s4053_s5 = inlined_call_operand.vmem [shape: f32[4,1], index: 5, kind: input, shape index: {}]   ;;  %s4054_s6 = inlined_call_operand.vmem [shape: f32[1,444], index: 6, kind: input, shape index: {}]   ;;  %s4055_s7 = inlined_call_operand.vmem [shape: f32[8,4], index: 7, kind: input, shape index: {}]   ;;  %s4056_s8 = inlined_call_operand.vmem [shape: f32[8,1], index: 8, kind: input, shape index: {}]   ;;  %s4057_s9 = inlined_call_operand.vmem [shape: f32[2,8,352], index: 9, kind: output, shape index: {}]  }
   0x1 LB: > { %s3041_s10 = sadd.s32 4294967295, %s3288_s30   ;;  %p3045_p0 = scmp.ge.s32.totalorder %s3288_s30, 1  ;;  %s3288_s30 = sphi %s3392_s30, %s19_s30  }
   0x2   : > { %p297_p1 = scmp.lt.s32.totalorder %s3288_s30, 3 }
   0x4   : > { %p298_p2 = pnand %p3045_p0, %p297_p1 }
   0x5   : > { %p338_p3 = scmp.lt.s32.totalorder (!%p298_p2), %s3041_s10, 1  ;;  %v3290_v0 = vmov (!%p298_p2), 0.0   ;;  %s3291_s15 = smov (!%p298_p2), 127   ;;  %v3299_v5 = vmov (!%p298_p2), 1   ;;  %v3485_v6 = vld [vmem:[%s4052_s4] sm:$0xf] (!%p298_p2) }
   0x6   : > { %301 = sbr.rel (%p298_p2) target bundleno = 733 (0x2dd), region = 56  ;;  %522 = vmatprep.mubr.f32.mxu1 (!%p298_p2), %v3290_v0  ;;  %451 = vmatprep.mubr.f32.mxu0 (!%p298_p2), %v3290_v0  ;;  %s3292_s16 = smov (!%p298_p2), 126   ;;  %v3300_v7 = vmov (!%p298_p2), 0   ;;  %v1921_v8 = vld [vmem:[%s4051_s3] sm:$0xf] (!%p298_p2)  ;;  %v3301_v9 = vmov (!%p298_p2), 2  }
   0x7   : > { %s3293_s17 = smov (!%p298_p2), 106   ;;  %s3294_s18 = smov (!%p298_p2), 105   ;;  %3222 = vset.pattern.permute.xlu1 (!%p298_p2), %v3299_v5  ;;  %3221 = vset.pattern.permute.xlu0 (!%p298_p2), %v3300_v7  ;;  %v3302_v10 = vmov (!%p298_p2), 3   ;;  %v3303_v11 = vmov (!%p298_p2), 4   ;;  %v3304_v12 = vmov (!%p298_p2), 6   ;;  %v3305_v13 = vmov (!%p298_p2), 5  }
   0x8   : > { %s3295_s19 = smov (!%p298_p2), 104   ;;  %s3296_s20 = smov (!%p298_p2), 84   ;;  %v3306_v14 = vmov (!%p298_p2), 9   ;;  %v3307_v15 = vmov (!%p298_p2), 7   ;;  %v3308_v16 = vmov (!%p298_p2), 12   ;;  %v3309_v17 = vmov (!%p298_p2), 8  }
   0x9   : > { %s3297_s21 = smov (!%p298_p2), 83   ;;  %s3298_s22 = smov (!%p298_p2), 82   ;;  %v3310_v18 = vmov (!%p298_p2), 15   ;;  %v3311_v19 = vmov (!%p298_p2), 10   ;;  %v3312_v20 = vmov (!%p298_p2), 18   ;;  %v3313_v21 = vmov (!%p298_p2), 11  }
   0xa   : > { %v3314_v22 = vmov (!%p298_p2), 21   ;;  %v3315_v23 = vmov (!%p298_p2), 13   ;;  %v3316_v24 = vmov (!%p298_p2), 24   ;;  %v3317_v25 = vmov (!%p298_p2), 14   ;;  %v3050_v32 = vld [vmem:[%s4050_s2 + $0x4] sm:$0xf] (!%p298_p2) }
   0xb   : > { %v3318_v26 = vmov (!%p298_p2), 16   ;;  %vm378_vm0 = vcmask (!%p298_p2), 1043456   ;;  %v3319_v30 = vmov (!%p298_p2), 17   ;;  %vm370_vm1 = vcmask (!%p298_p2), 1039360   ;;  %v355_v41 = vld [vmem:[%s4050_s2] sm:$0xf] (!%p298_p2) }
   0xc   : > { %vm374_vm2 = vcmask (!%p298_p2), 31744   ;;  %vm698_vm3 = vcmask (!%p298_p2), 1031168   ;;  %v3320_v42 = vmov (!%p298_p2), 19   ;;  %vm875_vm4 = vcmask (!%p298_p2), 867328   ;;  %v3063_v51 = vld [vmem:[%s4050_s2 + $0x8] sm:$0xf] (!%p298_p2) }
   0xd   : > { %s4059_s10 = smov (!%p338_p3, %s3041_s10), 1  ;;  %v3321_v49 = vmov 20   ;;  %vm1052_vm5 = vcmask 859136   ;;  %v3322_v58 = vmov 22   ;;  %v3070_v60 = vld [vmem:[%s4050_s2 + $0xc] sm:$0xf] }
   0xe   : > { %s3119_s11 = sshll.u32 %s4059_s10, 4  ;;  %vm1229_vm6 = vcmask 850944   ;;  %vm1406_vm7 = vcmask 687104   ;;  %vm1583_vm8 = vcmask 678912   ;;  %vm1760_vm9 = vcmask 670720   ;;  %s3159_s25 = smul.u32 12, %s4059_s10 }
   0xf   : > { %s342_s14 = scalar_lea.vmem %s4048_s0, %s3119_s11  ;;  %vm3324_vm10 = vmmov 0   ;;  %vm1990_vm11 = vcmask 490500   ;;  %s3327_s23 = smov 125   ;;  %vm2088_vm13 = vcmask 1022976   ;;  %vm2116_vm14 = vcmask 1014784  }
  0x10   : > { %v3408_v1 = vld [vmem:[%s342_s14] sm:$0xff]  ;;  %v3410_v2 = vld [vmem:[%s342_s14 + $0x8] sm:$0xff]  ;;  %s347_s28 = scalar_lea.vmem %s4049_s1, %s3159_s25  ;;  %vm1991_vm12 = vmor %vm1990_vm11, %vm378_vm0  ;;  %s3326_s14 = smov 37   ;;  %vm2225_vm15 = vcmask 842752   ;;  %vm2599_vm11 = vcmask 318464  }
  0x11   : > { %362 = vrot.lane.b32.xlu1 %v3408_v1, %s3291_s15  ;;  %v3416_v3 = vcombine.high %v3408_v1, %v3408_v1  ;;  %v3420_v4 = vcombine.high %v3410_v2, %v3410_v2  ;;  %s3328_s24 = smov 124   ;;  %s3336_s25 = smov 59  }
  0x12   : > { %s3337_s26 = smov 58   ;;  %s3338_s27 = smov 40  }
  0x13   : > { %364 = vrot.lane.b32.xlu0 %v3416_v3, %s3291_s15  ;;  %s3340_s29 = smov 38   ;;  %s3341_s11 = smov 36  }
  0x15   : > { %368 = vrot.lane.b32.xlu1 %v3420_v4, %s3291_s15 }
  0x17   : > { %366 = vrot.lane.b32.xlu0 %v3410_v2, %s3291_s15 }
  0x19   : > { %694 = vrot.lane.b32.xlu1 %v3410_v2, %s3292_s16 }
  0x1b   : > { %692 = vrot.lane.b32.xlu0 %v3416_v3, %s3292_s16 }
  0x1d   : > { %696 = vrot.lane.b32.xlu1 %v3420_v4, %s3292_s16 }
  0x1f   : > { %690 = vrot.lane.b32.xlu0 %v3408_v1, %s3292_s16 }
  0x21   : > { %871 = vrot.lane.b32.xlu1 %v3410_v2, %s3293_s17 }
  0x23   : > { %869 = vrot.lane.b32.xlu0 %v3416_v3, %s3293_s17 }
  0x25   : > { %873 = vrot.lane.b32.xlu1 %v3420_v4, %s3293_s17 }
  0x27   : > { %867 = vrot.lane.b32.xlu0 %v3408_v1, %s3293_s17 }
  0x29   : > { %1048 = vrot.lane.b32.xlu1 %v3410_v2, %s3294_s18 }
  0x2b   : > { %1046 = vrot.lane.b32.xlu0 %v3416_v3, %s3294_s18 }
  0x2d   : > { %1050 = vrot.lane.b32.xlu1 %v3420_v4, %s3294_s18 }
  0x2f   : > { %1044 = vrot.lane.b32.xlu0 %v3408_v1, %s3294_s18 }
  0x31   : > { %1225 = vrot.lane.b32.xlu1 %v3410_v2, %s3295_s19 }
  0x33   : > { %1223 = vrot.lane.b32.xlu0 %v3416_v3, %s3295_s19 }
  0x35   : > { %1227 = vrot.lane.b32.xlu1 %v3420_v4, %s3295_s19 }
  0x37   : > { %1221 = vrot.lane.b32.xlu0 %v3408_v1, %s3295_s19 }
  0x39   : > { %1402 = vrot.lane.b32.xlu1 %v3410_v2, %s3296_s20 }
  0x3b   : > { %1400 = vrot.lane.b32.xlu0 %v3416_v3, %s3296_s20 }
  0x3d   : > { %1404 = vrot.lane.b32.xlu1 %v3420_v4, %s3296_s20 }
  0x3f   : > { %1398 = vrot.lane.b32.xlu0 %v3408_v1, %s3296_s20 }
  0x41   : > { %1579 = vrot.lane.b32.xlu1 %v3410_v2, %s3297_s21 }
  0x43   : > { %1577 = vrot.lane.b32.xlu0 %v3416_v3, %s3297_s21 }
  0x45   : > { %1581 = vrot.lane.b32.xlu1 %v3420_v4, %s3297_s21 }
  0x47   : > { %1575 = vrot.lane.b32.xlu0 %v3408_v1, %s3297_s21 }
  0x49   : > { %1756 = vrot.lane.b32.xlu1 %v3410_v2, %s3298_s22 }
  0x4b   : > { %1754 = vrot.lane.b32.xlu0 %v3416_v3, %s3298_s22 }
  0x4d   : > { %1758 = vrot.lane.b32.xlu1 %v3420_v4, %s3298_s22 }
  0x4f   : > { %1752 = vrot.lane.b32.xlu0 %v3408_v1, %s3298_s22 }
  0x51   : > { %2013 = vperm.xlu1 %3222, %v3485_v6  }
  0x53   : > { %1924 = vperm.xlu0 %3221, %v1921_v8   ;;  %v3077_v8 = vld [vmem:[%s4050_s2 + $0x10] sm:$0xf] }
  0x55   : > { %3223 = vset.pattern.permute.xlu1 %v3301_v9 }
  0x56   : > { %2040 = vperm.xlu1 %3223, %v3485_v6  }
  0x57   : > { %3224 = vset.pattern.permute.xlu0 %v3302_v10 }
  0x58   : > { %2067 = vperm.xlu0 %3224, %v3485_v6  }
  0x5a   : > { %3225 = vset.pattern.permute.xlu1 %v3303_v11 }
  0x5b   : > { %2095 = vperm.xlu1 %3225, %v3485_v6  }
  0x5c   : > { %3227 = vset.pattern.permute.xlu0 %v3304_v12 }
  0x5d   : > { %2150 = vperm.xlu0 %3227, %v3485_v6  }
  0x5f   : > { %3226 = vset.pattern.permute.xlu1 %v3305_v13 }
  0x60   : > { %2123 = vperm.xlu1 %3226, %v3485_v6  }
  0x61   : > { %3230 = vset.pattern.permute.xlu0 %v3306_v14 }
  0x62   : > { %2232 = vperm.xlu0 %3230, %v3485_v6  }
  0x64   : > { %3228 = vset.pattern.permute.xlu1 %v3307_v15 }
  0x65   : > { %2177 = vperm.xlu1 %3228, %v3485_v6  }
  0x66   : > { %3233 = vset.pattern.permute.xlu0 %v3308_v16  ;;  %v3084_v16 = vld [vmem:[%s4050_s2 + $0x14] sm:$0xf] }
  0x67   : > { %2318 = vperm.xlu0 %3233, %v3485_v6  }
  0x69   : > { %3229 = vset.pattern.permute.xlu1 %v3309_v17 }
  0x6a   : > { %2204 = vperm.xlu1 %3229, %v3485_v6  }
  0x6b   : > { %3236 = vset.pattern.permute.xlu0 %v3310_v18 }
  0x6c   : > { %2404 = vperm.xlu0 %3236, %v3485_v6  }
  0x6e   : > { %3231 = vset.pattern.permute.xlu1 %v3311_v19 }
  0x6f   : > { %2262 = vperm.xlu1 %3231, %v3485_v6  }
  0x70   : > { %3239 = vset.pattern.permute.xlu0 %v3312_v20 }
  0x71   : > { %2491 = vperm.xlu0 %3239, %v3485_v6  }
  0x73   : > { %3232 = vset.pattern.permute.xlu1 %v3313_v21 }
  0x74   : > { %2290 = vperm.xlu1 %3232, %v3485_v6  }
  0x75   : > { %3242 = vset.pattern.permute.xlu0 %v3314_v22  ;;  %v3091_v22 = vld [vmem:[%s4050_s2 + $0x18] sm:$0xf] }
  0x76   : > { %2578 = vperm.xlu0 %3242, %v3485_v6  }
  0x78   : > { %3234 = vset.pattern.permute.xlu1 %v3315_v23 }
  0x79   : > { %2346 = vperm.xlu1 %3234, %v3485_v6  }
  0x7a   : > { %3245 = vset.pattern.permute.xlu0 %v3316_v24 }
  0x7b   : > { %2665 = vperm.xlu0 %3245, %v3485_v6  }
  0x7d   : > { %3235 = vset.pattern.permute.xlu1 %v3317_v25 }
  0x7e   : > { %2375 = vperm.xlu1 %3235, %v3485_v6  }
  0x7f   : > { %3247 = vset.pattern.permute.xlu0 %v3300_v7 }
  0x82   : > { %3237 = vset.pattern.permute.xlu1 %v3318_v26 }
  0x83   : > { %v363_v27 = vpop.permute.xlu1 %362  ;;  %2433 = vperm.xlu1 %3237, %v3485_v6  }
  0x85   : > { %v365_v28 = vpop.permute.xlu0 %364 }
  0x86   : > { %v371_v36 = vsel %vm370_vm1, %v363_v27, %v365_v28 }
  0x87   : > { %v369_v29 = vpop.permute.xlu1 %368  ;;  %3238 = vset.pattern.permute.xlu1 %v3319_v30  ;;  %v3098_v30 = vld [vmem:[%s4050_s2 + $0x1c] sm:$0xf] }
  0x88   : > { %3054 = vmatprep.subr.msk.mxu1 %vm378_vm0, %v369_v29  ;;  %2462 = vperm.xlu1 %3238, %v3485_v6  }
  0x89   : > { %v367_v31 = vpop.permute.xlu0 %366 }
  0x8a   : > { %v372_v33 = vsel %vm370_vm1, %v365_v28, %v367_v31  ;;  %v373_v34 = vsel %vm370_vm1, %v367_v31, %v369_v29 }
  0x8b   : > { %v695_v35 = vpop.permute.xlu1 %694  ;;  %3051 = vmatprep.subr.msk.mxu0 %vm378_vm0, %v372_v33  ;;  %3055 = vmatpush1.msk.msra.mxu1 %vm378_vm0, %v373_v34  ;;  %v3105_v33 = vld [vmem:[%s4050_s2 + $0x20] sm:$0xf] }
  0x8c   : > { %3052 = vmatpush1.msk.msra.mxu0 %vm378_vm0, %v371_v36  ;;  %3056 = vmatmul.mubr.msk.f32.vlgmr.msra.gmra.mrb[0].mxu1 %vm374_vm2, %v3050_v32  ;;  %v2693_v34 = vld [vmem:[%s4053_s5] sm:$0xf] }
  0x8d   : > { %3060 = vmatprep.subr.msk.mxu1 %vm378_vm0, %v3420_v4  ;;  %3053 = vmatmul.mubr.msk.f32.vlgmr.msra.gmra.mrb[0].mxu0 %vm374_vm2, %v3050_v32  ;;  %v693_v37 = vpop.permute.xlu0 %692  ;;  %v3323_v4 = vmov 23  }
  0x8e   : > { %3061 = vmatpush1.msk.msra.mxu1 %vm378_vm0, %v3410_v2  ;;  %3057 = vmatprep.subr.msk.mxu0 %vm378_vm0, %v3416_v3  ;;  %v700_v38 = vsel %vm698_vm3, %v693_v37, %v695_v35 }
  0x8f   : > { %v697_v39 = vpop.permute.xlu1 %696  ;;  %3058 = vmatpush1.msk.msra.mxu0 %vm378_vm0, %v3408_v1  ;;  %675 = vmatprep.mubr.f32.mxu1 %v3290_v0 }
  0x90   : > { %3064 = vmatprep.subr.msk.mxu0 %vm378_vm0, %v700_v38  ;;  %3067 = vmatprep.subr.msk.mxu1 %vm378_vm0, %v697_v39  ;;  %v701_v43 = vsel %vm698_vm3, %v695_v35, %v697_v39  ;;  %v2802_v39 = vld [vmem:[%s4055_s7] sm:$0xff] }
  0x91   : > { %v691_v40 = vpop.permute.xlu0 %690  ;;  %604 = vmatprep.mubr.f32.mxu0 %v3290_v0  ;;  %3240 = vset.pattern.permute.xlu1 %v3320_v42 }
  0x92   : > { %2520 = vperm.xlu1 %3240, %v3485_v6   ;;  %v699_v45 = vsel %vm698_vm3, %v691_v40, %v693_v37  ;;  %v2803_v40 = vld [vmem:[%s347_s28] sm:$0xff] }
  0x93   : > { %v872_v44 = vpop.permute.xlu1 %871 }
  0x94   : > { %3062 = vmatmul.mubr.msk.f32.vlgmr.msra.gmra.mrb[0].mxu1 %vm374_vm2, %v355_v41 }
  0x95   : > { %3068 = vmatpush1.msk.msra.mxu1 %vm378_vm0, %v701_v43  ;;  %3059 = vmatmul.mubr.msk.f32.vlgmr.msra.gmra.mrb[0].mxu0 %vm374_vm2, %v355_v41  ;;  %v870_v46 = vpop.permute.xlu0 %869  ;;  %v2804_v41 = vld [vmem:[%s347_s28 + $0x8] sm:$0xf]  ;;  %v2813_v43 = vcombine.high %v2803_v40, %v2803_v40  ;;  %s3339_s28 = smov 39  }
  0x96   : > { %3065 = vmatpush1.msk.msra.mxu0 %vm378_vm0, %v699_v45  ;;  %v877_v47 = vsel %vm875_vm4, %v870_v46, %v872_v44  ;;  %848 = vmatprep.mubr.f32.mxu1 %v3290_v0 }
  0x97   : > { %v874_v48 = vpop.permute.xlu1 %873  ;;  %3071 = vmatprep.subr.msk.mxu0 %vm378_vm0, %v877_v47  ;;  %777 = vmatprep.mubr.f32.mxu0 %v3290_v0 }
  0x98   : > { %3074 = vmatprep.subr.msk.mxu1 %vm378_vm0, %v874_v48  ;;  %3241 = vset.pattern.permute.xlu1 %v3321_v49  ;;  %v878_v52 = vsel %vm875_vm4, %v872_v44, %v874_v48 }
  0x99   : > { %v868_v50 = vpop.permute.xlu0 %867  ;;  %2549 = vperm.xlu1 %3241, %v3485_v6  }
  0x9a   : > { %v876_v54 = vsel %vm875_vm4, %v868_v50, %v870_v46 }
  0x9b   : > { %v1049_v53 = vpop.permute.xlu1 %1048 }
  0x9c   : > { %3069 = vmatmul.mubr.msk.f32.vlgmr.msra.gmra.mrb[0].mxu1 %vm374_vm2, %v3063_v51 }
  0x9d   : > { %3075 = vmatpush1.msk.msra.mxu1 %vm378_vm0, %v878_v52  ;;  %3066 = vmatmul.mubr.msk.f32.vlgmr.msra.gmra.mrb[0].mxu0 %vm374_vm2, %v3063_v51  ;;  %v1047_v55 = vpop.permute.xlu0 %1046 }
  0x9e   : > { %3072 = vmatpush1.msk.msra.mxu0 %vm378_vm0, %v876_v54  ;;  %v1054_v56 = vsel %vm1052_vm5, %v1047_v55, %v1049_v53  ;;  %1025 = vmatprep.mubr.f32.mxu1 %v3290_v0 }
  0x9f   : > { %v1051_v57 = vpop.permute.xlu1 %1050  ;;  %3078 = vmatprep.subr.msk.mxu0 %vm378_vm0, %v1054_v56  ;;  %954 = vmatprep.mubr.f32.mxu0 %v3290_v0 }
  0xa0   : > { %3081 = vmatprep.subr.msk.mxu1 %vm378_vm0, %v1051_v57  ;;  %3243 = vset.pattern.permute.xlu1 %v3322_v58  ;;  %v1055_v61 = vsel %vm1052_vm5, %v1049_v53, %v1051_v57 }
  0xa1   : > { %v1045_v59 = vpop.permute.xlu0 %1044  ;;  %2607 = vperm.xlu1 %3243, %v3485_v6  }
  0xa2   : > { %v1053_v63 = vsel %vm1052_vm5, %v1045_v59, %v1047_v55 }
  0xa3   : > { %v1226_v62 = vpop.permute.xlu1 %1225 }
  0xa4   : > { %3076 = vmatmul.mubr.msk.f32.vlgmr.msra.gmra.mrb[0].mxu1 %vm374_vm2, %v3070_v60 }
  0xa5   : > { %3082 = vmatpush1.msk.msra.mxu1 %vm378_vm0, %v1055_v61  ;;  %3073 = vmatmul.mubr.msk.f32.vlgmr.msra.gmra.mrb[0].mxu0 %vm374_vm2, %v3070_v60  ;;  %v1224_v1 = vpop.permute.xlu0 %1223 }
  0xa6   : > { %3079 = vmatpush1.msk.msra.mxu0 %vm378_vm0, %v1053_v63  ;;  %v1231_v2 = vsel %vm1229_vm6, %v1224_v1, %v1226_v62  ;;  %1202 = vmatprep.mubr.f32.mxu1 %v3290_v0 }
  0xa7   : > { %v1228_v3 = vpop.permute.xlu1 %1227  ;;  %3085 = vmatprep.subr.msk.mxu0 %vm378_vm0, %v1231_v2  ;;  %1131 = vmatprep.mubr.f32.mxu0 %v3290_v0 }
  0xa8   : > { %3088 = vmatprep.subr.msk.mxu1 %vm378_vm0, %v1228_v3  ;;  %3244 = vset.pattern.permute.xlu1 %v3323_v4  ;;  %v1232_v9 = vsel %vm1229_vm6, %v1226_v62, %v1228_v3 }
  0xa9   : > { %v1222_v5 = vpop.permute.xlu0 %1221  ;;  %2636 = vperm.xlu1 %3244, %v3485_v6  }
  0xaa   : > { %v1230_v11 = vsel %vm1229_vm6, %v1222_v5, %v1224_v1 }
  0xab   : > { %v1403_v10 = vpop.permute.xlu1 %1402 }
  0xac   : > { %3083 = vmatmul.mubr.msk.f32.vlgmr.msra.gmra.mrb[0].mxu1 %vm374_vm2, %v3077_v8 }
  0xad   : > { %3089 = vmatpush1.msk.msra.mxu1 %vm378_vm0, %v1232_v9  ;;  %3080 = vmatmul.mubr.msk.f32.vlgmr.msra.gmra.mrb[0].mxu0 %vm374_vm2, %v3077_v8  ;;  %v1401_v12 = vpop.permute.xlu0 %1400 }
  0xae   : > { %3086 = vmatpush1.msk.msra.mxu0 %vm378_vm0, %v1230_v11  ;;  %v1408_v13 = vsel %vm1406_vm7, %v1401_v12, %v1403_v10  ;;  %1379 = vmatprep.mubr.f32.mxu1 %v3290_v0 }
  0xaf   : > { %v1405_v14 = vpop.permute.xlu1 %1404  ;;  %3092 = vmatprep.subr.msk.mxu0 %vm378_vm0, %v1408_v13  ;;  %1308 = vmatprep.mubr.f32.mxu0 %v3290_v0 }
  0xb0   : > { %3095 = vmatprep.subr.msk.mxu1 %vm378_vm0, %v1405_v14  ;;  %3246 = vset.pattern.permute.xlu1 %v3300_v7  ;;  %v1409_v17 = vsel %vm1406_vm7, %v1403_v10, %v1405_v14  ;;  %v1957_v10 = vlaneseq }
  0xb1   : > { %v1399_v15 = vpop.permute.xlu0 %1398  ;;  %1998 = vperm.xlu1 %3246, %v3485_v6  }
  0xb2   : > { %v1407_v19 = vsel %vm1406_vm7, %v1399_v15, %v1401_v12 }
  0xb3   : > { %v1580_v18 = vpop.permute.xlu1 %1579 }
  0xb4   : > { %3090 = vmatmul.mubr.msk.f32.vlgmr.msra.gmra.mrb[0].mxu1 %vm374_vm2, %v3084_v16 }
  0xb5   : > { %3096 = vmatpush1.msk.msra.mxu1 %vm378_vm0, %v1409_v17  ;;  %3087 = vmatmul.mubr.msk.f32.vlgmr.msra.gmra.mrb[0].mxu0 %vm374_vm2, %v3084_v16  ;;  %v1578_v7 = vpop.permute.xlu0 %1577  ;;  %v1958_v16 = vshrl.u32 %v1957_v10, 7 }
  0xb6   : > { %3093 = vmatpush1.msk.msra.mxu0 %vm378_vm0, %v1407_v19  ;;  %v1585_v20 = vsel %vm1583_vm8, %v1578_v7, %v1580_v18  ;;  %1556 = vmatprep.mubr.f32.mxu1 %v3290_v0 }
  0xb7   : > { %v1582_v6 = vpop.permute.xlu1 %1581  ;;  %3099 = vmatprep.subr.msk.mxu0 %vm378_vm0, %v1585_v20  ;;  %1485 = vmatprep.mubr.f32.mxu0 %v3290_v0  ;;  %v1967_v17 = vsub.s32 2, %v1958_v16  ;;  %v1959_v19 = vsub.s32 0, %v1958_v16  ;;  %v3325_v20 = vmov 839922192  }
  0xb8   : > { %3102 = vmatprep.subr.msk.mxu1 %vm378_vm0, %v1582_v6  ;;  %v1586_v23 = vsel %vm1583_vm8, %v1580_v18, %v1582_v6  ;;  %2696 = vperm.xlu1 %3246, %v2693_v34   ;;  %v1955_v18 = vld [vmem:[%s4054_s6] sm:$0xf]  ;;  %v2001_v6 = vunpack.c.l.s4 %v3325_v20 }
  0xb9   : > { %v1576_v21 = vpop.permute.xlu0 %1575 }
  0xba   : > { %v1584_v25 = vsel %vm1583_vm8, %v1576_v21, %v1578_v7  ;;  %v1971_v21 = vsub.s32 3, %v1958_v16 }
  0xbb   : > { %v1757_v24 = vpop.permute.xlu1 %1756 }
  0xbc   : > { %3097 = vmatmul.mubr.msk.f32.vlgmr.msra.gmra.mrb[0].mxu1 %vm374_vm2, %v3091_v22 }
  0xbd   : > { %3103 = vmatpush1.msk.msra.mxu1 %vm378_vm0, %v1586_v23  ;;  %3094 = vmatmul.mubr.msk.f32.vlgmr.msra.gmra.mrb[0].mxu0 %vm374_vm2, %v3091_v22  ;;  %v1755_v26 = vpop.permute.xlu0 %1754  ;;  %v1963_v22 = vsub.s32 1, %v1958_v16  ;;  %v1968_v23 = vrot.slane %v1955_v18, %v1967_v17 }
  0xbe   : > { %3100 = vmatpush1.msk.msra.mxu0 %vm378_vm0, %v1584_v25  ;;  %v1762_v27 = vsel %vm1760_vm9, %v1755_v26, %v1757_v24  ;;  %1733 = vmatprep.mubr.f32.mxu1 %v3290_v0  ;;  %v1960_v25 = vrot.slane %v1955_v18, %v1959_v19 }
  0xbf   : > { %v1759_v28 = vpop.permute.xlu1 %1758  ;;  %3106 = vmatprep.subr.msk.mxu0 %vm378_vm0, %v1762_v27  ;;  %1662 = vmatprep.mubr.f32.mxu0 %v3290_v0  ;;  %v2002_v27 = vunpack.c.0.s8 %v2001_v6 }
  0xc0   : > { %3109 = vmatprep.subr.msk.mxu1 %vm378_vm0, %v1759_v28  ;;  %v1763_v31 = vsel %vm1760_vm9, %v1757_v24, %v1759_v28 }
  0xc1   : > { %v1753_v29 = vpop.permute.xlu0 %1752 }
  0xc2   : > { %v1761_v32 = vsel %vm1760_vm9, %v1753_v29, %v1755_v26  ;;  %v1972_v29 = vrot.slane %v1955_v18, %v1971_v21 }
  0xc4   : > { %3104 = vmatmul.mubr.msk.f32.vlgmr.msra.gmra.mrb[0].mxu1 %vm374_vm2, %v3098_v30 }
  0xc5   : > { %3110 = vmatpush1.msk.msra.mxu1 %vm378_vm0, %v1763_v31  ;;  %3101 = vmatmul.mubr.msk.f32.vlgmr.msra.gmra.mrb[0].mxu0 %vm374_vm2, %v3098_v30 }
  0xc6   : > { %3107 = vmatpush1.msk.msra.mxu0 %vm378_vm0, %v1761_v32  ;;  %1910 = vmatprep.mubr.f32.mxu1 %v3290_v0  ;;  %v1964_v32 = vrot.slane %v1955_v18, %v1963_v22 }
  0xc7   : > { %1839 = vmatprep.mubr.f32.mxu0 %v3290_v0  ;;  %3122 = vmatprep.subr.mxu1 %v3290_v0 }
  0xc8   : > { %3112 = vmatprep.subr.msk.mxu0 %vm378_vm0, %v2813_v43 }
  0xcc   : > { %3111 = vmatmul.mubr.msk.f32.vlgmr.msra.gmra.mrb[0].mxu1 %vm374_vm2, %v3105_v33 }
  0xcd   : > { %3108 = vmatmul.mubr.msk.f32.vlgmr.msra.gmra.mrb[0].mxu0 %vm374_vm2, %v3105_v33  ;;  %3124 = vmatprep.mubr.msk.f32.mxu1 %vm3324_vm10, %v3290_v0  ;;  %vm2570_vm10 = vcmask 326656  }
  0xce   : > { %2887 = vmatprep.mubr.f32.mxu0 %v3290_v0  ;;  %3123 = vmatpush3.msk.msra.mxu1 %vm378_vm0, %v2804_v41 }
  0xcf   : > { %3113 = vmatpush1.msk.msra.mxu0 %vm378_vm0, %v2803_v40 }
  0xd0   : > { %v3650_v35 = vpop.permute.xlu1 %2013  ;;  %3125 = vmatmul.mubr.msk.f32.vlgmr.msra.gmra.mrb[2].mxu1 %vm374_vm2, %v2802_v39 }
  0xd1   : > { %3114 = vmatmul.mubr.msk.f32.vlgmr.msra.gmra.mrb[2].mxu0 %vm374_vm2, %v2802_v39  ;;  %vm2367_vm2 = vcmask 662528  }
  0xd2   : > { %v1925_v47 = vpop.permute.xlu0 %1924 }
  0xd5   : > { %v3652_v36 = vpop.permute.xlu1 %2040 }
  0xd7   : > { %v2068_v22 = vpop.permute.xlu0 %2067 }
  0xda   : > { %v3654_v37 = vpop.permute.xlu1 %2095 }
  0xdf   : > { %v3656_v38 = vpop.permute.xlu1 %2123 }
  0xe4   : > { %v3666_v42 = vpop.permute.xlu1 %2177 }
  0xe9   : > { %v3673_v0 = vpop.permute.xlu1 %2204 }
  0xee   : > { %v3675_v44 = vpop.permute.xlu1 %2262 }
  0xf3   : > { %v3677_v45 = vpop.permute.xlu1 %2290 }
  0xf8   : > { %v3679_v46 = vpop.permute.xlu1 %2346 }
  0xfd   : > { %v3681_v55 = vpop.permute.xlu1 %2375 }
 0x102   : > { %v2434_v2 = vpop.permute.xlu1 %2433 }
 0x107   : > { %v2463_v3 = vpop.permute.xlu1 %2462 }
 0x111   : > { %v2521_v14 = vpop.permute.xlu1 %2520 }
 0x118   : > { %v2550_v7 = vpop.permute.xlu1 %2549 }
 0x120   : > { %v2608_v33 = vpop.permute.xlu1 %2607 }
 0x19f   : > { %v1912_v48 = vpop.f32.mrb[0].mxu1 }
 0x1a0   : > { %v1929_v49 = vadd.f32 %v1925_v47, %v1912_v48  ;;  %v1841_v50 = vpop.f32.mrb[0].mxu0  ;;  %v1914_v51 = vpop.f32.mrb[1].mxu1 }
 0x1a1   : > { %v1927_v52 = vadd.f32 %v1925_v47, %v1841_v50  ;;  %v1930_v53 = vadd.f32 %v1925_v47, %v1914_v51  ;;  %v1843_v54 = vpop.f32.mrb[1].mxu0 }
 0x1a2   : > { %v1933_v56 = vsub.f32 0.0, %v1929_v49  ;;  %v1928_v57 = vadd.f32 %v1925_v47, %v1843_v54  ;;  %v3686_v47 = vsub.s32 %v2002_v27, %v1958_v16 }
 0x1a3   : > { %v1931_v58 = vsub.f32 0.0, %v1927_v52  ;;  %v1934_v59 = vsub.f32 0.0, %v1930_v53 }
 0x1a4   : > { %v1939_v60 = vmul.f32 1.442695, %v1933_v56  ;;  %v1932_v61 = vsub.f32 0.0, %v1928_v57  ;;  %v3701_v54 = vrot.slane %v3681_v55, %v3686_v47  ;;  %v3704_v56 = vrot.slane %v2434_v2, %v3686_v47 }
 0x1a5   : > { %v1935_v62 = vmul.f32 1.442695, %v1931_v58  ;;  %v1941_v63 = vmul.f32 1.442695, %v1934_v59  ;;  %v2470_v58 = vrot.slane %v2463_v3, %v3686_v47  ;;  %v2615_v59 = vrot.slane %v2608_v33, %v3686_v47 }
 0x1a6   : > { %3258 = vpow2.f32 %v1939_v60  ;;  %v1937_v1 = vmul.f32 1.442695, %v1932_v61  ;;  %v2103_v2 = vrot.slane %v3654_v37, %v3686_v47  ;;  %v2131_v3 = vrot.slane %v3656_v38, %v3686_v47 }
 0x1a7   : > { %3260 = vpow2.f32 %v1935_v62  ;;  %v2557_v62 = vrot.slane %v2550_v7, %v3686_v47  ;;  %v2270_v38 = vrot.slane %v3675_v44, %v3686_v47  ;;  %v2021_v44 = vrot.slane %v3650_v35, %v3686_v47 }
 0x1a8   : > { %3262 = vpow2.f32 %v1941_v63  ;;  %v2048_v6 = vrot.slane %v3652_v36, %v3686_v47 }
 0x1a9   : > { %3264 = vpow2.f32 %v1937_v1 }
 0x1b0   : > { %v3259_v4 = vpop.eup %3258 }
 0x1b1   : > { %v3261_v5 = vpop.eup %3260  ;;  %v1945_v8 = vadd.f32 1.0, %v3259_v4 }
 0x1b2   : > { %v3263_v9 = vpop.eup %3262  ;;  %v1943_v11 = vadd.f32 1.0, %v3261_v5 }
 0x1b3   : > { %v3265_v12 = vpop.eup %3264  ;;  %3266 = vrcp.f32 %v1945_v8  ;;  %v1946_v13 = vadd.f32 1.0, %v3263_v9  ;;  %v2185_v8 = vrot.slane %v3666_v42, %v3686_v47  ;;  %v2212_v9 = vrot.slane %v3673_v0, %v3686_v47 }
 0x1b4   : > { %3268 = vrcp.f32 %v1943_v11  ;;  %v1944_v15 = vadd.f32 1.0, %v3265_v12 }
 0x1b5   : > { %3270 = vrcp.f32 %v1946_v13 }
 0x1b6   : > { %3272 = vrcp.f32 %v1944_v15 }
 0x1bd   : > { %v3267_v24 = vpop.eup %3266 }
 0x1be   : > { %v3269_v26 = vpop.eup %3268  ;;  %v1953_v28 = vmul.f32 %v3267_v24, %v1929_v49  ;;  %v3691_v49 = vrot.slane %v3677_v45, %v3686_v47  ;;  %v2528_v45 = vrot.slane %v2521_v14, %v3686_v47 }
 0x1bf   : > { %v3271_v30 = vpop.eup %3270  ;;  %v1951_v31 = vmul.f32 %v3269_v26, %v1927_v52 }
 0x1c0   : > { %v3273_v34 = vpop.eup %3272  ;;  %v1954_v39 = vmul.f32 %v3271_v30, %v1930_v53  ;;  %v1979_v40 = vmul.f32 %v1968_v23, %v1953_v28  ;;  %v3697_v53 = vrot.slane %v3679_v46, %v3686_v47  ;;  %v2075_v23 = vrot.slane %v2068_v22, %v3686_v47  ;;  %v2151_v28 = vpop.permute.xlu0 %2150 }
 0x1c1   : > { %v1977_v41 = vmul.f32 %v1960_v25, %v1951_v31  ;;  %v1952_v43 = vmul.f32 %v3273_v34, %v1928_v57  ;;  %v2637_v57 = vpop.permute.xlu1 %2636 }
 0x1c2   : > { %v1980_v48 = vmul.f32 %v1972_v29, %v1954_v39  ;;  %v2644_v60 = vrot.slane %v2637_v57, %v3686_v47  ;;  %v2158_v29 = vrot.slane %v2151_v28, %v3686_v47 }
 0x1c3   : > { %v1978_v50 = vmul.f32 %v1964_v32, %v1952_v43 }
 0x1c4   : > { %v1986_v51 = vcombine.low %v1979_v40, %v1980_v48  ;;  %v2233_v34 = vpop.permute.xlu0 %2232 }
 0x1c5   : > { %v3693_v52 = vcombine.low %v1977_v41, %v1978_v50  ;;  %v2240_v39 = vrot.slane %v2233_v34, %v3686_v47 }
 0x1c6   : > { %1992 = vst.msk [vmem:[#allocation2 + $0x8] sm:$0xff] %vm1991_vm12, %v1986_v51  ;;  %vm2628_vm12 = vcmask 310272  }
 0x1c7   : > { %1989 = vst [vmem:[#allocation2] sm:$0xff] %v3693_v52  ;;  %v3713_v46 = vmul.f32 %v3691_v49, %v3693_v52  ;;  %v3717_v55 = vmul.f32 %v3697_v53, %v3693_v52  ;;  %v3721_v61 = vmul.f32 %v3701_v54, %v3693_v52  ;;  %v3726_v63 = vmul.f32 %v3704_v56, %v3693_v52 }
 0x1c8   : > { %v3729_v1 = vmul.f32 %v2470_v58, %v3693_v52  ;;  %v3736_v4 = vmul.f32 %v2528_v45, %v3693_v52  ;;  %v3739_v5 = vmul.f32 %v2557_v62, %v3693_v52  ;;  %v3746_v10 = vmul.f32 %v2615_v59, %v3693_v52  ;;  %v2319_v50 = vpop.permute.xlu0 %2318 }
 0x1c9   : > { %v3749_v37 = vmul.f32 %v2644_v60, %v3693_v52  ;;  %v2105_v11 = vmul.f32 %v2103_v2, %v3693_v52  ;;  %v2133_v12 = vmul.f32 %v2131_v3, %v3693_v52  ;;  %v2187_v13 = vmul.f32 %v2185_v8, %v3693_v52 }
 0x1ca   : > { %v2214_v42 = vmul.f32 %v2212_v9, %v3693_v52  ;;  %v2272_v0 = vmul.f32 %v2270_v38, %v3693_v52  ;;  %v2023_v35 = vmul.f32 %v2021_v44, %v3693_v52  ;;  %v2050_v24 = vmul.f32 %v2048_v6, %v3693_v52 }
 0x1cb   : > { %v2077_v36 = vmul.f32 %v2075_v23, %v3693_v52  ;;  %v2160_v31 = vmul.f32 %v2158_v29, %v3693_v52  ;;  %v2242_v41 = vmul.f32 %v2240_v39, %v3693_v52  ;;  %v2326_v51 = vrot.slane %v2319_v50, %v3686_v47 }
 0x1cd   : > { %v3757_v14 = vld [vmem:[#allocation2 + $0x8] sm:$0xff] }
 0x1ce   : > { %v3760_v15 = vld [vmem:[#allocation2 + $0x8] sm:$0xf]  ;;  %v3763_v16 = vmul.f32 %v2470_v58, %v3757_v14  ;;  %v3768_v17 = vmul.f32 %v2528_v45, %v3757_v14  ;;  %v3771_v18 = vmul.f32 %v2557_v62, %v3757_v14  ;;  %v3774_v19 = vmul.f32 %v2615_v59, %v3757_v14  ;;  %v2405_v59 = vpop.permute.xlu0 %2404 }
 0x1cf   : > { %v2647_v7 = vmul.f32 %v2644_v60, %v3757_v14  ;;  %v2024_v20 = vmul.f32 %v2021_v44, %v3760_v15  ;;  %v2051_v21 = vmul.f32 %v2048_v6, %v3760_v15  ;;  %v2078_v25 = vmul.f32 %v2075_v23, %v3760_v15  ;;  %v1999_v44 = vpop.permute.xlu1 %1998 }
 0x1d0   : > { %v2106_v26 = vmul.f32 %v2103_v2, %v3760_v15  ;;  %v2134_v27 = vmul.f32 %v2131_v3, %v3760_v15  ;;  %v2161_v30 = vmul.f32 %v2158_v29, %v3760_v15  ;;  %v2188_v32 = vmul.f32 %v2185_v8, %v3760_v15 }
 0x1d1   : > { %2652 = vrot.lane.b32.xlu1 %v2647_v7, %s3326_s14  ;;  %2029 = vrot.lane.b32.xlu0 %v2024_v20, %s3291_s15  ;;  %v2215_v33 = vmul.f32 %v2212_v9, %v3760_v15  ;;  %v2243_v40 = vmul.f32 %v2240_v39, %v3760_v15  ;;  %v2273_v43 = vmul.f32 %v2270_v38, %v3757_v14  ;;  %v2724_v38 = vld [vmem:[#allocation2 + $0x8] sm:$0x33]  ;;  %v2805_v7 = vld [vmem:[%s4056_s8] sm:$0xff] }
 0x1d2   : > { %v2301_v48 = vmul.f32 %v3691_v49, %v3757_v14  ;;  %v2329_v57 = vmul.f32 %v2326_v51, %v3757_v14  ;;  %v2328_v58 = vmul.f32 %v2326_v51, %v3693_v52  ;;  %v2357_v45 = vmul.f32 %v3697_v53, %v3757_v14 }
 0x1d3   : > { %v2386_v49 = vmul.f32 %v3701_v54, %v3757_v14  ;;  %v2412_v60 = vrot.slane %v2405_v59, %v3686_v47  ;;  %v2444_v62 = vmul.f32 %v3704_v56, %v3757_v14  ;;  %v2492_v54 = vpop.permute.xlu0 %2491 }
 0x1d5   : > { %2027 = vrot.lane.b32.xlu1 %v2023_v35, %s3291_s15  ;;  %2056 = vrot.lane.b32.xlu0 %v2051_v21, %s3292_s16  ;;  %s3329_s15 = smov 103   ;;  %v2414_v53 = vmul.f32 %v2412_v60, %v3693_v52 }
 0x1d7   : > { %v2579_v56 = vpop.permute.xlu0 %2578 }
 0x1d9   : > { %2054 = vrot.lane.b32.xlu1 %v2050_v24, %s3292_s16  ;;  %2083 = vrot.lane.b32.xlu0 %v2078_v25, %s3327_s23  ;;  %s3330_s16 = smov 102  }
 0x1db   : > { %v2666_v8 = vpop.permute.xlu0 %2665 }
 0x1dd   : > { %2081 = vrot.lane.b32.xlu1 %v2077_v36, %s3327_s23  ;;  %2111 = vrot.lane.b32.xlu0 %v2106_v26, %s3328_s24 }
 0x1e1   : > { %2109 = vrot.lane.b32.xlu1 %v2105_v11, %s3328_s24  ;;  %2139 = vrot.lane.b32.xlu0 %v2134_v27, %s3293_s17  ;;  %v2728_v11 = vcombine.high %v2724_v38, %v2724_v38  ;;  %v3866_v27 = vpop.f32.mrb[2].mxu1 }
 0x1e2   : > { %v3126_v28 = vpop.f32.mrb[3].mxu1 }
 0x1e5   : > { %2137 = vrot.lane.b32.xlu1 %v2133_v12, %s3293_s17  ;;  %2166 = vrot.lane.b32.xlu0 %v2161_v30, %s3294_s18  ;;  %s3331_s17 = smov 81   ;;  %v2723_v12 = vld [vmem:[#allocation2] sm:$0x33] }
 0x1e9   : > { %2164 = vrot.lane.b32.xlu1 %v2160_v31, %s3294_s18  ;;  %2193 = vrot.lane.b32.xlu0 %v2188_v32, %s3295_s19  ;;  %s3332_s18 = smov 80   ;;  %v3868_v31 = vpop.f32.mrb[2].mxu0 }
 0x1ea   : > { %v3870_v32 = vpop.f32.mrb[3].mxu0 }
 0x1ed   : > { %2191 = vrot.lane.b32.xlu1 %v2187_v13, %s3295_s19  ;;  %2220 = vrot.lane.b32.xlu0 %v2215_v33, %s3329_s15  ;;  %s3333_s19 = smov 62   ;;  %v2762_v13 = vld [vmem:[#allocation2] sm:$0xcc] }
 0x1f1   : > { %2218 = vrot.lane.b32.xlu1 %v2214_v42, %s3329_s15  ;;  %2248 = vrot.lane.b32.xlu0 %v2243_v40, %s3330_s16  ;;  %v2727_v42 = vcombine.high %v2723_v12, %v2723_v12 }
 0x1f5   : > { %2246 = vrot.lane.b32.xlu1 %v2242_v41, %s3330_s16  ;;  %2278 = vrot.lane.b32.xlu0 %v2273_v43, %s3296_s20 }
 0x1f9   : > { %2276 = vrot.lane.b32.xlu1 %v2272_v0, %s3296_s20  ;;  %2306 = vrot.lane.b32.xlu0 %v2301_v48, %s3297_s21  ;;  %s3334_s20 = smov 61   ;;  %v2763_v0 = vld [vmem:[#allocation2 + $0x8] sm:$0xcc] }
 0x1fd   : > { %2304 = vrot.lane.b32.xlu1 %v3713_v46, %s3297_s21  ;;  %2334 = vrot.lane.b32.xlu0 %v2329_v57, %s3298_s22  ;;  %v2415_v46 = vmul.f32 %v2412_v60, %v3757_v14  ;;  %s3335_s21 = smov 60  }
 0x201   : > { %2332 = vrot.lane.b32.xlu1 %v2328_v58, %s3298_s22  ;;  %2362 = vrot.lane.b32.xlu0 %v2357_v45, %s3331_s17  ;;  %v2006_v45 = vrot.slane %v1999_v44, %v3686_v47 }
 0x203   : > { %v2009_v60 = vmul.f32 %v2006_v45, %v3760_v15 }
 0x205   : > { %2360 = vrot.lane.b32.xlu1 %v3717_v55, %s3331_s17  ;;  %2391 = vrot.lane.b32.xlu0 %v2386_v49, %s3332_s18  ;;  %v2499_v55 = vrot.slane %v2492_v54, %v3686_v47 }
 0x207   : > { %v2501_v2 = vmul.f32 %v2499_v55, %v3693_v52 }
 0x209   : > { %2389 = vrot.lane.b32.xlu1 %v3721_v61, %s3332_s18  ;;  %2420 = vrot.lane.b32.xlu0 %v2415_v46, %s3333_s19  ;;  %v2502_v61 = vmul.f32 %v2499_v55, %v3757_v14 }
 0x20d   : > { %2418 = vrot.lane.b32.xlu1 %v2414_v53, %s3333_s19  ;;  %2449 = vrot.lane.b32.xlu0 %v2444_v62, %s3334_s20 }
 0x211   : > { %2447 = vrot.lane.b32.xlu1 %v3726_v63, %s3334_s20  ;;  %2478 = vrot.lane.b32.xlu0 %v3763_v16, %s3335_s21  ;;  %v2586_v63 = vrot.slane %v2579_v56, %v3686_v47  ;;  %v2770_v16 = vrot.slane %v2763_v0, 6 }
 0x213   : > { %v2589_v3 = vmul.f32 %v2586_v63, %v3757_v14 }
 0x215   : > { %2476 = vrot.lane.b32.xlu1 %v3729_v1, %s3335_s21  ;;  %2507 = vrot.lane.b32.xlu0 %v2502_v61, %s3336_s25  ;;  %v2588_v1 = vmul.f32 %v2586_v63, %v3693_v52 }
 0x219   : > { %2505 = vrot.lane.b32.xlu1 %v2501_v2, %s3336_s25  ;;  %2536 = vrot.lane.b32.xlu0 %v3768_v17, %s3337_s26 }
 0x21d   : > { %2534 = vrot.lane.b32.xlu1 %v3736_v4, %s3337_s26  ;;  %2565 = vrot.lane.b32.xlu0 %v3771_v18, %s3338_s27  ;;  %v2673_v4 = vrot.slane %v2666_v8, %v3686_v47  ;;  %v2768_v18 = vrot.slane %v2762_v13, 6 }
 0x21f   : > { %v2676_v9 = vmul.f32 %v2673_v4, %v3757_v14  ;;  %v2767_v14 = vcombine.high %v2763_v0, %v2763_v0 }
 0x221   : > { %2563 = vrot.lane.b32.xlu1 %v3739_v5, %s3338_s27  ;;  %2594 = vrot.lane.b32.xlu0 %v2589_v3, %s3339_s28  ;;  %v2675_v5 = vmul.f32 %v2673_v4, %v3693_v52  ;;  %v2771_v17 = vrot.slane %v2767_v14, 6  ;;  %v2008_v3 = vmul.f32 %v2006_v45, %v3693_v52 }
 0x225   : > { %2592 = vrot.lane.b32.xlu1 %v2588_v1, %s3339_s28  ;;  %2623 = vrot.lane.b32.xlu0 %v3774_v19, %s3340_s29  ;;  %v3859_v19 = vpop.permute.xlu1 %2696 }
 0x229   : > { %2621 = vrot.lane.b32.xlu1 %v3746_v10, %s3340_s29  ;;  %2650 = vrot.lane.b32.xlu0 %v3749_v37, %s3326_s14  ;;  %v2766_v10 = vcombine.high %v2762_v13, %v2762_v13 }
 0x22b   : > { %v2769_v37 = vrot.slane %v2766_v10, 6 }
 0x22d   : > { %2681 = vrot.lane.b32.xlu1 %v2676_v9, %s3341_s11  ;;  %2679 = vrot.lane.b32.xlu0 %v2675_v5, %s3341_s11 }
 0x231   : > { %2735 = vrot.lane.b32.xlu1 %v2728_v11, %s3298_s22  ;;  %2729 = vrot.lane.b32.xlu0 %v2723_v12, %s3298_s22 }
 0x235   : > { %2731 = vrot.lane.b32.xlu1 %v2727_v42, %s3298_s22  ;;  %2733 = vrot.lane.b32.xlu0 %v2724_v38, %s3298_s22 }
 0x239   : > { %2774 = vrot.lane.b32.xlu1 %v2769_v37, %s3298_s22  ;;  %2776 = vrot.lane.b32.xlu0 %v2770_v16, %s3298_s22 }
 0x23d   : > { %2778 = vrot.lane.b32.xlu1 %v2771_v17, %s3298_s22  ;;  %2772 = vrot.lane.b32.xlu0 %v2768_v18, %s3298_s22  ;;  %s3160_s22 = smul.u32 24, %s4059_s10 }
 0x23f   : > { %s4016_s24 = scalar_lea.vmem %s4057_s9, %s3160_s22 }
 0x241   : > { %2808 = vperm.xlu0 %3247, %v2805_v7  }
 0x243   : > { %v3864_v20 = vpop.permute.xlu1 %2652  ;;  %v2030_v6 = vpop.permute.xlu0 %2029 }
 0x244   : > { %v2032_v49 = vrot.slane %v2030_v6, 4  ;;  %v2038_v61 = vadd.f32 %v2030_v6, %v2009_v60 }
 0x247   : > { %v2028_v35 = vpop.permute.xlu1 %2027  ;;  %v2057_v21 = vpop.permute.xlu0 %2056 }
 0x248   : > { %v2031_v51 = vrot.slane %v2028_v35, 4  ;;  %v2059_v53 = vrot.slane %v2057_v21, 4  ;;  %v2065_v8 = vadd.f32 %v2057_v21, %v2038_v61 }
 0x24a   : > { %v2033_v46 = vsel %vm378_vm0, %v2031_v51, %v2032_v49 }
 0x24b   : > { %v2055_v22 = vpop.permute.xlu1 %2054  ;;  %v2084_v23 = vpop.permute.xlu0 %2083  ;;  %v2034_v1 = vsel %vm370_vm1, %v2028_v35, %v2033_v46  ;;  %vm2253_vm1 = vcmask 834560  }
 0x24c   : > { %v2058_v59 = vrot.slane %v2055_v22, 4  ;;  %v2086_v56 = vrot.slane %v2084_v23, 4  ;;  %v2037_v12 = vadd.f32 %v2034_v1, %v2008_v3  ;;  %v2093_v13 = vadd.f32 %v2084_v23, %v2065_v8 }
 0x24e   : > { %v2060_v2 = vsel %vm378_vm0, %v2058_v59, %v2059_v53 }
 0x24f   : > { %v2082_v24 = vpop.permute.xlu1 %2081  ;;  %v2112_v25 = vpop.permute.xlu0 %2111  ;;  %v2061_v38 = vsel %vm698_vm3, %v2055_v22, %v2060_v2  ;;  %vm2396_vm3 = vcmask 654336  }
 0x250   : > { %v2085_v62 = vrot.slane %v2082_v24, 4  ;;  %v2114_v4 = vrot.slane %v2112_v25, 4  ;;  %v2064_v37 = vadd.f32 %v2061_v38, %v2037_v12  ;;  %v2121_v14 = vadd.f32 %v2112_v25, %v2093_v13 }
 0x252   : > { %v2087_v15 = vsel %vm378_vm0, %v2085_v62, %v2086_v56 }
 0x253   : > { %v2110_v36 = vpop.permute.xlu1 %2109  ;;  %v2140_v26 = vpop.permute.xlu0 %2139  ;;  %v2089_v10 = vsel %vm2088_vm13, %v2082_v24, %v2087_v15  ;;  %vm2657_vm13 = vcmask 302080  }
 0x254   : > { %v2113_v63 = vrot.slane %v2110_v36, 4  ;;  %v2142_v52 = vrot.slane %v2140_v26, 4  ;;  %v2092_v35 = vadd.f32 %v2089_v10, %v2064_v37  ;;  %v2148_v21 = vadd.f32 %v2140_v26, %v2121_v14 }
 0x256   : > { %v2115_v42 = vsel %vm378_vm0, %v2113_v63, %v2114_v4 }
 0x257   : > { %v2138_v29 = vpop.permute.xlu1 %2137  ;;  %v2167_v30 = vpop.permute.xlu0 %2166  ;;  %v2117_v17 = vsel %vm2116_vm14, %v2110_v36, %v2115_v42  ;;  %vm2686_vm14 = vcmask 293888  }
 0x258   : > { %v2141_v9 = vrot.slane %v2138_v29, 4  ;;  %v2169_v18 = vrot.slane %v2167_v30, 4  ;;  %v2120_v28 = vadd.f32 %v2117_v17, %v2092_v35  ;;  %v2175_v45 = vadd.f32 %v2167_v30, %v2148_v21 }
 0x25a   : > { %v2143_v16 = vsel %vm378_vm0, %v2141_v9, %v2142_v52 }
 0x25b   : > { %v3872_v33 = vpop.permute.xlu1 %2164  ;;  %v3874_v34 = vpop.permute.xlu0 %2193  ;;  %v2144_v22 = vsel %vm875_vm4, %v2138_v29, %v2143_v16  ;;  %vm2425_vm4 = vcmask 506880  }
 0x25c   : > { %v2168_v0 = vrot.slane %v3872_v33, 4  ;;  %v2196_v24 = vrot.slane %v3874_v34, 4  ;;  %v2147_v26 = vadd.f32 %v2144_v22, %v2120_v28  ;;  %v2202_v53 = vadd.f32 %v3874_v34, %v2175_v45 }
 0x25e   : > { %v2170_v23 = vsel %vm378_vm0, %v2168_v0, %v2169_v18 }
 0x25f   : > { %v3876_v39 = vpop.permute.xlu1 %2191  ;;  %v3878_v40 = vpop.permute.xlu0 %2220  ;;  %v2171_v29 = vsel %vm1052_vm5, %v3872_v33, %v2170_v23  ;;  %vm2454_vm5 = vcmask 498688  }
 0x260   : > { %v2195_v7 = vrot.slane %v3876_v39, 4  ;;  %v2223_v49 = vrot.slane %v3878_v40, 4  ;;  %v2174_v33 = vadd.f32 %v2171_v29, %v2147_v26  ;;  %v2230_v3 = vadd.f32 %v3878_v40, %v2202_v53 }
 0x262   : > { %v2197_v36 = vsel %vm378_vm0, %v2195_v7, %v2196_v24 }
 0x263   : > { %v3880_v41 = vpop.permute.xlu1 %2218  ;;  %v3882_v43 = vpop.permute.xlu0 %2248  ;;  %v2198_v2 = vsel %vm1229_vm6, %v3876_v39, %v2197_v36  ;;  %vm2483_vm6 = vcmask 490496  }
 0x264   : > { %v2222_v25 = vrot.slane %v3880_v41, 4  ;;  %v2251_v30 = vrot.slane %v3882_v43, 4  ;;  %v2201_v9 = vadd.f32 %v2198_v2, %v2174_v33  ;;  %v2258_v38 = vadd.f32 %v3882_v43, %v2230_v3 }
 0x266   : > { %v2224_v62 = vsel %vm378_vm0, %v2222_v25, %v2223_v49 }
 0x267   : > { %v3884_v48 = vpop.permute.xlu1 %2246  ;;  %v3886_v50 = vpop.permute.xlu0 %2278  ;;  %v2226_v15 = vsel %vm2225_vm15, %v3880_v41, %v2224_v62  ;;  %vm2745_vm15 = vcmask 779264  }
 0x268   : > { %v2250_v59 = vrot.slane %v3884_v48, 4  ;;  %v2281_v46 = vrot.slane %v3886_v50, 4  ;;  %v2229_v10 = vadd.f32 %v2226_v15, %v2201_v9 }
 0x26a   : > { %v2252_v1 = vsel %vm378_vm0, %v2250_v59, %v2251_v30  ;;  %v2284_v4 = vsel %vm1406_vm7, %v3886_v50, %v2281_v46 }
 0x26b   : > { %v3888_v57 = vpop.permute.xlu1 %2276  ;;  %v3890_v58 = vpop.permute.xlu0 %2306  ;;  %v2254_v40 = vsel %vm2253_vm1, %v3884_v48, %v2252_v1  ;;  %v2288_v50 = vadd.f32 %v2284_v4, %v2258_v38  ;;  %vm2721_vm1 = vcmask 781312  }
 0x26c   : > { %v2280_v61 = vrot.slane %v3888_v57, 4  ;;  %v2309_v56 = vrot.slane %v3890_v58, 4  ;;  %v2257_v16 = vadd.f32 %v2254_v40, %v2229_v10 }
 0x26e   : > { %v2282_v12 = vsel %vm378_vm0, %v2280_v61, %v2281_v46  ;;  %v2312_v42 = vsel %vm1583_vm8, %v3890_v58, %v2309_v56 }
 0x26f   : > { %v3895_v54 = vpop.permute.xlu1 %2304  ;;  %v3897_v55 = vpop.permute.xlu0 %2334  ;;  %v2283_v14 = vsel %vm1406_vm7, %v3888_v57, %v2282_v12  ;;  %v2316_v17 = vadd.f32 %v2312_v42, %v2288_v50  ;;  %vm2512_vm7 = vcmask 482304  }
 0x270   : > { %v2308_v34 = vrot.slane %v3895_v54, 4  ;;  %v2337_v39 = vrot.slane %v3897_v55, 4 }
 0x272   : > { %v2310_v0 = vsel %vm378_vm0, %v2308_v34, %v2309_v56  ;;  %v2340_v48 = vsel %vm1760_vm9, %v3897_v55, %v2337_v39  ;;  %v2287_v55 = vadd.f32 %v2283_v14, %v2257_v16 }
 0x273   : > { %v3903_v5 = vpop.permute.xlu1 %2332  ;;  %v3906_v11 = vpop.permute.xlu0 %2362  ;;  %v2311_v35 = vsel %vm1583_vm8, %v3895_v54, %v2310_v0  ;;  %v2344_v23 = vadd.f32 %v2340_v48, %v2316_v17  ;;  %vm2541_vm8 = vcmask 474112  }
 0x274   : > { %v2336_v13 = vrot.slane %v3903_v5, 4  ;;  %v2365_v41 = vrot.slane %v3906_v11, 4 }
 0x276   : > { %v2338_v18 = vsel %vm378_vm0, %v2336_v13, %v2337_v39  ;;  %v2369_v21 = vsel %vm2367_vm2, %v3906_v11, %v2365_v41  ;;  %v2315_v11 = vadd.f32 %v2311_v35, %v2287_v55 }
 0x277   : > { %v3911_v44 = vpop.permute.xlu1 %2360  ;;  %v3914_v6 = vpop.permute.xlu0 %2391  ;;  %v2339_v45 = vsel %vm1760_vm9, %v3903_v5, %v2338_v18  ;;  %v2373_v49 = vadd.f32 %v2369_v21, %v2344_v23 }
 0x278   : > { %v2364_v37 = vrot.slane %v3911_v44, 4  ;;  %v2394_v58 = vrot.slane %v3914_v6, 4  ;;  %v2343_v5 = vadd.f32 %v2339_v45, %v2315_v11 }
 0x27a   : > { %v2366_v24 = vsel %vm378_vm0, %v2364_v37, %v2365_v41  ;;  %v2398_v54 = vsel %vm2396_vm3, %v3914_v6, %v2394_v58 }
 0x27b   : > { %v3920_v51 = vpop.permute.xlu1 %2389  ;;  %v3925_v60 = vpop.permute.xlu0 %2420  ;;  %v2368_v29 = vsel %vm2367_vm2, %v3911_v44, %v2366_v24  ;;  %v2402_v30 = vadd.f32 %v2398_v54, %v2373_v49  ;;  %v2655_v54 = vrot.slane %v3864_v20, 4  ;;  %vm2800_vm2 = vcmask 785414  }
 0x27c   : > { %v2393_v7 = vrot.slane %v3920_v51, 4  ;;  %v2423_v57 = vrot.slane %v3925_v60, 4  ;;  %v2372_v44 = vadd.f32 %v2368_v29, %v2343_v5 }
 0x27e   : > { %v2395_v59 = vsel %vm378_vm0, %v2393_v7, %v2394_v58  ;;  %v2427_v46 = vsel %vm2425_vm4, %v3925_v60, %v2423_v57 }
 0x27f   : > { %v3937_v63 = vpop.permute.xlu1 %2418  ;;  %v2450_v8 = vpop.permute.xlu0 %2449  ;;  %v2397_v56 = vsel %vm2396_vm3, %v3920_v51, %v2395_v59  ;;  %v2431_v1 = vadd.f32 %v2427_v46, %v2402_v30  ;;  %vm2972_vm3 = vcmask 785408  }
 0x280   : > { %v2422_v25 = vrot.slane %v3937_v63, 4  ;;  %v2452_v36 = vrot.slane %v2450_v8, 4  ;;  %v2401_v38 = vadd.f32 %v2397_v56, %v2372_v44 }
 0x282   : > { %v2424_v6 = vsel %vm378_vm0, %v2422_v25, %v2423_v57  ;;  %v2456_v33 = vsel %vm2454_vm5, %v2450_v8, %v2452_v36 }
 0x283   : > { %v2448_v52 = vpop.permute.xlu1 %2447  ;;  %v2479_v43 = vpop.permute.xlu0 %2478  ;;  %v2426_v15 = vsel %vm2425_vm4, %v3937_v63, %v2424_v6  ;;  %v2460_v12 = vadd.f32 %v2456_v33, %v2431_v1 }
 0x284   : > { %v2451_v26 = vrot.slane %v2448_v52, 4  ;;  %v2481_v53 = vrot.slane %v2479_v43, 4  ;;  %v2430_v10 = vadd.f32 %v2426_v15, %v2401_v38 }
 0x286   : > { %v2453_v60 = vsel %vm378_vm0, %v2451_v26, %v2452_v36  ;;  %v2485_v4 = vsel %vm2483_vm6, %v2479_v43, %v2481_v53 }
 0x287   : > { %v2477_v22 = vpop.permute.xlu1 %2476  ;;  %v2508_v28 = vpop.permute.xlu0 %2507  ;;  %v2455_v40 = vsel %vm2454_vm5, %v2448_v52, %v2453_v60  ;;  %v2489_v50 = vadd.f32 %v2485_v4, %v2460_v12  ;;  %v2704_v12 = vrot.slane %v3859_v19, %v3686_v47 }
 0x288   : > { %v2480_v61 = vrot.slane %v2477_v22, 4  ;;  %v2510_v3 = vrot.slane %v2508_v28, 4  ;;  %v2459_v14 = vadd.f32 %v2455_v40, %v2430_v10 }
 0x28a   : > { %v2482_v51 = vsel %vm378_vm0, %v2480_v61, %v2481_v53  ;;  %v2514_v42 = vsel %vm2512_vm7, %v2508_v28, %v2510_v3  ;;  %v2659_v61 = vsel %vm2657_vm13, %v3864_v20, %v2655_v54 }
 0x28b   : > { %v2506_v62 = vpop.permute.xlu1 %2505  ;;  %v2537_v2 = vpop.permute.xlu0 %2536  ;;  %v2484_v0 = vsel %vm2483_vm6, %v2477_v22, %v2482_v51  ;;  %v2518_v48 = vadd.f32 %v2514_v42, %v2489_v50 }
 0x28c   : > { %v2509_v34 = vrot.slane %v2506_v62, 4  ;;  %v2539_v39 = vrot.slane %v2537_v2, 4  ;;  %v2488_v35 = vadd.f32 %v2484_v0, %v2459_v14 }
 0x28e   : > { %v2511_v63 = vsel %vm378_vm0, %v2509_v34, %v2510_v3  ;;  %v2543_v37 = vsel %vm2541_vm8, %v2537_v2, %v2539_v39 }
 0x28f   : > { %v2535_v9 = vpop.permute.xlu1 %2534  ;;  %v2566_v13 = vpop.permute.xlu0 %2565  ;;  %v2513_v17 = vsel %vm2512_vm7, %v2506_v62, %v2511_v63  ;;  %v2547_v21 = vadd.f32 %v2543_v37, %v2518_v48 }
 0x290   : > { %v2538_v8 = vrot.slane %v2535_v9, 4  ;;  %v2568_v41 = vrot.slane %v2566_v13, 4  ;;  %v2517_v24 = vadd.f32 %v2513_v17, %v2488_v35 }
 0x292   : > { %v2540_v58 = vsel %vm378_vm0, %v2538_v8, %v2539_v39  ;;  %v2572_v18 = vsel %vm2570_vm10, %v2566_v13, %v2568_v41 }
 0x293   : > { %v2564_v43 = vpop.permute.xlu1 %2563  ;;  %v2595_v52 = vpop.permute.xlu0 %2594  ;;  %v2542_v22 = vsel %vm2541_vm8, %v2535_v9, %v2540_v58  ;;  %v2576_v25 = vadd.f32 %v2572_v18, %v2547_v21 }
 0x294   : > { %v2567_v16 = vrot.slane %v2564_v43, 4  ;;  %v2597_v7 = vrot.slane %v2595_v52, 4  ;;  %v2546_v49 = vadd.f32 %v2542_v22, %v2517_v24 }
 0x296   : > { %v2569_v57 = vsel %vm378_vm0, %v2567_v16, %v2568_v41  ;;  %v2601_v55 = vsel %vm2599_vm11, %v2595_v52, %v2597_v7 }
 0x297   : > { %v2593_v23 = vpop.permute.xlu1 %2592  ;;  %v2624_v45 = vpop.permute.xlu0 %2623  ;;  %v2571_v36 = vsel %vm2570_vm10, %v2564_v43, %v2569_v57  ;;  %v2605_v59 = vadd.f32 %v2601_v55, %v2576_v25 }
 0x298   : > { %v2596_v28 = vrot.slane %v2593_v23, 4  ;;  %v2626_v11 = vrot.slane %v2624_v45, 4  ;;  %v2575_v62 = vadd.f32 %v2571_v36, %v2546_v49 }
 0x29a   : > { %v2598_v26 = vsel %vm378_vm0, %v2596_v28, %v2597_v7  ;;  %v2630_v46 = vsel %vm2628_vm12, %v2624_v45, %v2626_v11 }
 0x29b   : > { %v2600_v29 = vsel %vm2599_vm11, %v2593_v23, %v2598_v26  ;;  %v2622_v53 = vpop.permute.xlu1 %2621  ;;  %v2634_v5 = vadd.f32 %v2630_v46, %v2605_v59  ;;  %v2651_v6 = vpop.permute.xlu0 %2650 }
 0x29c   : > { %v2625_v30 = vrot.slane %v2622_v53, 4  ;;  %v2654_v2 = vrot.slane %v2651_v6, 4  ;;  %v2604_v56 = vadd.f32 %v2600_v29, %v2575_v62 }
 0x29d   : > { %v2663_v3 = vadd.f32 %v2659_v61, %v2634_v5 }
 0x29e   : > { %v2627_v33 = vsel %vm378_vm0, %v2625_v30, %v2626_v11  ;;  %v2656_v1 = vsel %vm378_vm0, %v2654_v2, %v2655_v54 }
 0x29f   : > { %v2629_v44 = vsel %vm2628_vm12, %v2622_v53, %v2627_v33  ;;  %v2682_v60 = vpop.permute.xlu1 %2681  ;;  %v2680_v4 = vpop.permute.xlu0 %2679  ;;  %v2658_v39 = vsel %vm2657_vm13, %v2651_v6, %v2656_v1 }
 0x2a0   : > { %v2633_v34 = vadd.f32 %v2629_v44, %v2604_v56  ;;  %v2684_v15 = vrot.slane %v2682_v60, 4  ;;  %v2683_v9 = vrot.slane %v2680_v4, 4 }
 0x2a2   : > { %v2662_v38 = vadd.f32 %v2658_v39, %v2633_v34  ;;  %v2688_v20 = vsel %vm2686_vm14, %v2682_v60, %v2684_v15  ;;  %v2685_v8 = vsel %vm378_vm0, %v2683_v9, %v2684_v15  ;;  %vm2788_vm0 = vcmask 783364  }
 0x2a3   : > { %v2692_v51 = vadd.f32 %v2688_v20, %v2663_v3  ;;  %v2736_v13 = vpop.permute.xlu1 %2735  ;;  %v2687_v40 = vsel %vm2686_vm14, %v2680_v4, %v2685_v8  ;;  %v2730_v42 = vpop.permute.xlu0 %2729 }
 0x2a4   : > { %v2691_v10 = vadd.f32 %v2687_v40, %v2662_v38 }
 0x2a5   : > { %v2707_v41 = vadd.f32 %v2704_v12, %v2692_v51 }
 0x2a6   : > { %v2706_v63 = vadd.f32 %v2704_v12, %v2691_v10 }
 0x2a7   : > { %v2709_v50 = vsub.f32 0.0, %v2707_v41  ;;  %v2732_v0 = vpop.permute.xlu1 %2731  ;;  %v2734_v19 = vpop.permute.xlu0 %2733 }
 0x2a8   : > { %v2737_v47 = vsel %vm1760_vm9, %v2730_v42, %v2732_v0  ;;  %v2708_v43 = vsub.f32 0.0, %v2706_v63  ;;  %v2738_v14 = vsel %vm1760_vm9, %v2732_v0, %v2734_v19  ;;  %v2739_v48 = vsel %vm1760_vm9, %v2734_v19, %v2736_v13 }
 0x2a9   : > { %v2712_v37 = vmul.f32 1.442695, %v2709_v50  ;;  %2743 = vst [vmem:[%s4016_s24] sm:$0x3] %v2737_v47  ;;  %2744 = vst [vmem:[%s4016_s24 + $0x8] sm:$0x3] %v2738_v14 }
 0x2aa   : > { %2746 = vst.msk [vmem:[%s4016_s24 + $0x10] sm:$0x3] %vm2745_vm15, %v2739_v48  ;;  %v2710_v58 = vmul.f32 1.442695, %v2708_v43 }
 0x2ab   : > { %3274 = vpow2.f32 %v2712_v37  ;;  %v2775_v16 = vpop.permute.xlu1 %2774  ;;  %v2777_v52 = vpop.permute.xlu0 %2776 }
 0x2ac   : > { %3276 = vpow2.f32 %v2710_v58  ;;  %v2781_v17 = vsel %vm1760_vm9, %v2775_v16, %v2777_v52 }
 0x2ad   : > { %2787 = vst [vmem:[%s4016_s24 + $0x8] sm:$0x30] %v2781_v17 }
 0x2af   : > { %v2779_v18 = vpop.permute.xlu1 %2778  ;;  %v2773_v35 = vpop.permute.xlu0 %2772 }
 0x2b0   : > { %v2782_v7 = vsel %vm1760_vm9, %v2777_v52, %v2779_v18  ;;  %v2780_v21 = vsel %vm1760_vm9, %v2773_v35, %v2775_v16  ;;  %vm2760_vm9 = vcmask 781314  }
 0x2b1   : > { %2789 = vst.msk [vmem:[%s4016_s24 + $0x10] sm:$0x30] %vm2788_vm0, %v2782_v7  ;;  %2786 = vst [vmem:[%s4016_s24] sm:$0x30] %v2780_v21 }
 0x2b5   : > { %v3275_v57 = vpop.eup %3274 }
 0x2b6   : > { %v2715_v22 = vadd.f32 1.0, %v3275_v57  ;;  %v3277_v55 = vpop.eup %3276 }
 0x2b7   : > { %v2714_v23 = vadd.f32 1.0, %v3277_v55 }
 0x2b8   : > { %3278 = vrcp.f32 %v2715_v22 }
 0x2b9   : > { %3280 = vrcp.f32 %v2714_v23 }
 0x2c0   : > { %v2809_v53 = vpop.permute.xlu0 %2808 }
 0x2c1   : > { %v2961_v5 = vadd.f32 %v3866_v27, %v2809_v53  ;;  %v2890_v30 = vadd.f32 %v3868_v31, %v2809_v53  ;;  %v2892_v2 = vadd.f32 %v3870_v32, %v2809_v53 }
 0x2c2   : > { %v3279_v24 = vpop.eup %3278 }
 0x2c3   : > { %v2719_v25 = vmul.f32 %v3279_v24, %v2707_v41  ;;  %v3281_v28 = vpop.eup %3280 }
 0x2c4   : > { %v2718_v45 = vmul.f32 %v3281_v28, %v2706_v63 }
 0x2c5   : > { %2722 = vst.msk [vmem:[#allocation3 + $0x8] sm:$0xf] %vm2721_vm1, %v2719_v25 }
 0x2c6   : > { %2720 = vst [vmem:[#allocation3] sm:$0xff] %v2718_v45 }
 0x2cc   : > { %v2748_v54 = vld [vmem:[#allocation3 + $0x8] sm:$0x3] }
 0x2cd   : > { %v2754_v36 = vrot.slane %v2748_v54, 6  ;;  %v3255_v11 = vld [vmem:[#allocation3 + $0x8] ss:$0 sps:$4 sm:$0xcc]   ;;  %v2747_v49 = vld [vmem:[#allocation3] sm:$0x33] }
 0x2ce   : > { %v2790_v59 = vld [vmem:[#allocation3] sm:$0xcc]  ;;  %2801 = vst.msk [vmem:[%s4016_s24 + $0x10] sm:$0xc0] %vm2800_vm2, %v3255_v11  ;;  %v2752_v26 = vrot.slane %v2747_v49, 6  ;;  %v2751_v46 = vcombine.high %v2747_v49, %v2747_v49 }
 0x2cf   : > { %2761 = vst.msk [vmem:[%s4016_s24 + $0x10] sm:$0xc] %vm2760_vm9, %v2754_v36  ;;  %v2794_v29 = vcombine.low %v2790_v59, %v2790_v59  ;;  %2799 = vst [vmem:[%s4016_s24 + $0x8] sm:$0xc0] %v2790_v59 }
 0x2d0   : > { %2758 = vst [vmem:[%s4016_s24] sm:$0xc] %v2752_v26  ;;  %v2753_v62 = vrot.slane %v2751_v46, 6 }
 0x2d1   : > { %2798 = vst [vmem:[%s4016_s24] sm:$0xc0] %v2794_v29 }
 0x2d2   : > { %2759 = vst [vmem:[%s4016_s24 + $0x8] sm:$0xc] %v2753_v62 }
 0x2d6   : > { %v2966_v6 = vld [vmem:[%s4016_s24 + $0x10] sm:$0xff] }
 0x2d7   : > { %v2969_v61 = vadd.f32 %v2966_v6, %v2961_v5 }
 0x2d8   : > { %v2964_v56 = vld [vmem:[%s4016_s24] sm:$0xff] }
 0x2d9   : > { %2973 = vst.msk [vmem:[%s4016_s24 + $0x10] sm:$0xff] %vm2972_vm3, %v2969_v61  ;;  %v2967_v33 = vadd.f32 %v2964_v56, %v2890_v30  ;;  %v2965_v3 = vld [vmem:[%s4016_s24 + $0x8] sm:$0xff] }
 0x2da   : > { %v2968_v44 = vadd.f32 %v2965_v3, %v2892_v2 }
 0x2db   : > { %2970 = vst [vmem:[%s4016_s24] sm:$0xff] %v2967_v33 }
 0x2dc   : > { %2971 = vst [vmem:[%s4016_s24 + $0x8] sm:$0xff] %v2968_v44 }
 0x2dd PF: > { %s19_s30 = sadd.s32 1, %s3288_s30  }
 0x2de   : > { %p16_p4 = scmp.ge.s32.totalorder %s19_s30, 4  }
 0x2e0   :  { %18 = sbr.rel (!%p16_p4) target bundleno = 1 (0x1), region = 97 }

</bundles_post_ra>
